<compile_context>
chip_gen: v6e
topology: v6e:2x2x1
jax: 0.10.0
libtpu: 0.0.40
codegen_flags: <defaults>
</compile_context>

<pallas_src>
import jax
import jax.numpy as jnp
from jax import lax
from jax.experimental import pallas as pl
from jax.experimental.pallas import tpu as pltpu

# ---------------- small, module-consistent config ----------------
B = 2            # batch
IN_CH = 1        # OverlapPatchEmbed in_chans
IMG = 16         # image size (PyTorch default 1024)
PH = PW = 8      # patch size (PyTorch default 128)
STRIDE = 4       # stride    (PyTorch default 64)
PAD = PH // 2    # padding
C = 32           # embed_dim (PyTorch default 768)
H_HEADS = 8      # num_heads
HD = C // H_HEADS
SCALE = HD ** -0.5
NUM_BLOCKS = 2   # num_blocks (PyTorch default 6)
HO = (IMG + 2 * PAD - PH) // STRIDE + 1
P_SEQ = HO * HO              # num_seq (positions)
K_PATCH = IN_CH * PH * PW    # im2col feature size
LN_EPS = 1e-5
VMEM_LIMIT = 32 * 1024 * 1024   # explicit scoped-VMEM budget (<= all chips)
REF_PREC = lax.Precision.HIGHEST  # reference-only precision


# ============================ kernels =============================

def patch_embed_kernel(p_ref, wT_ref, b_ref, g_ref, be_ref, pos_ref,
                       o_ref, acc_ref):
    # p_ref : (B, tk, P) bf16  K-major im2col patches (no host transpose)
    # wT_ref: (tk, C)   bf16   flattened conv weight, pre-transposed
    # b/g/be: (1, C)    f32    conv bias / LN gamma / LN beta
    # pos   : (P, C)    f32    positional table
    # o_ref : (B, P, C) f32    acc_ref: VMEM (B, P, C) f32 K-tile accumulator
    kt = pl.program_id(0)

    @pl.when(kt == 0)
    def _():
        acc_ref[...] = jnp.zeros_like(acc_ref)

    # Batch folded into the GEMM M: the weight tile sits in VMEM once per
    # K-tile and is reused by every batch element.
    for b in range(p_ref.shape[0]):   # static batch loop
        acc_ref[b] += lax.dot_general(            # (tk,P)^T @ (tk,C) on MXU
            p_ref[b], wT_ref[...], (((0,), (0,)), ((), ())),
            preferred_element_type=jnp.float32)

    @pl.when(kt == pl.num_programs(0) - 1)
    def _():
        y = acc_ref[...] + b_ref[...]                      # (B, P, C) f32
        mu = jnp.mean(y, axis=-1, keepdims=True)
        var = jnp.mean(jnp.square(y - mu), axis=-1, keepdims=True)
        yn = (y - mu) * lax.rsqrt(var + LN_EPS)
        o_ref[...] = yn * g_ref[...] + be_ref[...] + pos_ref[...]


def guidance_block_kernel(sam_ref, pl_ref, wq_s_ref, wq_p_ref, wkv_s_ref,
                          wkv_p_ref, wp_ref, bp_ref, o_ref, attn_ref):
    # One fused Guidance block for one batch element.  Tokens stay f32 for the
    # residual adds; all matmuls are bf16 x bf16 with f32 accumulation.
    sam = sam_ref[0]                     # (N, C) f32
    plx = pl_ref[0]                      # (N, C) f32
    n, c = sam.shape
    sam_bf = sam.astype(jnp.bfloat16)
    plx_bf = plx.astype(jnp.bfloat16)

    def mm(a, b):                        # bf16 MXU matmul, f32 accumulate
        return jnp.dot(a, b, preferred_element_type=jnp.float32)

    def attend_into_scratch(q, k, v):
        # q/k/v: (N, C) bf16.  Each head's output is written straight into the
        # f32 VMEM scratch at its static lane offset, so only one head's
        # intermediates are live at a time (no concatenate copy).
        # (scale already folded into the query weights)
        for h in range(H_HEADS):
            s0 = h * HD
            qh = q[:, s0:s0 + HD]
            kh = k[:, s0:s0 + HD]
            vh = v[:, s0:s0 + HD]
            s = lax.dot_general(qh, kh, (((1,), (1,)), ((), ())),
                                preferred_element_type=jnp.float32)
            m = jnp.max(s, axis=-1, keepdims=True)
            e = jnp.exp(s - m)
            l = jnp.sum(e, axis=-1, keepdims=True)
            p = (e * pl.reciprocal(l, approx=True)).astype(jnp.bfloat16)
            attn_ref[:, s0:s0 + HD] = mm(p, vh)            # (N, HD) f32

    # --- attention #1: Q from pl_source, K/V from sam ------------------
    q_pl = mm(plx_bf, wq_p_ref[...]).astype(jnp.bfloat16)     # (N, C)
    kv_sam = mm(sam_bf, wkv_s_ref[...]).astype(jnp.bfloat16)  # (N, 2C)
    attend_into_scratch(q_pl, kv_sam[:, :c], kv_sam[:, c:])
    g_sam = mm(attn_ref[...].astype(jnp.bfloat16), wp_ref[...]) \
        + bp_ref[...] + sam                                   # (N, C) f32

    # --- attention #2: Q from sam, K/V from pl_source ------------------
    q_sam = mm(sam_bf, wq_s_ref[...]).astype(jnp.bfloat16)
    kv_pl = mm(plx_bf, wkv_p_ref[...]).astype(jnp.bfloat16)
    attend_into_scratch(q_sam, kv_pl[:, :c], kv_pl[:, c:])
    # Same proj weight for both paths (PyTorch quirk: proj_pl_source is a
    # Dropout; the forward uses proj_sam for both).
    g_pl = mm(attn_ref[...].astype(jnp.bfloat16), wp_ref[...]) \
        + bp_ref[...] + plx

    # Encoder returns guidance_sam + guidance_pl -> fuse the final sum here.
    o_ref[0] = g_sam + g_pl


# ============================ wrappers ============================

def extract_patches(x):
    # x: (B, Cin, H, W) -> (B, Cin*PH*PW, P) bf16, K-major (no host transpose).
    p = lax.conv_general_dilated_patches(
        x, filter_shape=(PH, PW), window_strides=(STRIDE, STRIDE),
        padding=((PAD, PAD), (PAD, PAD)),
        dimension_numbers=('NCHW', 'OIHW', 'NCHW'),
        precision=REF_PREC)
    return p.reshape(p.shape[0], K_PATCH, HO * HO).astype(jnp.bfloat16)


def _k_tile(k):
    # Reduction-dim tile: whole K if small, else a multiple of 128 <= 1024
    # (1024 keeps the double-buffered blocks inside v5e's scoped-VMEM budget).
    if k <= 1024:
        return k
    for tk in range(1024, 127, -128):
        if k % tk == 0:
            return tk
    return k


def patch_embed_ln(patches, wT, b2d, g2d, be2d, pos):
    bb, k, p = patches.shape
    tk = _k_tile(k)
    nkt = k // tk
    return pl.pallas_call(
        patch_embed_kernel,
        out_shape=jax.ShapeDtypeStruct((bb, p, C), jnp.float32),
        grid=(nkt,),
        in_specs=[
            pl.BlockSpec((bb, tk, p), lambda kt: (0, kt, 0)),
            pl.BlockSpec((tk, C), lambda kt: (kt, 0)),
            pl.BlockSpec((1, C), lambda kt: (0, 0)),
            pl.BlockSpec((1, C), lambda kt: (0, 0)),
            pl.BlockSpec((1, C), lambda kt: (0, 0)),
            pl.BlockSpec((p, C), lambda kt: (0, 0)),
        ],
        out_specs=pl.BlockSpec((bb, p, C), lambda kt: (0, 0, 0)),
        scratch_shapes=[pltpu.VMEM((bb, p, C), jnp.float32)],
        compiler_params=pltpu.CompilerParams(
            dimension_semantics=("arbitrary",),       # K is a reduction axis
            vmem_limit_bytes=VMEM_LIMIT),
    )(patches, wT, b2d, g2d, be2d, pos)


def guidance_block(sam_e, pl_e, blk):
    bb, n, c = sam_e.shape
    tok = pl.BlockSpec((1, n, c), lambda b: (b, 0, 0))

    def wspec(r, cc):
        return pl.BlockSpec((r, cc), lambda b: (0, 0))

    return pl.pallas_call(
        guidance_block_kernel,
        out_shape=jax.ShapeDtypeStruct((bb, n, c), jnp.float32),
        grid=(bb,),
        in_specs=[tok, tok,
                  wspec(c, c), wspec(c, c),
                  wspec(c, 2 * c), wspec(c, 2 * c),
                  wspec(c, c), wspec(1, c)],
        out_specs=tok,
        scratch_shapes=[pltpu.VMEM((n, c), jnp.float32)],   # attn head output
        compiler_params=pltpu.CompilerParams(
            dimension_semantics=("parallel",),      # batch over v7x megacore
            vmem_limit_bytes=VMEM_LIMIT),
    )(sam_e, pl_e, blk['wq_samT'], blk['wq_plT'], blk['wkv_samT'],
      blk['wkv_plT'], blk['wpT'], blk['bp2d'])


def prepare_kernel_params(params):
    # One-time host-side weight re-layout (outside jit): pre-transposed bf16
    # matmul weights (attention SCALE folded into the query weights), 2-D f32
    # biases, conv weight flattened to (K, C) bf16.
    def embed(p):
        return dict(wT=p['conv_w'].reshape(C, K_PATCH).T.astype(jnp.bfloat16),
                    b2d=p['conv_b'].reshape(1, C),
                    g2d=p['gamma'].reshape(1, C),
                    be2d=p['beta'].reshape(1, C))

    def block(b):
        return dict(
            wq_samT=(b['wq_sam'] * SCALE).T.astype(jnp.bfloat16),
            wq_plT=(b['wq_pl'] * SCALE).T.astype(jnp.bfloat16),
            wkv_samT=b['wkv_sam'].T.astype(jnp.bfloat16),
            wkv_plT=b['wkv_pl'].T.astype(jnp.bfloat16),
            wpT=b['wp'].T.astype(jnp.bfloat16),
            bp2d=b['bp'].reshape(1, C))

    return dict(pos=params['pos_table'],
                sam_embed=embed(params['sam_embed']),
                pl_embed=embed(params['pl_embed']),
                blocks=[block(b) for b in params['blocks']])


def encoder_forward(sam_img, pl_img, kp):
    pos = kp['pos']
    pe_s, pe_p = kp['sam_embed'], kp['pl_embed']
    sam_e = patch_embed_ln(extract_patches(sam_img), pe_s['wT'], pe_s['b2d'],
                           pe_s['g2d'], pe_s['be2d'], pos)
    pl_e = patch_embed_ln(extract_patches(pl_img), pe_p['wT'], pe_p['b2d'],
                          pe_p['g2d'], pe_p['be2d'], pos)
    # The PyTorch loop feeds (sam_embed, pl_embed) to EVERY block and only the
    # last block's outputs reach the return, so earlier blocks are dead work:
    # execute only the last block (don't rely on XLA DCE of dead pallas_calls).
    return guidance_block(sam_e, pl_e, kp['blocks'][-1])


# ======================= params & reference =======================

def split_heads(x):   # (B, N, C) -> (B, H, N, hd)   (reference only)
    bb, n, c = x.shape
    return x.reshape(bb, n, H_HEADS, c // H_HEADS).transpose(0, 2, 1, 3)


def merge_heads(x):   # (B, H, N, hd) -> (B, N, C)   (reference only)
    bb, hh, n, hd = x.shape
    return x.transpose(0, 2, 1, 3).reshape(bb, n, hh * hd)


def init_params(key):
    keys = jax.random.split(key, 32)
    ki = iter(keys)

    def nrm(shape, scale=0.1):
        return scale * jax.random.normal(next(ki), shape, dtype=jnp.float32)

    def embed_params():
        return dict(conv_w=nrm((C, IN_CH, PH, PW)), conv_b=nrm((C,)),
                    gamma=jnp.ones((C,), jnp.float32),
                    beta=jnp.zeros((C,), jnp.float32))

    return dict(pos_table=nrm((P_SEQ, C)),
                sam_embed=embed_params(),
                pl_embed=embed_params(),
                blocks=[dict(wq_sam=nrm((C, C)), wq_pl=nrm((C, C)),
                             wkv_sam=nrm((2 * C, C)), wkv_pl=nrm((2 * C, C)),
                             wp=nrm((C, C)), bp=nrm((C,)))
                        for _ in range(NUM_BLOCKS)])


def ref_encoder(sam_img, pl_img, params):
    # Pure-JAX f32 reference (independent conv path) for correctness check.
    def ref_pe(x, p):
        y = lax.conv_general_dilated(
            x, p['conv_w'], (STRIDE, STRIDE), ((PAD, PAD), (PAD, PAD)),
            dimension_numbers=('NCHW', 'OIHW', 'NCHW'), precision=REF_PREC)
        y = y + p['conv_b'][None, :, None, None]
        bb, cc, ho, wo = y.shape
        y = y.reshape(bb, cc, ho * wo).transpose(0, 2, 1)
        mu = y.mean(-1, keepdims=True)
        var = ((y - mu) ** 2).mean(-1, keepdims=True)
        return (y - mu) / jnp.sqrt(var + LN_EPS) * p['gamma'] + p['beta']

    def lin(x, w, b=None):
        y = jnp.einsum('bnk,ck->bnc', x, w, precision=REF_PREC)
        return y if b is None else y + b

    pos = params['pos_table']
    sam_e = ref_pe(sam_img, params['sam_embed']) + pos
    pl_e = ref_pe(pl_img, params['pl_embed']) + pos
    g_sam = g_pl = None
    for blk in params['blocks']:
        q_sam = split_heads(lin(sam_e, blk['wq_sam']))
        q_pl = split_heads(lin(pl_e, blk['wq_pl']))
        kv_sam = lin(sam_e, blk['wkv_sam'])
        k_sam, v_sam = split_heads(kv_sam[..., :C]), split_heads(kv_sam[..., C:])
        kv_pl = lin(pl_e, blk['wkv_pl'])
        k_pl, v_pl = split_heads(kv_pl[..., :C]), split_heads(kv_pl[..., C:])

        def attend(q, k, v):
            s = jnp.einsum('bhnd,bhmd->bhnm', q, k, precision=REF_PREC) * SCALE
            a = jax.nn.softmax(s, axis=-1)
            return merge_heads(jnp.einsum('bhnm,bhmd->bhnd', a, v,
                                          precision=REF_PREC))

        o_sam, o_pl = attend(q_pl, k_sam, v_sam), attend(q_sam, k_pl, v_pl)
        g_sam = lin(o_sam, blk['wp'], blk['bp']) + sam_e
        g_pl = lin(o_pl, blk['wp'], blk['bp']) + pl_e
    return g_sam + g_pl


if __name__ == "__main__":
    key = jax.random.PRNGKey(0)
    kp_, ks, kl = jax.random.split(key, 3)
    params = init_params(kp_)
    sam_img = jax.random.normal(ks, (B, IN_CH, IMG, IMG), dtype=jnp.float32)
    pl_img = jax.random.normal(kl, (B, IN_CH, IMG, IMG), dtype=jnp.float32)

    kparams = prepare_kernel_params(params)   # pre-transpose / bf16 cast once
    out = jax.jit(encoder_forward)(sam_img, pl_img, kparams)
    out = jax.block_until_ready(out)

    ref = ref_encoder(sam_img, pl_img, params)
    assert out.shape == (B, P_SEQ, C), out.shape
    # bf16 matmuls (f32 accumulation) + approximate-reciprocal softmax vs the
    # f32-HIGHEST reference: check max error relative to the output magnitude.
    err = float(jnp.max(jnp.abs(out - ref)))
    ref_mag = float(jnp.max(jnp.abs(ref)))
    assert err <= 3e-2 * ref_mag + 1e-3, (err, ref_mag)
    print("KERNEL_OK")
</pallas_src>

<mosaic_0001>
module attributes {stable_mosaic.version = 11 : i64} {
  func.func @patch_embed_kernel(%arg0: i32, %arg1: memref<2x64x25xbf16, #tpu.memory_space<vmem>>, %arg2: memref<64x32xbf16, #tpu.memory_space<vmem>>, %arg3: memref<1x32xf32, #tpu.memory_space<vmem>>, %arg4: memref<1x32xf32, #tpu.memory_space<vmem>>, %arg5: memref<1x32xf32, #tpu.memory_space<vmem>>, %arg6: memref<25x32xf32, #tpu.memory_space<vmem>>, %arg7: memref<2x25x32xf32, #tpu.memory_space<vmem>>, %arg8: memref<2x25x32xf32, #tpu.memory_space<vmem>>) attributes {dimension_semantics = [#tpu.dimension_semantics<arbitrary>], iteration_bounds = array<i64: 1>, scalar_prefetch = 0 : i64, scratch_operands = 1 : i64, tpu.core_type = #tpu.core_type<tc>, window_params = [{transform_indices = @transform_0, window_bounds = array<i64: 2, 64, 25>}, {transform_indices = @transform_1, window_bounds = array<i64: 64, 32>}, {pipeline_mode = #tpu.pipeline_mode<synchronous>, transform_indices = @transform_2, window_bounds = array<i64: 1, 32>}, {pipeline_mode = #tpu.pipeline_mode<synchronous>, transform_indices = @transform_3, window_bounds = array<i64: 1, 32>}, {pipeline_mode = #tpu.pipeline_mode<synchronous>, transform_indices = @transform_4, window_bounds = array<i64: 1, 32>}, {pipeline_mode = #tpu.pipeline_mode<synchronous>, transform_indices = @transform_5, window_bounds = array<i64: 25, 32>}, {pipeline_mode = #tpu.pipeline_mode<synchronous>, transform_indices = @transform_6, window_bounds = array<i64: 2, 25, 32>}]} {
    %c0_i32 = arith.constant 0 : i32
    %0 = arith.cmpi eq, %arg0, %c0_i32 : i32
    %1 = arith.extui %0 : i1 to i32
    %c0_i32_0 = arith.constant 0 : i32
    %2 = arith.cmpi ne, %1, %c0_i32_0 : i32
    scf.if %2 {
      %cst_24 = arith.constant 0.000000e+00 : f32
      %26 = vector.broadcast %cst_24 : f32 to vector<2x25x32xf32>
      %c0_25 = arith.constant 0 : index
      %c0_26 = arith.constant 0 : index
      %c0_27 = arith.constant 0 : index
      %27 = vector.load %arg8[%c0_25, %c0_26, %c0_27] : memref<2x25x32xf32, #tpu.memory_space<vmem>>, vector<2x25x32xf32>
      tpu.vector_store %arg8[%c0_25, %c0_26, %c0_27], %26 {strides = array<i32>} : memref<2x25x32xf32, #tpu.memory_space<vmem>>, vector<2x25x32xf32>,
    } else {
    }
    %c0 = arith.constant 0 : index
    %c0_1 = arith.constant 0 : index
    %c0_2 = arith.constant 0 : index
    %3 = vector.load %arg8[%c0, %c0_1, %c0_2] : memref<2x25x32xf32, #tpu.memory_space<vmem>>, vector<1x25x32xf32>
    %4 = vector.shape_cast %3 : vector<1x25x32xf32> to vector<25x32xf32>
    %c0_3 = arith.constant 0 : index
    %c0_4 = arith.constant 0 : index
    %c0_5 = arith.constant 0 : index
    %5 = vector.load %arg1[%c0_3, %c0_4, %c0_5] : memref<2x64x25xbf16, #tpu.memory_space<vmem>>, vector<1x64x25xbf16>
    %6 = vector.shape_cast %5 : vector<1x64x25xbf16> to vector<64x25xbf16>
    %c0_6 = arith.constant 0 : index
    %c0_7 = arith.constant 0 : index
    %7 = vector.load %arg2[%c0_6, %c0_7] : memref<64x32xbf16, #tpu.memory_space<vmem>>, vector<64x32xbf16>
    %cst = arith.constant dense<0.000000e+00> : vector<25x32xf32>
    %8 = tpu.matmul %6, %7, %cst {dimension_numbers = #tpu.dot_dimension_numbers<[0], [0], [1], [1], [0, 1, 1, 1], [], []>} : vector<64x25xbf16>, vector<64x32xbf16>, vector<25x32xf32> -> vector<25x32xf32>
    %9 = arith.addf %4, %8 : vector<25x32xf32>
    %c0_8 = arith.constant 0 : index
    %c0_9 = arith.constant 0 : index
    %c0_10 = arith.constant 0 : index
    %10 = vector.load %arg8[%c0_8, %c0_9, %c0_10] : memref<2x25x32xf32, #tpu.memory_space<vmem>>, vector<1x25x32xf32>
    %11 = vector.shape_cast %10 : vector<1x25x32xf32> to vector<25x32xf32>
    %12 = vector.shape_cast %9 : vector<25x32xf32> to vector<1x25x32xf32>
    tpu.vector_store %arg8[%c0_8, %c0_9, %c0_10], %12 {strides = array<i32>} : memref<2x25x32xf32, #tpu.memory_space<vmem>>, vector<1x25x32xf32>,
    %c1 = arith.constant 1 : index
    %c0_11 = arith.constant 0 : index
    %c0_12 = arith.constant 0 : index
    %13 = vector.load %arg8[%c1, %c0_11, %c0_12] : memref<2x25x32xf32, #tpu.memory_space<vmem>>, vector<1x25x32xf32>
    %14 = vector.shape_cast %13 : vector<1x25x32xf32> to vector<25x32xf32>
    %c1_13 = arith.constant 1 : index
    %c0_14 = arith.constant 0 : index
    %c0_15 = arith.constant 0 : index
    %15 = vector.load %arg1[%c1_13, %c0_14, %c0_15] : memref<2x64x25xbf16, #tpu.memory_space<vmem>>, vector<1x64x25xbf16>
    %16 = vector.shape_cast %15 : vector<1x64x25xbf16> to vector<64x25xbf16>
    %c0_16 = arith.constant 0 : index
    %c0_17 = arith.constant 0 : index
    %17 = vector.load %arg2[%c0_16, %c0_17] : memref<64x32xbf16, #tpu.memory_space<vmem>>, vector<64x32xbf16>
    %cst_18 = arith.constant dense<0.000000e+00> : vector<25x32xf32>
    %18 = tpu.matmul %16, %17, %cst_18 {dimension_numbers = #tpu.dot_dimension_numbers<[0], [0], [1], [1], [0, 1, 1, 1], [], []>} : vector<64x25xbf16>, vector<64x32xbf16>, vector<25x32xf32> -> vector<25x32xf32>
    %19 = arith.addf %14, %18 : vector<25x32xf32>
    %c1_19 = arith.constant 1 : index
    %c0_20 = arith.constant 0 : index
    %c0_21 = arith.constant 0 : index
    %20 = vector.load %arg8[%c1_19, %c0_20, %c0_21] : memref<2x25x32xf32, #tpu.memory_space<vmem>>, vector<1x25x32xf32>
    %21 = vector.shape_cast %20 : vector<1x25x32xf32> to vector<25x32xf32>
    %22 = vector.shape_cast %19 : vector<25x32xf32> to vector<1x25x32xf32>
    tpu.vector_store %arg8[%c1_19, %c0_20, %c0_21], %22 {strides = array<i32>} : memref<2x25x32xf32, #tpu.memory_space<vmem>>, vector<1x25x32xf32>,
    %c0_i32_22 = arith.constant 0 : i32
    %23 = arith.cmpi eq, %arg0, %c0_i32_22 : i32
    %24 = arith.extui %23 : i1 to i32
    %c0_i32_23 = arith.constant 0 : i32
    %25 = arith.cmpi ne, %24, %c0_i32_23 : i32
    scf.if %25 {
      %c0_24 = arith.constant 0 : index
      %c0_25 = arith.constant 0 : index
      %c0_26 = arith.constant 0 : index
      %26 = vector.load %arg8[%c0_24, %c0_25, %c0_26] : memref<2x25x32xf32, #tpu.memory_space<vmem>>, vector<2x25x32xf32>
      %c0_27 = arith.constant 0 : index
      %c0_28 = arith.constant 0 : index
      %27 = vector.load %arg3[%c0_27, %c0_28] : memref<1x32xf32, #tpu.memory_space<vmem>>, vector<1x32xf32>
      %28 = vector.shape_cast %27 : vector<1x32xf32> to vector<1x1x32xf32>
      %29 = vector.broadcast %28 : vector<1x1x32xf32> to vector<2x25x32xf32>
      %30 = arith.addf %26, %29 : vector<2x25x32xf32>
      %cst_29 = arith.constant dense<0.000000e+00> : vector<2x25xf32>
      %31 = vector.multi_reduction <add>, %30, %cst_29 [2] : vector<2x25x32xf32> to vector<2x25xf32>
      %32 = vector.shape_cast %31 : vector<2x25xf32> to vector<2x25x1xf32>
      %cst_30 = arith.constant 3.200000e+01 : f32
      %33 = vector.broadcast %cst_30 : f32 to vector<2x25x1xf32>
      %34 = arith.divf %32, %33 : vector<2x25x1xf32>
      %35 = vector.broadcast %34 : vector<2x25x1xf32> to vector<2x25x32xf32>
      %36 = arith.subf %30, %35 : vector<2x25x32xf32>
      %37 = arith.mulf %36, %36 : vector<2x25x32xf32>
      %cst_31 = arith.constant dense<0.000000e+00> : vector<2x25xf32>
      %38 = vector.multi_reduction <add>, %37, %cst_31 [2] : vector<2x25x32xf32> to vector<2x25xf32>
      %39 = vector.shape_cast %38 : vector<2x25xf32> to vector<2x25x1xf32>
      %cst_32 = arith.constant 3.200000e+01 : f32
      %40 = vector.broadcast %cst_32 : f32 to vector<2x25x1xf32>
      %41 = arith.divf %39, %40 : vector<2x25x1xf32>
      %42 = vector.broadcast %34 : vector<2x25x1xf32> to vector<2x25x32xf32>
      %43 = arith.subf %30, %42 : vector<2x25x32xf32>
      %cst_33 = arith.constant 9.99999974E-6 : f32
      %44 = vector.broadcast %cst_33 : f32 to vector<2x25x1xf32>
      %45 = arith.addf %41, %44 : vector<2x25x1xf32>
      %46 = math.rsqrt %45 : vector<2x25x1xf32>
      %47 = vector.broadcast %46 : vector<2x25x1xf32> to vector<2x25x32xf32>
      %48 = arith.mulf %43, %47 : vector<2x25x32xf32>
      %c0_34 = arith.constant 0 : index
      %c0_35 = arith.constant 0 : index
      %49 = vector.load %arg4[%c0_34, %c0_35] : memref<1x32xf32, #tpu.memory_space<vmem>>, vector<1x32xf32>
      %50 = vector.shape_cast %49 : vector<1x32xf32> to vector<1x1x32xf32>
      %51 = vector.broadcast %50 : vector<1x1x32xf32> to vector<2x25x32xf32>
      %52 = arith.mulf %48, %51 : vector<2x25x32xf32>
      %c0_36 = arith.constant 0 : index
      %c0_37 = arith.constant 0 : index
      %53 = vector.load %arg5[%c0_36, %c0_37] : memref<1x32xf32, #tpu.memory_space<vmem>>, vector<1x32xf32>
      %54 = vector.shape_cast %53 : vector<1x32xf32> to vector<1x1x32xf32>
      %55 = vector.broadcast %54 : vector<1x1x32xf32> to vector<2x25x32xf32>
      %56 = arith.addf %52, %55 : vector<2x25x32xf32>
      %c0_38 = arith.constant 0 : index
      %c0_39 = arith.constant 0 : index
      %57 = vector.load %arg6[%c0_38, %c0_39] : memref<25x32xf32, #tpu.memory_space<vmem>>, vector<25x32xf32>
      %58 = vector.shape_cast %57 : vector<25x32xf32> to vector<1x25x32xf32>
      %59 = vector.broadcast %58 : vector<1x25x32xf32> to vector<2x25x32xf32>
      %60 = arith.addf %56, %59 : vector<2x25x32xf32>
      %c0_40 = arith.constant 0 : index
      %c0_41 = arith.constant 0 : index
      %c0_42 = arith.constant 0 : index
      %61 = vector.load %arg7[%c0_40, %c0_41, %c0_42] : memref<2x25x32xf32, #tpu.memory_space<vmem>>, vector<2x25x32xf32>
      tpu.vector_store %arg7[%c0_40, %c0_41, %c0_42], %60 {strides = array<i32>} : memref<2x25x32xf32, #tpu.memory_space<vmem>>, vector<2x25x32xf32>,
    } else {
    }
    return
  }
  func.func @transform_0(%arg0: i32) -> (i32, i32, i32) {
    %c0_i32 = arith.constant 0 : i32
    %c0_i32_0 = arith.constant 0 : i32
    %c0_i32_1 = arith.constant 0 : i32
    return %c0_i32, %arg0, %c0_i32_0 : i32, i32, i32
  }
  func.func @transform_1(%arg0: i32) -> (i32, i32) {
    %c0_i32 = arith.constant 0 : i32
    %c0_i32_0 = arith.constant 0 : i32
    return %arg0, %c0_i32 : i32, i32
  }
  func.func @transform_2(%arg0: i32) -> (i32, i32) {
    %c0_i32 = arith.constant 0 : i32
    %c0_i32_0 = arith.constant 0 : i32
    %c0_i32_1 = arith.constant 0 : i32
    return %c0_i32, %c0_i32_0 : i32, i32
  }
  func.func @transform_3(%arg0: i32) -> (i32, i32) {
    %c0_i32 = arith.constant 0 : i32
    %c0_i32_0 = arith.constant 0 : i32
    %c0_i32_1 = arith.constant 0 : i32
    return %c0_i32, %c0_i32_0 : i32, i32
  }
  func.func @transform_4(%arg0: i32) -> (i32, i32) {
    %c0_i32 = arith.constant 0 : i32
    %c0_i32_0 = arith.constant 0 : i32
    %c0_i32_1 = arith.constant 0 : i32
    return %c0_i32, %c0_i32_0 : i32, i32
  }
  func.func @transform_5(%arg0: i32) -> (i32, i32) {
    %c0_i32 = arith.constant 0 : i32
    %c0_i32_0 = arith.constant 0 : i32
    %c0_i32_1 = arith.constant 0 : i32
    return %c0_i32, %c0_i32_0 : i32, i32
  }
  func.func @transform_6(%arg0: i32) -> (i32, i32, i32) {
    %c0_i32 = arith.constant 0 : i32
    %c0_i32_0 = arith.constant 0 : i32
    %c0_i32_1 = arith.constant 0 : i32
    %c0_i32_2 = arith.constant 0 : i32
    return %c0_i32, %c0_i32_0, %c0_i32_1 : i32, i32, i32
  }
}

module attributes {stable_mosaic.version = 11 : i64} {
  func.func @guidance_block_kernel(%arg0: i32, %arg1: memref<1x25x32xf32, #tpu.memory_space<vmem>>, %arg2: memref<1x25x32xf32, #tpu.memory_space<vmem>>, %arg3: memref<32x32xbf16, #tpu.memory_space<vmem>>, %arg4: memref<32x32xbf16, #tpu.memory_space<vmem>>, %arg5: memref<32x64xbf16, #tpu.memory_space<vmem>>, %arg6: memref<32x64xbf16, #tpu.memory_space<vmem>>, %arg7: memref<32x32xbf16, #tpu.memory_space<vmem>>, %arg8: memref<1x32xf32, #tpu.memory_space<vmem>>, %arg9: memref<1x25x32xf32, #tpu.memory_space<vmem>>, %arg10: memref<25x32xf32, #tpu.memory_space<vmem>>) attributes {dimension_semantics = [#tpu.dimension_semantics<parallel>], iteration_bounds = array<i64: 2>, scalar_prefetch = 0 : i64, scratch_operands = 1 : i64, tpu.core_type = #tpu.core_type<tc>, window_params = [{transform_indices = @transform_0, window_bounds = array<i64: 1, 25, 32>}, {transform_indices = @transform_1, window_bounds = array<i64: 1, 25, 32>}, {pipeline_mode = #tpu.pipeline_mode<synchronous>, transform_indices = @transform_2, window_bounds = array<i64: 32, 32>}, {pipeline_mode = #tpu.pipeline_mode<synchronous>, transform_indices = @transform_3, window_bounds = array<i64: 32, 32>}, {pipeline_mode = #tpu.pipeline_mode<synchronous>, transform_indices = @transform_4, window_bounds = array<i64: 32, 64>}, {pipeline_mode = #tpu.pipeline_mode<synchronous>, transform_indices = @transform_5, window_bounds = array<i64: 32, 64>}, {pipeline_mode = #tpu.pipeline_mode<synchronous>, transform_indices = @transform_6, window_bounds = array<i64: 32, 32>}, {pipeline_mode = #tpu.pipeline_mode<synchronous>, transform_indices = @transform_7, window_bounds = array<i64: 1, 32>}, {transform_indices = @transform_8, window_bounds = array<i64: 1, 25, 32>}]} {
    %c0 = arith.constant 0 : index
    %c0_0 = arith.constant 0 : index
    %c0_1 = arith.constant 0 : index
    %0 = vector.load %arg1[%c0, %c0_0, %c0_1] : memref<1x25x32xf32, #tpu.memory_space<vmem>>, vector<1x25x32xf32>
    %1 = vector.shape_cast %0 : vector<1x25x32xf32> to vector<25x32xf32>
    %c0_2 = arith.constant 0 : index
    %c0_3 = arith.constant 0 : index
    %c0_4 = arith.constant 0 : index
    %2 = vector.load %arg2[%c0_2, %c0_3, %c0_4] : memref<1x25x32xf32, #tpu.memory_space<vmem>>, vector<1x25x32xf32>
    %3 = vector.shape_cast %2 : vector<1x25x32xf32> to vector<25x32xf32>
    %4 = arith.truncf %1 : vector<25x32xf32> to vector<25x32xbf16>
    %5 = arith.truncf %3 : vector<25x32xf32> to vector<25x32xbf16>
    %c0_5 = arith.constant 0 : index
    %c0_6 = arith.constant 0 : index
    %6 = vector.load %arg4[%c0_5, %c0_6] : memref<32x32xbf16, #tpu.memory_space<vmem>>, vector<32x32xbf16>
    %cst = arith.constant dense<0.000000e+00> : vector<25x32xf32>
    %7 = tpu.matmul %5, %6, %cst {dimension_numbers = #tpu.dot_dimension_numbers<[1], [0], [0], [1], [0, 0, 1, 1], [], []>} : vector<25x32xbf16>, vector<32x32xbf16>, vector<25x32xf32> -> vector<25x32xf32>
    %8 = arith.truncf %7 : vector<25x32xf32> to vector<25x32xbf16>
    %c0_7 = arith.constant 0 : index
    %c0_8 = arith.constant 0 : index
    %9 = vector.load %arg5[%c0_7, %c0_8] : memref<32x64xbf16, #tpu.memory_space<vmem>>, vector<32x64xbf16>
    %cst_9 = arith.constant dense<0.000000e+00> : vector<25x64xf32>
    %10 = tpu.matmul %4, %9, %cst_9 {dimension_numbers = #tpu.dot_dimension_numbers<[1], [0], [0], [1], [0, 0, 1, 1], [], []>} : vector<25x32xbf16>, vector<32x64xbf16>, vector<25x64xf32> -> vector<25x64xf32>
    %11 = arith.truncf %10 : vector<25x64xf32> to vector<25x64xbf16>
    %12 = vector.extract_strided_slice %11 {offsets = [0, 0], sizes = [25, 32], strides = [1, 1]} : vector<25x64xbf16> to vector<25x32xbf16>
    %13 = vector.extract_strided_slice %11 {offsets = [0, 32], sizes = [25, 32], strides = [1, 1]} : vector<25x64xbf16> to vector<25x32xbf16>
    %14 = vector.extract_strided_slice %8 {offsets = [0, 0], sizes = [25, 4], strides = [1, 1]} : vector<25x32xbf16> to vector<25x4xbf16>
    %15 = vector.extract_strided_slice %12 {offsets = [0, 0], sizes = [25, 4], strides = [1, 1]} : vector<25x32xbf16> to vector<25x4xbf16>
    %16 = vector.extract_strided_slice %13 {offsets = [0, 0], sizes = [25, 4], strides = [1, 1]} : vector<25x32xbf16> to vector<25x4xbf16>
    %cst_10 = arith.constant dense<0.000000e+00> : vector<25x25xf32>
    %17 = tpu.matmul %14, %15, %cst_10 {dimension_numbers = #tpu.dot_dimension_numbers<[1], [1], [0], [0], [0, 0, 1, 0], [], []>} : vector<25x4xbf16>, vector<25x4xbf16>, vector<25x25xf32> -> vector<25x25xf32>
    %cst_11 = arith.constant dense<0xFF800000> : vector<25xf32>
    %18 = vector.multi_reduction <maximumf>, %17, %cst_11 [1] : vector<25x25xf32> to vector<25xf32>
    %19 = vector.shape_cast %18 : vector<25xf32> to vector<25x1xf32>
    %20 = vector.broadcast %19 : vector<25x1xf32> to vector<25x25xf32>
    %21 = arith.subf %17, %20 : vector<25x25xf32>
    %22 = math.exp %21 : vector<25x25xf32>
    %cst_12 = arith.constant dense<0.000000e+00> : vector<25xf32>
    %23 = vector.multi_reduction <add>, %22, %cst_12 [1] : vector<25x25xf32> to vector<25xf32>
    %24 = vector.shape_cast %23 : vector<25xf32> to vector<25x1xf32>
    %25 = tpu.reciprocal %24 {approx = true} : vector<25x1xf32> -> vector<25x1xf32>
    %26 = vector.broadcast %25 : vector<25x1xf32> to vector<25x25xf32>
    %27 = arith.mulf %22, %26 : vector<25x25xf32>
    %28 = arith.truncf %27 : vector<25x25xf32> to vector<25x25xbf16>
    %cst_13 = arith.constant dense<0.000000e+00> : vector<25x4xf32>
    %29 = tpu.matmul %28, %16, %cst_13 {dimension_numbers = #tpu.dot_dimension_numbers<[1], [0], [0], [1], [0, 0, 1, 1], [], []>} : vector<25x25xbf16>, vector<25x4xbf16>, vector<25x4xf32> -> vector<25x4xf32>
    %c0_14 = arith.constant 0 : index
    %c0_15 = arith.constant 0 : index
    %30 = vector.load %arg10[%c0_14, %c0_15] : memref<25x32xf32, #tpu.memory_space<vmem>>, vector<25x4xf32>
    tpu.vector_store %arg10[%c0_14, %c0_15], %29 {strides = array<i32>} : memref<25x32xf32, #tpu.memory_space<vmem>>, vector<25x4xf32>,
    %31 = vector.extract_strided_slice %8 {offsets = [0, 4], sizes = [25, 4], strides = [1, 1]} : vector<25x32xbf16> to vector<25x4xbf16>
    %32 = vector.extract_strided_slice %12 {offsets = [0, 4], sizes = [25, 4], strides = [1, 1]} : vector<25x32xbf16> to vector<25x4xbf16>
    %33 = vector.extract_strided_slice %13 {offsets = [0, 4], sizes = [25, 4], strides = [1, 1]} : vector<25x32xbf16> to vector<25x4xbf16>
    %cst_16 = arith.constant dense<0.000000e+00> : vector<25x25xf32>
    %34 = tpu.matmul %31, %32, %cst_16 {dimension_numbers = #tpu.dot_dimension_numbers<[1], [1], [0], [0], [0, 0, 1, 0], [], []>} : vector<25x4xbf16>, vector<25x4xbf16>, vector<25x25xf32> -> vector<25x25xf32>
    %cst_17 = arith.constant dense<0xFF800000> : vector<25xf32>
    %35 = vector.multi_reduction <maximumf>, %34, %cst_17 [1] : vector<25x25xf32> to vector<25xf32>
    %36 = vector.shape_cast %35 : vector<25xf32> to vector<25x1xf32>
    %37 = vector.broadcast %36 : vector<25x1xf32> to vector<25x25xf32>
    %38 = arith.subf %34, %37 : vector<25x25xf32>
    %39 = math.exp %38 : vector<25x25xf32>
    %cst_18 = arith.constant dense<0.000000e+00> : vector<25xf32>
    %40 = vector.multi_reduction <add>, %39, %cst_18 [1] : vector<25x25xf32> to vector<25xf32>
    %41 = vector.shape_cast %40 : vector<25xf32> to vector<25x1xf32>
    %42 = tpu.reciprocal %41 {approx = true} : vector<25x1xf32> -> vector<25x1xf32>
    %43 = vector.broadcast %42 : vector<25x1xf32> to vector<25x25xf32>
    %44 = arith.mulf %39, %43 : vector<25x25xf32>
    %45 = arith.truncf %44 : vector<25x25xf32> to vector<25x25xbf16>
    %cst_19 = arith.constant dense<0.000000e+00> : vector<25x4xf32>
    %46 = tpu.matmul %45, %33, %cst_19 {dimension_numbers = #tpu.dot_dimension_numbers<[1], [0], [0], [1], [0, 0, 1, 1], [], []>} : vector<25x25xbf16>, vector<25x4xbf16>, vector<25x4xf32> -> vector<25x4xf32>
    %c0_20 = arith.constant 0 : index
    %c4 = arith.constant 4 : index
    %47 = vector.load %arg10[%c0_20, %c4] : memref<25x32xf32, #tpu.memory_space<vmem>>, vector<25x4xf32>
    tpu.vector_store %arg10[%c0_20, %c4], %46 {strides = array<i32>} : memref<25x32xf32, #tpu.memory_space<vmem>>, vector<25x4xf32>,
    %48 = vector.extract_strided_slice %8 {offsets = [0, 8], sizes = [25, 4], strides = [1, 1]} : vector<25x32xbf16> to vector<25x4xbf16>
    %49 = vector.extract_strided_slice %12 {offsets = [0, 8], sizes = [25, 4], strides = [1, 1]} : vector<25x32xbf16> to vector<25x4xbf16>
    %50 = vector.extract_strided_slice %13 {offsets = [0, 8], sizes = [25, 4], strides = [1, 1]} : vector<25x32xbf16> to vector<25x4xbf16>
    %cst_21 = arith.constant dense<0.000000e+00> : vector<25x25xf32>
    %51 = tpu.matmul %48, %49, %cst_21 {dimension_numbers = #tpu.dot_dimension_numbers<[1], [1], [0], [0], [0, 0, 1, 0], [], []>} : vector<25x4xbf16>, vector<25x4xbf16>, vector<25x25xf32> -> vector<25x25xf32>
    %cst_22 = arith.constant dense<0xFF800000> : vector<25xf32>
    %52 = vector.multi_reduction <maximumf>, %51, %cst_22 [1] : vector<25x25xf32> to vector<25xf32>
    %53 = vector.shape_cast %52 : vector<25xf32> to vector<25x1xf32>
    %54 = vector.broadcast %53 : vector<25x1xf32> to vector<25x25xf32>
    %55 = arith.subf %51, %54 : vector<25x25xf32>
    %56 = math.exp %55 : vector<25x25xf32>
    %cst_23 = arith.constant dense<0.000000e+00> : vector<25xf32>
    %57 = vector.multi_reduction <add>, %56, %cst_23 [1] : vector<25x25xf32> to vector<25xf32>
    %58 = vector.shape_cast %57 : vector<25xf32> to vector<25x1xf32>
    %59 = tpu.reciprocal %58 {approx = true} : vector<25x1xf32> -> vector<25x1xf32>
    %60 = vector.broadcast %59 : vector<25x1xf32> to vector<25x25xf32>
    %61 = arith.mulf %56, %60 : vector<25x25xf32>
    %62 = arith.truncf %61 : vector<25x25xf32> to vector<25x25xbf16>
    %cst_24 = arith.constant dense<0.000000e+00> : vector<25x4xf32>
    %63 = tpu.matmul %62, %50, %cst_24 {dimension_numbers = #tpu.dot_dimension_numbers<[1], [0], [0], [1], [0, 0, 1, 1], [], []>} : vector<25x25xbf16>, vector<25x4xbf16>, vector<25x4xf32> -> vector<25x4xf32>
    %c0_25 = arith.constant 0 : index
    %c8 = arith.constant 8 : index
    %64 = vector.load %arg10[%c0_25, %c8] : memref<25x32xf32, #tpu.memory_space<vmem>>, vector<25x4xf32>
    tpu.vector_store %arg10[%c0_25, %c8], %63 {strides = array<i32>} : memref<25x32xf32, #tpu.memory_space<vmem>>, vector<25x4xf32>,
    %65 = vector.extract_strided_slice %8 {offsets = [0, 12], sizes = [25, 4], strides = [1, 1]} : vector<25x32xbf16> to vector<25x4xbf16>
    %66 = vector.extract_strided_slice %12 {offsets = [0, 12], sizes = [25, 4], strides = [1, 1]} : vector<25x32xbf16> to vector<25x4xbf16>
    %67 = vector.extract_strided_slice %13 {offsets = [0, 12], sizes = [25, 4], strides = [1, 1]} : vector<25x32xbf16> to vector<25x4xbf16>
    %cst_26 = arith.constant dense<0.000000e+00> : vector<25x25xf32>
    %68 = tpu.matmul %65, %66, %cst_26 {dimension_numbers = #tpu.dot_dimension_numbers<[1], [1], [0], [0], [0, 0, 1, 0], [], []>} : vector<25x4xbf16>, vector<25x4xbf16>, vector<25x25xf32> -> vector<25x25xf32>
    %cst_27 = arith.constant dense<0xFF800000> : vector<25xf32>
    %69 = vector.multi_reduction <maximumf>, %68, %cst_27 [1] : vector<25x25xf32> to vector<25xf32>
    %70 = vector.shape_cast %69 : vector<25xf32> to vector<25x1xf32>
    %71 = vector.broadcast %70 : vector<25x1xf32> to vector<25x25xf32>
    %72 = arith.subf %68, %71 : vector<25x25xf32>
    %73 = math.exp %72 : vector<25x25xf32>
    %cst_28 = arith.constant dense<0.000000e+00> : vector<25xf32>
    %74 = vector.multi_reduction <add>, %73, %cst_28 [1] : vector<25x25xf32> to vector<25xf32>
    %75 = vector.shape_cast %74 : vector<25xf32> to vector<25x1xf32>
    %76 = tpu.reciprocal %75 {approx = true} : vector<25x1xf32> -> vector<25x1xf32>
    %77 = vector.broadcast %76 : vector<25x1xf32> to vector<25x25xf32>
    %78 = arith.mulf %73, %77 : vector<25x25xf32>
    %79 = arith.truncf %78 : vector<25x25xf32> to vector<25x25xbf16>
    %cst_29 = arith.constant dense<0.000000e+00> : vector<25x4xf32>
    %80 = tpu.matmul %79, %67, %cst_29 {dimension_numbers = #tpu.dot_dimension_numbers<[1], [0], [0], [1], [0, 0, 1, 1], [], []>} : vector<25x25xbf16>, vector<25x4xbf16>, vector<25x4xf32> -> vector<25x4xf32>
    %c0_30 = arith.constant 0 : index
    %c12 = arith.constant 12 : index
    %81 = vector.load %arg10[%c0_30, %c12] : memref<25x32xf32, #tpu.memory_space<vmem>>, vector<25x4xf32>
    tpu.vector_store %arg10[%c0_30, %c12], %80 {strides = array<i32>} : memref<25x32xf32, #tpu.memory_space<vmem>>, vector<25x4xf32>,
    %82 = vector.extract_strided_slice %8 {offsets = [0, 16], sizes = [25, 4], strides = [1, 1]} : vector<25x32xbf16> to vector<25x4xbf16>
    %83 = vector.extract_strided_slice %12 {offsets = [0, 16], sizes = [25, 4], strides = [1, 1]} : vector<25x32xbf16> to vector<25x4xbf16>
    %84 = vector.extract_strided_slice %13 {offsets = [0, 16], sizes = [25, 4], strides = [1, 1]} : vector<25x32xbf16> to vector<25x4xbf16>
    %cst_31 = arith.constant dense<0.000000e+00> : vector<25x25xf32>
    %85 = tpu.matmul %82, %83, %cst_31 {dimension_numbers = #tpu.dot_dimension_numbers<[1], [1], [0], [0], [0, 0, 1, 0], [], []>} : vector<25x4xbf16>, vector<25x4xbf16>, vector<25x25xf32> -> vector<25x25xf32>
    %cst_32 = arith.constant dense<0xFF800000> : vector<25xf32>
    %86 = vector.multi_reduction <maximumf>, %85, %cst_32 [1] : vector<25x25xf32> to vector<25xf32>
    %87 = vector.shape_cast %86 : vector<25xf32> to vector<25x1xf32>
    %88 = vector.broadcast %87 : vector<25x1xf32> to vector<25x25xf32>
    %89 = arith.subf %85, %88 : vector<25x25xf32>
    %90 = math.exp %89 : vector<25x25xf32>
    %cst_33 = arith.constant dense<0.000000e+00> : vector<25xf32>
    %91 = vector.multi_reduction <add>, %90, %cst_33 [1] : vector<25x25xf32> to vector<25xf32>
    %92 = vector.shape_cast %91 : vector<25xf32> to vector<25x1xf32>
    %93 = tpu.reciprocal %92 {approx = true} : vector<25x1xf32> -> vector<25x1xf32>
    %94 = vector.broadcast %93 : vector<25x1xf32> to vector<25x25xf32>
    %95 = arith.mulf %90, %94 : vector<25x25xf32>
    %96 = arith.truncf %95 : vector<25x25xf32> to vector<25x25xbf16>
    %cst_34 = arith.constant dense<0.000000e+00> : vector<25x4xf32>
    %97 = tpu.matmul %96, %84, %cst_34 {dimension_numbers = #tpu.dot_dimension_numbers<[1], [0], [0], [1], [0, 0, 1, 1], [], []>} : vector<25x25xbf16>, vector<25x4xbf16>, vector<25x4xf32> -> vector<25x4xf32>
    %c0_35 = arith.constant 0 : index
    %c16 = arith.constant 16 : index
    %98 = vector.load %arg10[%c0_35, %c16] : memref<25x32xf32, #tpu.memory_space<vmem>>, vector<25x4xf32>
    tpu.vector_store %arg10[%c0_35, %c16], %97 {strides = array<i32>} : memref<25x32xf32, #tpu.memory_space<vmem>>, vector<25x4xf32>,
    %99 = vector.extract_strided_slice %8 {offsets = [0, 20], sizes = [25, 4], strides = [1, 1]} : vector<25x32xbf16> to vector<25x4xbf16>
    %100 = vector.extract_strided_slice %12 {offsets = [0, 20], sizes = [25, 4], strides = [1, 1]} : vector<25x32xbf16> to vector<25x4xbf16>
    %101 = vector.extract_strided_slice %13 {offsets = [0, 20], sizes = [25, 4], strides = [1, 1]} : vector<25x32xbf16> to vector<25x4xbf16>
    %cst_36 = arith.constant dense<0.000000e+00> : vector<25x25xf32>
    %102 = tpu.matmul %99, %100, %cst_36 {dimension_numbers = #tpu.dot_dimension_numbers<[1], [1], [0], [0], [0, 0, 1, 0], [], []>} : vector<25x4xbf16>, vector<25x4xbf16>, vector<25x25xf32> -> vector<25x25xf32>
    %cst_37 = arith.constant dense<0xFF800000> : vector<25xf32>
    %103 = vector.multi_reduction <maximumf>, %102, %cst_37 [1] : vector<25x25xf32> to vector<25xf32>
    %104 = vector.shape_cast %103 : vector<25xf32> to vector<25x1xf32>
    %105 = vector.broadcast %104 : vector<25x1xf32> to vector<25x25xf32>
    %106 = arith.subf %102, %105 : vector<25x25xf32>
    %107 = math.exp %106 : vector<25x25xf32>
    %cst_38 = arith.constant dense<0.000000e+00> : vector<25xf32>
    %108 = vector.multi_reduction <add>, %107, %cst_38 [1] : vector<25x25xf32> to vector<25xf32>
    %109 = vector.shape_cast %108 : vector<25xf32> to vector<25x1xf32>
    %110 = tpu.reciprocal %109 {approx = true} : vector<25x1xf32> -> vector<25x1xf32>
    %111 = vector.broadcast %110 : vector<25x1xf32> to vector<25x25xf32>
    %112 = arith.mulf %107, %111 : vector<25x25xf32>
    %113 = arith.truncf %112 : vector<25x25xf32> to vector<25x25xbf16>
    %cst_39 = arith.constant dense<0.000000e+00> : vector<25x4xf32>
    %114 = tpu.matmul %113, %101, %cst_39 {dimension_numbers = #tpu.dot_dimension_numbers<[1], [0], [0], [1], [0, 0, 1, 1], [], []>} : vector<25x25xbf16>, vector<25x4xbf16>, vector<25x4xf32> -> vector<25x4xf32>
    %c0_40 = arith.constant 0 : index
    %c20 = arith.constant 20 : index
    %115 = vector.load %arg10[%c0_40, %c20] : memref<25x32xf32, #tpu.memory_space<vmem>>, vector<25x4xf32>
    tpu.vector_store %arg10[%c0_40, %c20], %114 {strides = array<i32>} : memref<25x32xf32, #tpu.memory_space<vmem>>, vector<25x4xf32>,
    %116 = vector.extract_strided_slice %8 {offsets = [0, 24], sizes = [25, 4], strides = [1, 1]} : vector<25x32xbf16> to vector<25x4xbf16>
    %117 = vector.extract_strided_slice %12 {offsets = [0, 24], sizes = [25, 4], strides = [1, 1]} : vector<25x32xbf16> to vector<25x4xbf16>
    %118 = vector.extract_strided_slice %13 {offsets = [0, 24], sizes = [25, 4], strides = [1, 1]} : vector<25x32xbf16> to vector<25x4xbf16>
    %cst_41 = arith.constant dense<0.000000e+00> : vector<25x25xf32>
    %119 = tpu.matmul %116, %117, %cst_41 {dimension_numbers = #tpu.dot_dimension_numbers<[1], [1], [0], [0], [0, 0, 1, 0], [], []>} : vector<25x4xbf16>, vector<25x4xbf16>, vector<25x25xf32> -> vector<25x25xf32>
    %cst_42 = arith.constant dense<0xFF800000> : vector<25xf32>
    %120 = vector.multi_reduction <maximumf>, %119, %cst_42 [1] : vector<25x25xf32> to vector<25xf32>
    %121 = vector.shape_cast %120 : vector<25xf32> to vector<25x1xf32>
    %122 = vector.broadcast %121 : vector<25x1xf32> to vector<25x25xf32>
    %123 = arith.subf %119, %122 : vector<25x25xf32>
    %124 = math.exp %123 : vector<25x25xf32>
    %cst_43 = arith.constant dense<0.000000e+00> : vector<25xf32>
    %125 = vector.multi_reduction <add>, %124, %cst_43 [1] : vector<25x25xf32> to vector<25xf32>
    %126 = vector.shape_cast %125 : vector<25xf32> to vector<25x1xf32>
    %127 = tpu.reciprocal %126 {approx = true} : vector<25x1xf32> -> vector<25x1xf32>
    %128 = vector.broadcast %127 : vector<25x1xf32> to vector<25x25xf32>
    %129 = arith.mulf %124, %128 : vector<25x25xf32>
    %130 = arith.truncf %129 : vector<25x25xf32> to vector<25x25xbf16>
    %cst_44 = arith.constant dense<0.000000e+00> : vector<25x4xf32>
    %131 = tpu.matmul %130, %118, %cst_44 {dimension_numbers = #tpu.dot_dimension_numbers<[1], [0], [0], [1], [0, 0, 1, 1], [], []>} : vector<25x25xbf16>, vector<25x4xbf16>, vector<25x4xf32> -> vector<25x4xf32>
    %c0_45 = arith.constant 0 : index
    %c24 = arith.constant 24 : index
    %132 = vector.load %arg10[%c0_45, %c24] : memref<25x32xf32, #tpu.memory_space<vmem>>, vector<25x4xf32>
    tpu.vector_store %arg10[%c0_45, %c24], %131 {strides = array<i32>} : memref<25x32xf32, #tpu.memory_space<vmem>>, vector<25x4xf32>,
    %133 = vector.extract_strided_slice %8 {offsets = [0, 28], sizes = [25, 4], strides = [1, 1]} : vector<25x32xbf16> to vector<25x4xbf16>
    %134 = vector.extract_strided_slice %12 {offsets = [0, 28], sizes = [25, 4], strides = [1, 1]} : vector<25x32xbf16> to vector<25x4xbf16>
    %135 = vector.extract_strided_slice %13 {offsets = [0, 28], sizes = [25, 4], strides = [1, 1]} : vector<25x32xbf16> to vector<25x4xbf16>
    %cst_46 = arith.constant dense<0.000000e+00> : vector<25x25xf32>
    %136 = tpu.matmul %133, %134, %cst_46 {dimension_numbers = #tpu.dot_dimension_numbers<[1], [1], [0], [0], [0, 0, 1, 0], [], []>} : vector<25x4xbf16>, vector<25x4xbf16>, vector<25x25xf32> -> vector<25x25xf32>
    %cst_47 = arith.constant dense<0xFF800000> : vector<25xf32>
    %137 = vector.multi_reduction <maximumf>, %136, %cst_47 [1] : vector<25x25xf32> to vector<25xf32>
    %138 = vector.shape_cast %137 : vector<25xf32> to vector<25x1xf32>
    %139 = vector.broadcast %138 : vector<25x1xf32> to vector<25x25xf32>
    %140 = arith.subf %136, %139 : vector<25x25xf32>
    %141 = math.exp %140 : vector<25x25xf32>
    %cst_48 = arith.constant dense<0.000000e+00> : vector<25xf32>
    %142 = vector.multi_reduction <add>, %141, %cst_48 [1] : vector<25x25xf32> to vector<25xf32>
    %143 = vector.shape_cast %142 : vector<25xf32> to vector<25x1xf32>
    %144 = tpu.reciprocal %143 {approx = true} : vector<25x1xf32> -> vector<25x1xf32>
    %145 = vector.broadcast %144 : vector<25x1xf32> to vector<25x25xf32>
    %146 = arith.mulf %141, %145 : vector<25x25xf32>
    %147 = arith.truncf %146 : vector<25x25xf32> to vector<25x25xbf16>
    %cst_49 = arith.constant dense<0.000000e+00> : vector<25x4xf32>
    %148 = tpu.matmul %147, %135, %cst_49 {dimension_numbers = #tpu.dot_dimension_numbers<[1], [0], [0], [1], [0, 0, 1, 1], [], []>} : vector<25x25xbf16>, vector<25x4xbf16>, vector<25x4xf32> -> vector<25x4xf32>
    %c0_50 = arith.constant 0 : index
    %c28 = arith.constant 28 : index
    %149 = vector.load %arg10[%c0_50, %c28] : memref<25x32xf32, #tpu.memory_space<vmem>>, vector<25x4xf32>
    tpu.vector_store %arg10[%c0_50, %c28], %148 {strides = array<i32>} : memref<25x32xf32, #tpu.memory_space<vmem>>, vector<25x4xf32>,
    %c0_51 = arith.constant 0 : index
    %c0_52 = arith.constant 0 : index
    %150 = vector.load %arg10[%c0_51, %c0_52] : memref<25x32xf32, #tpu.memory_space<vmem>>, vector<25x32xf32>
    %151 = arith.truncf %150 : vector<25x32xf32> to vector<25x32xbf16>
    %c0_53 = arith.constant 0 : index
    %c0_54 = arith.constant 0 : index
    %152 = vector.load %arg7[%c0_53, %c0_54] : memref<32x32xbf16, #tpu.memory_space<vmem>>, vector<32x32xbf16>
    %cst_55 = arith.constant dense<0.000000e+00> : vector<25x32xf32>
    %153 = tpu.matmul %151, %152, %cst_55 {dimension_numbers = #tpu.dot_dimension_numbers<[1], [0], [0], [1], [0, 0, 1, 1], [], []>} : vector<25x32xbf16>, vector<32x32xbf16>, vector<25x32xf32> -> vector<25x32xf32>
    %c0_56 = arith.constant 0 : index
    %c0_57 = arith.constant 0 : index
    %154 = vector.load %arg8[%c0_56, %c0_57] : memref<1x32xf32, #tpu.memory_space<vmem>>, vector<1x32xf32>
    %155 = vector.broadcast %154 : vector<1x32xf32> to vector<25x32xf32>
    %156 = arith.addf %153, %155 : vector<25x32xf32>
    %157 = arith.addf %156, %1 : vector<25x32xf32>
    %c0_58 = arith.constant 0 : index
    %c0_59 = arith.constant 0 : index
    %158 = vector.load %arg3[%c0_58, %c0_59] : memref<32x32xbf16, #tpu.memory_space<vmem>>, vector<32x32xbf16>
    %cst_60 = arith.constant dense<0.000000e+00> : vector<25x32xf32>
    %159 = tpu.matmul %4, %158, %cst_60 {dimension_numbers = #tpu.dot_dimension_numbers<[1], [0], [0], [1], [0, 0, 1, 1], [], []>} : vector<25x32xbf16>, vector<32x32xbf16>, vector<25x32xf32> -> vector<25x32xf32>
    %160 = arith.truncf %159 : vector<25x32xf32> to vector<25x32xbf16>
    %c0_61 = arith.constant 0 : index
    %c0_62 = arith.constant 0 : index
    %161 = vector.load %arg6[%c0_61, %c0_62] : memref<32x64xbf16, #tpu.memory_space<vmem>>, vector<32x64xbf16>
    %cst_63 = arith.constant dense<0.000000e+00> : vector<25x64xf32>
    %162 = tpu.matmul %5, %161, %cst_63 {dimension_numbers = #tpu.dot_dimension_numbers<[1], [0], [0], [1], [0, 0, 1, 1], [], []>} : vector<25x32xbf16>, vector<32x64xbf16>, vector<25x64xf32> -> vector<25x64xf32>
    %163 = arith.truncf %162 : vector<25x64xf32> to vector<25x64xbf16>
    %164 = vector.extract_strided_slice %163 {offsets = [0, 0], sizes = [25, 32], strides = [1, 1]} : vector<25x64xbf16> to vector<25x32xbf16>
    %165 = vector.extract_strided_slice %163 {offsets = [0, 32], sizes = [25, 32], strides = [1, 1]} : vector<25x64xbf16> to vector<25x32xbf16>
    %166 = vector.extract_strided_slice %160 {offsets = [0, 0], sizes = [25, 4], strides = [1, 1]} : vector<25x32xbf16> to vector<25x4xbf16>
    %167 = vector.extract_strided_slice %164 {offsets = [0, 0], sizes = [25, 4], strides = [1, 1]} : vector<25x32xbf16> to vector<25x4xbf16>
    %168 = vector.extract_strided_slice %165 {offsets = [0, 0], sizes = [25, 4], strides = [1, 1]} : vector<25x32xbf16> to vector<25x4xbf16>
    %cst_64 = arith.constant dense<0.000000e+00> : vector<25x25xf32>
    %169 = tpu.matmul %166, %167, %cst_64 {dimension_numbers = #tpu.dot_dimension_numbers<[1], [1], [0], [0], [0, 0, 1, 0], [], []>} : vector<25x4xbf16>, vector<25x4xbf16>, vector<25x25xf32> -> vector<25x25xf32>
    %cst_65 = arith.constant dense<0xFF800000> : vector<25xf32>
    %170 = vector.multi_reduction <maximumf>, %169, %cst_65 [1] : vector<25x25xf32> to vector<25xf32>
    %171 = vector.shape_cast %170 : vector<25xf32> to vector<25x1xf32>
    %172 = vector.broadcast %171 : vector<25x1xf32> to vector<25x25xf32>
    %173 = arith.subf %169, %172 : vector<25x25xf32>
    %174 = math.exp %173 : vector<25x25xf32>
    %cst_66 = arith.constant dense<0.000000e+00> : vector<25xf32>
    %175 = vector.multi_reduction <add>, %174, %cst_66 [1] : vector<25x25xf32> to vector<25xf32>
    %176 = vector.shape_cast %175 : vector<25xf32> to vector<25x1xf32>
    %177 = tpu.reciprocal %176 {approx = true} : vector<25x1xf32> -> vector<25x1xf32>
    %178 = vector.broadcast %177 : vector<25x1xf32> to vector<25x25xf32>
    %179 = arith.mulf %174, %178 : vector<25x25xf32>
    %180 = arith.truncf %179 : vector<25x25xf32> to vector<25x25xbf16>
    %cst_67 = arith.constant dense<0.000000e+00> : vector<25x4xf32>
    %181 = tpu.matmul %180, %168, %cst_67 {dimension_numbers = #tpu.dot_dimension_numbers<[1], [0], [0], [1], [0, 0, 1, 1], [], []>} : vector<25x25xbf16>, vector<25x4xbf16>, vector<25x4xf32> -> vector<25x4xf32>
    %c0_68 = arith.constant 0 : index
    %c0_69 = arith.constant 0 : index
    %182 = vector.load %arg10[%c0_68, %c0_69] : memref<25x32xf32, #tpu.memory_space<vmem>>, vector<25x4xf32>
    tpu.vector_store %arg10[%c0_68, %c0_69], %181 {strides = array<i32>} : memref<25x32xf32, #tpu.memory_space<vmem>>, vector<25x4xf32>,
    %183 = vector.extract_strided_slice %160 {offsets = [0, 4], sizes = [25, 4], strides = [1, 1]} : vector<25x32xbf16> to vector<25x4xbf16>
    %184 = vector.extract_strided_slice %164 {offsets = [0, 4], sizes = [25, 4], strides = [1, 1]} : vector<25x32xbf16> to vector<25x4xbf16>
    %185 = vector.extract_strided_slice %165 {offsets = [0, 4], sizes = [25, 4], strides = [1, 1]} : vector<25x32xbf16> to vector<25x4xbf16>
    %cst_70 = arith.constant dense<0.000000e+00> : vector<25x25xf32>
    %186 = tpu.matmul %183, %184, %cst_70 {dimension_numbers = #tpu.dot_dimension_numbers<[1], [1], [0], [0], [0, 0, 1, 0], [], []>} : vector<25x4xbf16>, vector<25x4xbf16>, vector<25x25xf32> -> vector<25x25xf32>
    %cst_71 = arith.constant dense<0xFF800000> : vector<25xf32>
    %187 = vector.multi_reduction <maximumf>, %186, %cst_71 [1] : vector<25x25xf32> to vector<25xf32>
    %188 = vector.shape_cast %187 : vector<25xf32> to vector<25x1xf32>
    %189 = vector.broadcast %188 : vector<25x1xf32> to vector<25x25xf32>
    %190 = arith.subf %186, %189 : vector<25x25xf32>
    %191 = math.exp %190 : vector<25x25xf32>
    %cst_72 = arith.constant dense<0.000000e+00> : vector<25xf32>
    %192 = vector.multi_reduction <add>, %191, %cst_72 [1] : vector<25x25xf32> to vector<25xf32>
    %193 = vector.shape_cast %192 : vector<25xf32> to vector<25x1xf32>
    %194 = tpu.reciprocal %193 {approx = true} : vector<25x1xf32> -> vector<25x1xf32>
    %195 = vector.broadcast %194 : vector<25x1xf32> to vector<25x25xf32>
    %196 = arith.mulf %191, %195 : vector<25x25xf32>
    %197 = arith.truncf %196 : vector<25x25xf32> to vector<25x25xbf16>
    %cst_73 = arith.constant dense<0.000000e+00> : vector<25x4xf32>
    %198 = tpu.matmul %197, %185, %cst_73 {dimension_numbers = #tpu.dot_dimension_numbers<[1], [0], [0], [1], [0, 0, 1, 1], [], []>} : vector<25x25xbf16>, vector<25x4xbf16>, vector<25x4xf32> -> vector<25x4xf32>
    %c0_74 = arith.constant 0 : index
    %c4_75 = arith.constant 4 : index
    %199 = vector.load %arg10[%c0_74, %c4_75] : memref<25x32xf32, #tpu.memory_space<vmem>>, vector<25x4xf32>
    tpu.vector_store %arg10[%c0_74, %c4_75], %198 {strides = array<i32>} : memref<25x32xf32, #tpu.memory_space<vmem>>, vector<25x4xf32>,
    %200 = vector.extract_strided_slice %160 {offsets = [0, 8], sizes = [25, 4], strides = [1, 1]} : vector<25x32xbf16> to vector<25x4xbf16>
    %201 = vector.extract_strided_slice %164 {offsets = [0, 8], sizes = [25, 4], strides = [1, 1]} : vector<25x32xbf16> to vector<25x4xbf16>
    %202 = vector.extract_strided_slice %165 {offsets = [0, 8], sizes = [25, 4], strides = [1, 1]} : vector<25x32xbf16> to vector<25x4xbf16>
    %cst_76 = arith.constant dense<0.000000e+00> : vector<25x25xf32>
    %203 = tpu.matmul %200, %201, %cst_76 {dimension_numbers = #tpu.dot_dimension_numbers<[1], [1], [0], [0], [0, 0, 1, 0], [], []>} : vector<25x4xbf16>, vector<25x4xbf16>, vector<25x25xf32> -> vector<25x25xf32>
    %cst_77 = arith.constant dense<0xFF800000> : vector<25xf32>
    %204 = vector.multi_reduction <maximumf>, %203, %cst_77 [1] : vector<25x25xf32> to vector<25xf32>
    %205 = vector.shape_cast %204 : vector<25xf32> to vector<25x1xf32>
    %206 = vector.broadcast %205 : vector<25x1xf32> to vector<25x25xf32>
    %207 = arith.subf %203, %206 : vector<25x25xf32>
    %208 = math.exp %207 : vector<25x25xf32>
    %cst_78 = arith.constant dense<0.000000e+00> : vector<25xf32>
    %209 = vector.multi_reduction <add>, %208, %cst_78 [1] : vector<25x25xf32> to vector<25xf32>
    %210 = vector.shape_cast %209 : vector<25xf32> to vector<25x1xf32>
    %211 = tpu.reciprocal %210 {approx = true} : vector<25x1xf32> -> vector<25x1xf32>
    %212 = vector.broadcast %211 : vector<25x1xf32> to vector<25x25xf32>
    %213 = arith.mulf %208, %212 : vector<25x25xf32>
    %214 = arith.truncf %213 : vector<25x25xf32> to vector<25x25xbf16>
    %cst_79 = arith.constant dense<0.000000e+00> : vector<25x4xf32>
    %215 = tpu.matmul %214, %202, %cst_79 {dimension_numbers = #tpu.dot_dimension_numbers<[1], [0], [0], [1], [0, 0, 1, 1], [], []>} : vector<25x25xbf16>, vector<25x4xbf16>, vector<25x4xf32> -> vector<25x4xf32>
    %c0_80 = arith.constant 0 : index
    %c8_81 = arith.constant 8 : index
    %216 = vector.load %arg10[%c0_80, %c8_81] : memref<25x32xf32, #tpu.memory_space<vmem>>, vector<25x4xf32>
    tpu.vector_store %arg10[%c0_80, %c8_81], %215 {strides = array<i32>} : memref<25x32xf32, #tpu.memory_space<vmem>>, vector<25x4xf32>,
    %217 = vector.extract_strided_slice %160 {offsets = [0, 12], sizes = [25, 4], strides = [1, 1]} : vector<25x32xbf16> to vector<25x4xbf16>
    %218 = vector.extract_strided_slice %164 {offsets = [0, 12], sizes = [25, 4], strides = [1, 1]} : vector<25x32xbf16> to vector<25x4xbf16>
    %219 = vector.extract_strided_slice %165 {offsets = [0, 12], sizes = [25, 4], strides = [1, 1]} : vector<25x32xbf16> to vector<25x4xbf16>
    %cst_82 = arith.constant dense<0.000000e+00> : vector<25x25xf32>
    %220 = tpu.matmul %217, %218, %cst_82 {dimension_numbers = #tpu.dot_dimension_numbers<[1], [1], [0], [0], [0, 0, 1, 0], [], []>} : vector<25x4xbf16>, vector<25x4xbf16>, vector<25x25xf32> -> vector<25x25xf32>
    %cst_83 = arith.constant dense<0xFF800000> : vector<25xf32>
    %221 = vector.multi_reduction <maximumf>, %220, %cst_83 [1] : vector<25x25xf32> to vector<25xf32>
    %222 = vector.shape_cast %221 : vector<25xf32> to vector<25x1xf32>
    %223 = vector.broadcast %222 : vector<25x1xf32> to vector<25x25xf32>
    %224 = arith.subf %220, %223 : vector<25x25xf32>
    %225 = math.exp %224 : vector<25x25xf32>
    %cst_84 = arith.constant dense<0.000000e+00> : vector<25xf32>
    %226 = vector.multi_reduction <add>, %225, %cst_84 [1] : vector<25x25xf32> to vector<25xf32>
    %227 = vector.shape_cast %226 : vector<25xf32> to vector<25x1xf32>
    %228 = tpu.reciprocal %227 {approx = true} : vector<25x1xf32> -> vector<25x1xf32>
    %229 = vector.broadcast %228 : vector<25x1xf32> to vector<25x25xf32>
    %230 = arith.mulf %225, %229 : vector<25x25xf32>
    %231 = arith.truncf %230 : vector<25x25xf32> to vector<25x25xbf16>
    %cst_85 = arith.constant dense<0.000000e+00> : vector<25x4xf32>
    %232 = tpu.matmul %231, %219, %cst_85 {dimension_numbers = #tpu.dot_dimension_numbers<[1], [0], [0], [1], [0, 0, 1, 1], [], []>} : vector<25x25xbf16>, vector<25x4xbf16>, vector<25x4xf32> -> vector<25x4xf32>
    %c0_86 = arith.constant 0 : index
    %c12_87 = arith.constant 12 : index
    %233 = vector.load %arg10[%c0_86, %c12_87] : memref<25x32xf32, #tpu.memory_space<vmem>>, vector<25x4xf32>
    tpu.vector_store %arg10[%c0_86, %c12_87], %232 {strides = array<i32>} : memref<25x32xf32, #tpu.memory_space<vmem>>, vector<25x4xf32>,
    %234 = vector.extract_strided_slice %160 {offsets = [0, 16], sizes = [25, 4], strides = [1, 1]} : vector<25x32xbf16> to vector<25x4xbf16>
    %235 = vector.extract_strided_slice %164 {offsets = [0, 16], sizes = [25, 4], strides = [1, 1]} : vector<25x32xbf16> to vector<25x4xbf16>
    %236 = vector.extract_strided_slice %165 {offsets = [0, 16], sizes = [25, 4], strides = [1, 1]} : vector<25x32xbf16> to vector<25x4xbf16>
    %cst_88 = arith.constant dense<0.000000e+00> : vector<25x25xf32>
    %237 = tpu.matmul %234, %235, %cst_88 {dimension_numbers = #tpu.dot_dimension_numbers<[1], [1], [0], [0], [0, 0, 1, 0], [], []>} : vector<25x4xbf16>, vector<25x4xbf16>, vector<25x25xf32> -> vector<25x25xf32>
    %cst_89 = arith.constant dense<0xFF800000> : vector<25xf32>
    %238 = vector.multi_reduction <maximumf>, %237, %cst_89 [1] : vector<25x25xf32> to vector<25xf32>
    %239 = vector.shape_cast %238 : vector<25xf32> to vector<25x1xf32>
    %240 = vector.broadcast %239 : vector<25x1xf32> to vector<25x25xf32>
    %241 = arith.subf %237, %240 : vector<25x25xf32>
    %242 = math.exp %241 : vector<25x25xf32>
    %cst_90 = arith.constant dense<0.000000e+00> : vector<25xf32>
    %243 = vector.multi_reduction <add>, %242, %cst_90 [1] : vector<25x25xf32> to vector<25xf32>
    %244 = vector.shape_cast %243 : vector<25xf32> to vector<25x1xf32>
    %245 = tpu.reciprocal %244 {approx = true} : vector<25x1xf32> -> vector<25x1xf32>
    %246 = vector.broadcast %245 : vector<25x1xf32> to vector<25x25xf32>
    %247 = arith.mulf %242, %246 : vector<25x25xf32>
    %248 = arith.truncf %247 : vector<25x25xf32> to vector<25x25xbf16>
    %cst_91 = arith.constant dense<0.000000e+00> : vector<25x4xf32>
    %249 = tpu.matmul %248, %236, %cst_91 {dimension_numbers = #tpu.dot_dimension_numbers<[1], [0], [0], [1], [0, 0, 1, 1], [], []>} : vector<25x25xbf16>, vector<25x4xbf16>, vector<25x4xf32> -> vector<25x4xf32>
    %c0_92 = arith.constant 0 : index
    %c16_93 = arith.constant 16 : index
    %250 = vector.load %arg10[%c0_92, %c16_93] : memref<25x32xf32, #tpu.memory_space<vmem>>, vector<25x4xf32>
    tpu.vector_store %arg10[%c0_92, %c16_93], %249 {strides = array<i32>} : memref<25x32xf32, #tpu.memory_space<vmem>>, vector<25x4xf32>,
    %251 = vector.extract_strided_slice %160 {offsets = [0, 20], sizes = [25, 4], strides = [1, 1]} : vector<25x32xbf16> to vector<25x4xbf16>
    %252 = vector.extract_strided_slice %164 {offsets = [0, 20], sizes = [25, 4], strides = [1, 1]} : vector<25x32xbf16> to vector<25x4xbf16>
    %253 = vector.extract_strided_slice %165 {offsets = [0, 20], sizes = [25, 4], strides = [1, 1]} : vector<25x32xbf16> to vector<25x4xbf16>
    %cst_94 = arith.constant dense<0.000000e+00> : vector<25x25xf32>
    %254 = tpu.matmul %251, %252, %cst_94 {dimension_numbers = #tpu.dot_dimension_numbers<[1], [1], [0], [0], [0, 0, 1, 0], [], []>} : vector<25x4xbf16>, vector<25x4xbf16>, vector<25x25xf32> -> vector<25x25xf32>
    %cst_95 = arith.constant dense<0xFF800000> : vector<25xf32>
    %255 = vector.multi_reduction <maximumf>, %254, %cst_95 [1] : vector<25x25xf32> to vector<25xf32>
    %256 = vector.shape_cast %255 : vector<25xf32> to vector<25x1xf32>
    %257 = vector.broadcast %256 : vector<25x1xf32> to vector<25x25xf32>
    %258 = arith.subf %254, %257 : vector<25x25xf32>
    %259 = math.exp %258 : vector<25x25xf32>
    %cst_96 = arith.constant dense<0.000000e+00> : vector<25xf32>
    %260 = vector.multi_reduction <add>, %259, %cst_96 [1] : vector<25x25xf32> to vector<25xf32>
    %261 = vector.shape_cast %260 : vector<25xf32> to vector<25x1xf32>
    %262 = tpu.reciprocal %261 {approx = true} : vector<25x1xf32> -> vector<25x1xf32>
    %263 = vector.broadcast %262 : vector<25x1xf32> to vector<25x25xf32>
    %264 = arith.mulf %259, %263 : vector<25x25xf32>
    %265 = arith.truncf %264 : vector<25x25xf32> to vector<25x25xbf16>
    %cst_97 = arith.constant dense<0.000000e+00> : vector<25x4xf32>
    %266 = tpu.matmul %265, %253, %cst_97 {dimension_numbers = #tpu.dot_dimension_numbers<[1], [0], [0], [1], [0, 0, 1, 1], [], []>} : vector<25x25xbf16>, vector<25x4xbf16>, vector<25x4xf32> -> vector<25x4xf32>
    %c0_98 = arith.constant 0 : index
    %c20_99 = arith.constant 20 : index
    %267 = vector.load %arg10[%c0_98, %c20_99] : memref<25x32xf32, #tpu.memory_space<vmem>>, vector<25x4xf32>
    tpu.vector_store %arg10[%c0_98, %c20_99], %266 {strides = array<i32>} : memref<25x32xf32, #tpu.memory_space<vmem>>, vector<25x4xf32>,
    %268 = vector.extract_strided_slice %160 {offsets = [0, 24], sizes = [25, 4], strides = [1, 1]} : vector<25x32xbf16> to vector<25x4xbf16>
    %269 = vector.extract_strided_slice %164 {offsets = [0, 24], sizes = [25, 4], strides = [1, 1]} : vector<25x32xbf16> to vector<25x4xbf16>
    %270 = vector.extract_strided_slice %165 {offsets = [0, 24], sizes = [25, 4], strides = [1, 1]} : vector<25x32xbf16> to vector<25x4xbf16>
    %cst_100 = arith.constant dense<0.000000e+00> : vector<25x25xf32>
    %271 = tpu.matmul %268, %269, %cst_100 {dimension_numbers = #tpu.dot_dimension_numbers<[1], [1], [0], [0], [0, 0, 1, 0], [], []>} : vector<25x4xbf16>, vector<25x4xbf16>, vector<25x25xf32> -> vector<25x25xf32>
    %cst_101 = arith.constant dense<0xFF800000> : vector<25xf32>
    %272 = vector.multi_reduction <maximumf>, %271, %cst_101 [1] : vector<25x25xf32> to vector<25xf32>
    %273 = vector.shape_cast %272 : vector<25xf32> to vector<25x1xf32>
    %274 = vector.broadcast %273 : vector<25x1xf32> to vector<25x25xf32>
    %275 = arith.subf %271, %274 : vector<25x25xf32>
    %276 = math.exp %275 : vector<25x25xf32>
    %cst_102 = arith.constant dense<0.000000e+00> : vector<25xf32>
    %277 = vector.multi_reduction <add>, %276, %cst_102 [1] : vector<25x25xf32> to vector<25xf32>
    %278 = vector.shape_cast %277 : vector<25xf32> to vector<25x1xf32>
    %279 = tpu.reciprocal %278 {approx = true} : vector<25x1xf32> -> vector<25x1xf32>
    %280 = vector.broadcast %279 : vector<25x1xf32> to vector<25x25xf32>
    %281 = arith.mulf %276, %280 : vector<25x25xf32>
    %282 = arith.truncf %281 : vector<25x25xf32> to vector<25x25xbf16>
    %cst_103 = arith.constant dense<0.000000e+00> : vector<25x4xf32>
    %283 = tpu.matmul %282, %270, %cst_103 {dimension_numbers = #tpu.dot_dimension_numbers<[1], [0], [0], [1], [0, 0, 1, 1], [], []>} : vector<25x25xbf16>, vector<25x4xbf16>, vector<25x4xf32> -> vector<25x4xf32>
    %c0_104 = arith.constant 0 : index
    %c24_105 = arith.constant 24 : index
    %284 = vector.load %arg10[%c0_104, %c24_105] : memref<25x32xf32, #tpu.memory_space<vmem>>, vector<25x4xf32>
    tpu.vector_store %arg10[%c0_104, %c24_105], %283 {strides = array<i32>} : memref<25x32xf32, #tpu.memory_space<vmem>>, vector<25x4xf32>,
    %285 = vector.extract_strided_slice %160 {offsets = [0, 28], sizes = [25, 4], strides = [1, 1]} : vector<25x32xbf16> to vector<25x4xbf16>
    %286 = vector.extract_strided_slice %164 {offsets = [0, 28], sizes = [25, 4], strides = [1, 1]} : vector<25x32xbf16> to vector<25x4xbf16>
    %287 = vector.extract_strided_slice %165 {offsets = [0, 28], sizes = [25, 4], strides = [1, 1]} : vector<25x32xbf16> to vector<25x4xbf16>
    %cst_106 = arith.constant dense<0.000000e+00> : vector<25x25xf32>
    %288 = tpu.matmul %285, %286, %cst_106 {dimension_numbers = #tpu.dot_dimension_numbers<[1], [1], [0], [0], [0, 0, 1, 0], [], []>} : vector<25x4xbf16>, vector<25x4xbf16>, vector<25x25xf32> -> vector<25x25xf32>
    %cst_107 = arith.constant dense<0xFF800000> : vector<25xf32>
    %289 = vector.multi_reduction <maximumf>, %288, %cst_107 [1] : vector<25x25xf32> to vector<25xf32>
    %290 = vector.shape_cast %289 : vector<25xf32> to vector<25x1xf32>
    %291 = vector.broadcast %290 : vector<25x1xf32> to vector<25x25xf32>
    %292 = arith.subf %288, %291 : vector<25x25xf32>
    %293 = math.exp %292 : vector<25x25xf32>
    %cst_108 = arith.constant dense<0.000000e+00> : vector<25xf32>
    %294 = vector.multi_reduction <add>, %293, %cst_108 [1] : vector<25x25xf32> to vector<25xf32>
    %295 = vector.shape_cast %294 : vector<25xf32> to vector<25x1xf32>
    %296 = tpu.reciprocal %295 {approx = true} : vector<25x1xf32> -> vector<25x1xf32>
    %297 = vector.broadcast %296 : vector<25x1xf32> to vector<25x25xf32>
    %298 = arith.mulf %293, %297 : vector<25x25xf32>
    %299 = arith.truncf %298 : vector<25x25xf32> to vector<25x25xbf16>
    %cst_109 = arith.constant dense<0.000000e+00> : vector<25x4xf32>
    %300 = tpu.matmul %299, %287, %cst_109 {dimension_numbers = #tpu.dot_dimension_numbers<[1], [0], [0], [1], [0, 0, 1, 1], [], []>} : vector<25x25xbf16>, vector<25x4xbf16>, vector<25x4xf32> -> vector<25x4xf32>
    %c0_110 = arith.constant 0 : index
    %c28_111 = arith.constant 28 : index
    %301 = vector.load %arg10[%c0_110, %c28_111] : memref<25x32xf32, #tpu.memory_space<vmem>>, vector<25x4xf32>
    tpu.vector_store %arg10[%c0_110, %c28_111], %300 {strides = array<i32>} : memref<25x32xf32, #tpu.memory_space<vmem>>, vector<25x4xf32>,
    %c0_112 = arith.constant 0 : index
    %c0_113 = arith.constant 0 : index
    %302 = vector.load %arg10[%c0_112, %c0_113] : memref<25x32xf32, #tpu.memory_space<vmem>>, vector<25x32xf32>
    %303 = arith.truncf %302 : vector<25x32xf32> to vector<25x32xbf16>
    %c0_114 = arith.constant 0 : index
    %c0_115 = arith.constant 0 : index
    %304 = vector.load %arg7[%c0_114, %c0_115] : memref<32x32xbf16, #tpu.memory_space<vmem>>, vector<32x32xbf16>
    %cst_116 = arith.constant dense<0.000000e+00> : vector<25x32xf32>
    %305 = tpu.matmul %303, %304, %cst_116 {dimension_numbers = #tpu.dot_dimension_numbers<[1], [0], [0], [1], [0, 0, 1, 1], [], []>} : vector<25x32xbf16>, vector<32x32xbf16>, vector<25x32xf32> -> vector<25x32xf32>
    %c0_117 = arith.constant 0 : index
    %c0_118 = arith.constant 0 : index
    %306 = vector.load %arg8[%c0_117, %c0_118] : memref<1x32xf32, #tpu.memory_space<vmem>>, vector<1x32xf32>
    %307 = vector.broadcast %306 : vector<1x32xf32> to vector<25x32xf32>
    %308 = arith.addf %305, %307 : vector<25x32xf32>
    %309 = arith.addf %308, %3 : vector<25x32xf32>
    %310 = arith.addf %157, %309 : vector<25x32xf32>
    %c0_119 = arith.constant 0 : index
    %c0_120 = arith.constant 0 : index
    %c0_121 = arith.constant 0 : index
    %311 = vector.load %arg9[%c0_119, %c0_120, %c0_121] : memref<1x25x32xf32, #tpu.memory_space<vmem>>, vector<1x25x32xf32>
    %312 = vector.shape_cast %311 : vector<1x25x32xf32> to vector<25x32xf32>
    %313 = vector.shape_cast %310 : vector<25x32xf32> to vector<1x25x32xf32>
    tpu.vector_store %arg9[%c0_119, %c0_120, %c0_121], %313 {strides = array<i32>} : memref<1x25x32xf32, #tpu.memory_space<vmem>>, vector<1x25x32xf32>,
    return
  }
  func.func @transform_0(%arg0: i32) -> (i32, i32, i32) {
    %c0_i32 = arith.constant 0 : i32
    %c0_i32_0 = arith.constant 0 : i32
    %c0_i32_1 = arith.constant 0 : i32
    return %arg0, %c0_i32, %c0_i32_0 : i32, i32, i32
  }
  func.func @transform_1(%arg0: i32) -> (i32, i32, i32) {
    %c0_i32 = arith.constant 0 : i32
    %c0_i32_0 = arith.constant 0 : i32
    %c0_i32_1 = arith.constant 0 : i32
    return %arg0, %c0_i32, %c0_i32_0 : i32, i32, i32
  }
  func.func @transform_2(%arg0: i32) -> (i32, i32) {
    %c0_i32 = arith.constant 0 : i32
    %c0_i32_0 = arith.constant 0 : i32
    %c0_i32_1 = arith.constant 0 : i32
    return %c0_i32, %c0_i32_0 : i32, i32
  }
  func.func @transform_3(%arg0: i32) -> (i32, i32) {
    %c0_i32 = arith.constant 0 : i32
    %c0_i32_0 = arith.constant 0 : i32
    %c0_i32_1 = arith.constant 0 : i32
    return %c0_i32, %c0_i32_0 : i32, i32
  }
  func.func @transform_4(%arg0: i32) -> (i32, i32) {
    %c0_i32 = arith.constant 0 : i32
    %c0_i32_0 = arith.constant 0 : i32
    %c0_i32_1 = arith.constant 0 : i32
    return %c0_i32, %c0_i32_0 : i32, i32
  }
  func.func @transform_5(%arg0: i32) -> (i32, i32) {
    %c0_i32 = arith.constant 0 : i32
    %c0_i32_0 = arith.constant 0 : i32
    %c0_i32_1 = arith.constant 0 : i32
    return %c0_i32, %c0_i32_0 : i32, i32
  }
  func.func @transform_6(%arg0: i32) -> (i32, i32) {
    %c0_i32 = arith.constant 0 : i32
    %c0_i32_0 = arith.constant 0 : i32
    %c0_i32_1 = arith.constant 0 : i32
    return %c0_i32, %c0_i32_0 : i32, i32
  }
  func.func @transform_7(%arg0: i32) -> (i32, i32) {
    %c0_i32 = arith.constant 0 : i32
    %c0_i32_0 = arith.constant 0 : i32
    %c0_i32_1 = arith.constant 0 : i32
    return %c0_i32, %c0_i32_0 : i32, i32
  }
  func.func @transform_8(%arg0: i32) -> (i32, i32, i32) {
    %c0_i32 = arith.constant 0 : i32
    %c0_i32_0 = arith.constant 0 : i32
    %c0_i32_1 = arith.constant 0 : i32
    return %arg0, %c0_i32, %c0_i32_0 : i32, i32, i32
  }
}

</mosaic_0001>

<bundles_post_ra>
// kernel: encoder_forward.3
= control target key start
LH: loop header
LB: loop body
LE: loop exit
PB: predicated region body
PF: predicated region fallthrough
CT: control target
= control target key end

     0   :  { %vm28_vm0 = vcmask 261120   ;;  %v623_v1 = vmov 0.0   ;;  %vm122_vm1 = vcmask 523264   ;;  %vm32_vm2 = vcmask 253952   ;;  %s832_s0 = inlined_call_operand.vmem [shape: bf16[2,64,25], index: 0, kind: input, shape index: {}]   ;;  %s833_s1 = inlined_call_operand.vmem [shape: bf16[64,32], index: 1, kind: input, shape index: {}]   ;;  %s834_s2 = inlined_call_operand.vmem [shape: f32[1,32], index: 2, kind: input, shape index: {}]   ;;  %s835_s3 = inlined_call_operand.vmem [shape: f32[1,32], index: 3, kind: input, shape index: {}]   ;;  %s836_s4 = inlined_call_operand.vmem [shape: f32[1,32], index: 4, kind: input, shape index: {}]   ;;  %s837_s5 = inlined_call_operand.vmem [shape: f32[25,32], index: 5, kind: input, shape index: {}]   ;;  %s838_s6 = inlined_call_operand.vmem [shape: f32[2,25,32], index: 6, kind: output, shape index: {}]  }
   0x1   :  { %v591_v0 = vld [vmem:[%s832_s0 + $0x20] sm:$0xff]   ;;  %31 = vst.msk [vmem:[#allocation2 + $0x10] sm:$0xff] %vm28_vm0, %v623_v1  ;;  %29 = vst.msk [vmem:[#allocation2] sm:$0xff] %vm28_vm0, %v623_v1  ;;  %v593_v3 = vld [vmem:[%s832_s0 + $0x28] sm:$0xff]  }
   0x2   :  { %30 = vst.msk [vmem:[#allocation2 + $0x8] sm:$0xff] %vm28_vm0, %v623_v1  ;;  %34 = vst.msk [vmem:[#allocation2 + $0x20] sm:$0xff] %vm28_vm0, %v623_v1  ;;  %v592_v2 = vld [vmem:[%s832_s0] sm:$0xff]   ;;  %234 = vxpose.xlu1.c.b16.start [1/4] (short) (narrow) %v591_v0, 32  ;;  %v594_v4 = vld [vmem:[%s832_s0 + $0x8] sm:$0xff]  }
   0x3   :  { %35 = vst.msk [vmem:[#allocation2 + $0x28] sm:$0xff] %vm28_vm0, %v623_v1  ;;  %36 = vst.msk [vmem:[#allocation2 + $0x30] sm:$0xff] %vm28_vm0, %v623_v1  ;;  %82 = vxpose.xlu0.c.b16.start [1/4] (short) (narrow) %v592_v2, 32  ;;  %v595_v5 = vld [vmem:[%s832_s0 + $0x30] sm:$0xff]   ;;  %v597_v7 = vld [vmem:[%s832_s0 + $0x38] sm:$0xff]  }
   0x4   :  { %v596_v6 = vld [vmem:[%s832_s0 + $0x10] sm:$0xff]   ;;  %v599_v8 = vld [vmem:[%s833_s1 + $0x18] sm:$0xff]   ;;  %v603_v13 = vld [vmem:[%s833_s1 + $0x8] sm:$0xff]   ;;  %33 = vst.msk [vmem:[#allocation2 + $0x18] sm:$0x1] %vm32_vm2, %v623_v1 }
   0x5   :  { %v598_v9 = vld [vmem:[%s832_s0 + $0x18] sm:$0xff]   ;;  %565 = vmatprep.subr.bf16.mxu0 %v599_v8  ;;  %v601_v11 = vld [vmem:[%s833_s1 + $0x10] sm:$0xff]   ;;  %v604_v14 = vld [vmem:[%s833_s1 + $0x8] sm:$0xff]   ;;  %37 = vst.msk [vmem:[#allocation2 + $0x38] sm:$0x1] %vm32_vm2, %v623_v1 }
   0x6   :  { %235 = vxpose.xlu1.c.b16.cont [2/4] (short) (narrow) %v593_v3, 32  ;;  %v600_v10 = vld [vmem:[%s833_s1 + $0x18] sm:$0xff]   ;;  %v602_v12 = vld [vmem:[%s833_s1 + $0x10] sm:$0xff]   ;;  %566 = vmatpush3.bf16.msra.mxu0 %v599_v8  ;;  %v605_v15 = vld [vmem:[%s833_s1] sm:$0xff]  }
   0x7   :  { %83 = vxpose.xlu0.c.b16.cont [2/4] (short) (narrow) %v594_v4, 32  ;;  %577 = vmatprep.subr.bf16.mxu1 %v600_v10  ;;  %v606_v16 = vld [vmem:[%s833_s1] sm:$0xff]  }
   0x8   :  { %578 = vmatpush3.bf16.msra.mxu1 %v600_v10  ;;  %567 = vmatprep.subr.bf16.mxu0 %v601_v11  ;;  %v40_v22 = vld [vmem:[#allocation2 + $0x10] sm:$0xff]  ;;  %v38_v27 = vld [vmem:[#allocation2] sm:$0xff] }
   0x9   :  { %579 = vmatprep.subr.bf16.mxu1 %v602_v12  ;;  %v189_v24 = vld [vmem:[#allocation2 + $0x20] sm:$0xff]  ;;  %v39_v39 = vld [vmem:[#allocation2 + $0x8] sm:$0xff] }
   0xa   :  { %236 = vxpose.xlu1.c.b16.cont [3/4] (short) (narrow) %v595_v5, 32  ;;  %568 = vmatpush3.bf16.msra.mxu0 %v601_v11  ;;  %v191_v21 = vld [vmem:[#allocation2 + $0x30] sm:$0xff]  ;;  %v190_v36 = vld [vmem:[#allocation2 + $0x28] sm:$0xff]  ;;  %v550_v45 = vld [vmem:[%s834_s2] ss:$0 sm:$0xff] }
   0xb   :  { %84 = vxpose.xlu0.c.b16.cont [3/4] (short) (narrow) %v596_v6, 32  ;;  %569 = vmatprep.subr.bf16.mxu0 %v603_v13  ;;  %v41_v33 = vld [vmem:[#allocation2 + $0x18] sm:$0x1] }
   0xc   :  { %580 = vmatpush3.bf16.msra.mxu1 %v602_v12  ;;  %v192_v30 = vld [vmem:[#allocation2 + $0x38] sm:$0x1] }
   0xd   :  { %581 = vmatprep.subr.bf16.mxu1 %v604_v14 }
   0xe   :  { %237 = vxpose.xlu1.c.b16.end [4/4] (short) (narrow) %v597_v7, 32  ;;  %570 = vmatpush3.bf16.msra.mxu0 %v603_v13 }
   0xf   :  { %85 = vxpose.xlu0.c.b16.end [4/4] (short) (narrow) %v598_v9, 32  ;;  %571 = vmatprep.subr.bf16.mxu0 %v605_v15 }
  0x10   :  { %582 = vmatpush3.bf16.msra.mxu1 %v604_v14 }
  0x11   :  { %583 = vmatprep.subr.bf16.mxu1 %v606_v16 }
  0x12   :  { %572 = vmatpush3.bf16.msra.mxu0 %v605_v15 }
  0x14   :  { %584 = vmatpush3.bf16.msra.mxu1 %v606_v16 }
  0x64   :  { %v242_v17 = vpop.trf.xlu1 }
  0x65   :  { %v90_v18 = vpop.trf.xlu0  ;;  %585 = vmatprep.mubr.msk.bf16.mxu1 %vm122_vm1, %v242_v17 }
  0x66   :  { %573 = vmatprep.mubr.msk.bf16.mxu0 %vm122_vm1, %v90_v18 }
  0x68   :  { %v243_v19 = vpop.trf.xlu1 }
  0x69   :  { %v91_v20 = vpop.trf.xlu0  ;;  %586 = vmatmul.mubr.msk.bf16.vlgmr.msra.gmra.mxu1 %vm122_vm1, %v243_v19 }
  0x6a   :  { %574 = vmatmul.mubr.msk.bf16.vlgmr.msra.gmra.mxu0 %vm122_vm1, %v91_v20 }
 0x129   :  { %v587_v23 = vpop.f32.mrf.mxu1 }
 0x12a   :  { %v575_v25 = vpop.f32.mrf.mxu0  ;;  %v331_v26 = vadd.f32 %v587_v23, %v191_v21 }
 0x12b   :  { %v180_v28 = vadd.f32 %v575_v25, %v40_v22  ;;  %v314_v29 = vpop.f32.mrf.mxu1 }
 0x12c   :  { %335 = vst.msk [vmem:[#allocation2 + $0x30] sm:$0xff] %vm28_vm0, %v331_v26  ;;  %v163_v31 = vpop.f32.mrf.mxu0  ;;  %v329_v32 = vadd.f32 %v314_v29, %v189_v24 }
 0x12d   :  { %185 = vst.msk [vmem:[#allocation2 + $0x10] sm:$0xff] %vm28_vm0, %v180_v28  ;;  %v178_v34 = vadd.f32 %v163_v31, %v38_v27  ;;  %v588_v35 = vpop.f32.mrf.mxu1 }
 0x12e   :  { %333 = vst.msk [vmem:[#allocation2 + $0x20] sm:$0xff] %vm28_vm0, %v329_v32  ;;  %v576_v37 = vpop.f32.mrf.mxu0  ;;  %v332_v38 = vadd.f32 %v588_v35, %v192_v30 }
 0x12f   :  { %183 = vst.msk [vmem:[#allocation2] sm:$0xff] %vm28_vm0, %v178_v34  ;;  %v181_v40 = vadd.f32 %v576_v37, %v41_v33  ;;  %v317_v41 = vpop.f32.mrf.mxu1 }
 0x130   :  { %336 = vst.msk [vmem:[#allocation2 + $0x38] sm:$0x1] %vm32_vm2, %v332_v38  ;;  %v166_v42 = vpop.f32.mrf.mxu0  ;;  %v330_v43 = vadd.f32 %v317_v41, %v190_v36 }
 0x131   :  { %187 = vst.msk [vmem:[#allocation2 + $0x18] sm:$0x1] %vm32_vm2, %v181_v40  ;;  %v179_v44 = vadd.f32 %v166_v42, %v39_v39 }
 0x132   :  { %334 = vst.msk [vmem:[#allocation2 + $0x28] sm:$0xff] %vm28_vm0, %v330_v43 }
 0x133   :  { %184 = vst.msk [vmem:[#allocation2 + $0x8] sm:$0xff] %vm28_vm0, %v179_v44  ;;  %v346_v59 = vld [vmem:[#allocation2 + $0x30] sm:$0xff] }
 0x134   :  { %v342_v46 = vld [vmem:[#allocation2 + $0x10] sm:$0xff]  ;;  %v361_v63 = vadd.f32 %v550_v45, %v346_v59 }
 0x135   :  { %v357_v47 = vadd.f32 %v550_v45, %v342_v46  ;;  %v344_v52 = vld [vmem:[#allocation2 + $0x20] sm:$0xff] }
 0x136   :  { %v340_v48 = vld [vmem:[#allocation2] sm:$0xff]  ;;  %v359_v57 = vadd.f32 %v550_v45, %v344_v52  ;;  %v381_v2 = vsel %vm28_vm0, %v361_v63, 0.0 }
 0x137   :  { %v369_v49 = vsel %vm28_vm0, %v357_v47, 0.0  ;;  %v355_v50 = vadd.f32 %v550_v45, %v340_v48  ;;  %v347_v1 = vld [vmem:[#allocation2 + $0x38] sm:$0x1] }
 0x138   :  { %370 = vadd.xlane.f32.xlu0 %v369_v49  ;;  %v343_v51 = vld [vmem:[#allocation2 + $0x18] sm:$0x1]  ;;  %v375_v61 = vsel %vm28_vm0, %v359_v57, 0.0  ;;  %v362_v4 = vadd.f32 %v550_v45, %v347_v1 }
 0x139   :  { %v358_v53 = vadd.f32 %v550_v45, %v343_v51  ;;  %v363_v55 = vsel %vm28_vm0, %v355_v50, 0.0  ;;  %v345_v60 = vld [vmem:[#allocation2 + $0x28] sm:$0xff] }
 0x13a   :  { %v341_v54 = vld [vmem:[#allocation2 + $0x8] sm:$0xff]  ;;  %v360_v0 = vadd.f32 %v550_v45, %v345_v60  ;;  %v384_v5 = vsel %vm32_vm2, %v362_v4, 0.0 }
 0x13b   :  { %v372_v56 = vsel %vm32_vm2, %v358_v53, 0.0  ;;  %v356_v58 = vadd.f32 %v550_v45, %v341_v54 }
 0x13c   :  { %364 = vadd.xlane.f32.xlu0 %v363_v55  ;;  %373 = vadd.xlane.f32.xlu1 %v372_v56  ;;  %v378_v3 = vsel %vm28_vm0, %v360_v0, 0.0 }
 0x13d   :  { %v366_v62 = vsel %vm28_vm0, %v356_v58, 0.0 }
 0x140   :  { %376 = vadd.xlane.f32.xlu0 %v375_v61  ;;  %367 = vadd.xlane.f32.xlu1 %v366_v62 }
 0x144   :  { %382 = vadd.xlane.f32.xlu0 %v381_v2  ;;  %379 = vadd.xlane.f32.xlu1 %v378_v3 }
 0x148   :  { %385 = vadd.xlane.f32.xlu1 %v384_v5 }
 0x1c1   :  { %v371_v6 = vpop.xlane.xlu0 %370 }
 0x1c2   :  { %v390_v7 = vmul.f32 0.03125, %v371_v6  ;;  %v551_v6 = vld [vmem:[%s835_s3] ss:$0 sm:$0xff] }
 0x1c4   :  { %v734_v8 = vsub.f32 %v357_v47, %v390_v7 }
 0x1c5   :  { %v365_v9 = vpop.xlane.xlu0 %364  ;;  %v374_v10 = vpop.xlane.xlu1 %373 }
 0x1c6   :  { %v388_v11 = vmul.f32 0.03125, %v365_v9  ;;  %v391_v12 = vmul.f32 0.03125, %v374_v10  ;;  %v406_v13 = vmul.f32 %v734_v8, %v734_v8  ;;  %v552_v10 = vld [vmem:[%s836_s4] ss:$0 sm:$0xff] }
 0x1c8   :  { %v738_v14 = vsub.f32 %v355_v50, %v388_v11  ;;  %v740_v15 = vsub.f32 %v358_v53, %v391_v12  ;;  %v418_v16 = vsel %vm28_vm0, %v406_v13, 0.0  ;;  %v500_v13 = vld [vmem:[%s837_s5 + $0x10] sm:$0xff] }
 0x1c9   :  { %419 = vadd.xlane.f32.xlu0 %v418_v16  ;;  %v377_v17 = vpop.xlane.xlu0 %376  ;;  %v368_v18 = vpop.xlane.xlu1 %367 }
 0x1ca   :  { %v392_v19 = vmul.f32 0.03125, %v377_v17  ;;  %v389_v20 = vmul.f32 0.03125, %v368_v18  ;;  %v404_v21 = vmul.f32 %v738_v14, %v738_v14  ;;  %v407_v22 = vmul.f32 %v740_v15, %v740_v15 }
 0x1cc   :  { %v747_v23 = vsub.f32 %v359_v57, %v392_v19  ;;  %v749_v24 = vsub.f32 %v356_v58, %v389_v20  ;;  %v412_v25 = vsel %vm28_vm0, %v404_v21, 0.0  ;;  %v421_v26 = vsel %vm32_vm2, %v407_v22, 0.0  ;;  %v498_v22 = vld [vmem:[%s837_s5] sm:$0xff] }
 0x1cd   :  { %413 = vadd.xlane.f32.xlu0 %v412_v25  ;;  %v383_v27 = vpop.xlane.xlu0 %382  ;;  %422 = vadd.xlane.f32.xlu1 %v421_v26  ;;  %v380_v28 = vpop.xlane.xlu1 %379 }
 0x1ce   :  { %v394_v29 = vmul.f32 0.03125, %v383_v27  ;;  %v393_v30 = vmul.f32 0.03125, %v380_v28  ;;  %v408_v31 = vmul.f32 %v747_v23, %v747_v23  ;;  %v405_v32 = vmul.f32 %v749_v24, %v749_v24 }
 0x1d0   :  { %v757_v33 = vsub.f32 %v361_v63, %v394_v29  ;;  %v759_v34 = vsub.f32 %v360_v0, %v393_v30  ;;  %v424_v35 = vsel %vm28_vm0, %v408_v31, 0.0  ;;  %v415_v36 = vsel %vm28_vm0, %v405_v32, 0.0 }
 0x1d1   :  { %425 = vadd.xlane.f32.xlu0 %v424_v35  ;;  %416 = vadd.xlane.f32.xlu1 %v415_v36  ;;  %v386_v37 = vpop.xlane.xlu1 %385 }
 0x1d2   :  { %v395_v38 = vmul.f32 0.03125, %v386_v37  ;;  %v410_v39 = vmul.f32 %v757_v33, %v757_v33  ;;  %v409_v40 = vmul.f32 %v759_v34, %v759_v34 }
 0x1d4   :  { %v767_v41 = vsub.f32 %v362_v4, %v395_v38  ;;  %v430_v42 = vsel %vm28_vm0, %v410_v39, 0.0  ;;  %v427_v43 = vsel %vm28_vm0, %v409_v40, 0.0  ;;  %v499_v39 = vld [vmem:[%s837_s5 + $0x8] sm:$0xff] }
 0x1d5   :  { %431 = vadd.xlane.f32.xlu0 %v430_v42  ;;  %428 = vadd.xlane.f32.xlu1 %v427_v43 }
 0x1d6   :  { %v411_v44 = vmul.f32 %v767_v41, %v767_v41 }
 0x1d8   :  { %v433_v45 = vsel %vm32_vm2, %v411_v44, 0.0 }
 0x1d9   :  { %434 = vadd.xlane.f32.xlu1 %v433_v45 }
 0x252   :  { %v420_v46 = vpop.xlane.xlu0 %419 }
 0x253   :  { %v438_v47 = vmul.f32 0.03125, %v420_v46 }
 0x255   :  { %v446_v48 = vadd.f32 1e-05, %v438_v47 }
 0x256   :  { %v414_v49 = vpop.xlane.xlu0 %413  ;;  %v423_v50 = vpop.xlane.xlu1 %422 }
 0x257   :  { %607 = vrsqrt.f32 %v446_v48  ;;  %v436_v51 = vmul.f32 0.03125, %v414_v49  ;;  %v439_v52 = vmul.f32 0.03125, %v423_v50 }
 0x259   :  { %v444_v53 = vadd.f32 1e-05, %v436_v51  ;;  %v447_v54 = vadd.f32 1e-05, %v439_v52 }
 0x25a   :  { %v426_v55 = vpop.xlane.xlu0 %425  ;;  %v417_v56 = vpop.xlane.xlu1 %416 }
 0x25b   :  { %609 = vrsqrt.f32 %v444_v53  ;;  %v440_v57 = vmul.f32 0.03125, %v426_v55  ;;  %v437_v58 = vmul.f32 0.03125, %v417_v56 }
 0x25c   :  { %611 = vrsqrt.f32 %v447_v54 }
 0x25d   :  { %v448_v59 = vadd.f32 1e-05, %v440_v57  ;;  %v445_v60 = vadd.f32 1e-05, %v437_v58 }
 0x25e   :  { %v432_v61 = vpop.xlane.xlu0 %431  ;;  %v429_v62 = vpop.xlane.xlu1 %428 }
 0x25f   :  { %613 = vrsqrt.f32 %v448_v59  ;;  %v442_v63 = vmul.f32 0.03125, %v432_v61  ;;  %v441_v0 = vmul.f32 0.03125, %v429_v62 }
 0x260   :  { %615 = vrsqrt.f32 %v445_v60 }
 0x261   :  { %v450_v1 = vadd.f32 1e-05, %v442_v63  ;;  %v449_v2 = vadd.f32 1e-05, %v441_v0 }
 0x262   :  { %v435_v3 = vpop.xlane.xlu1 %434 }
 0x263   :  { %617 = vrsqrt.f32 %v450_v1  ;;  %v443_v4 = vmul.f32 0.03125, %v435_v3 }
 0x264   :  { %v608_v5 = vpop.eup %607  ;;  %619 = vrsqrt.f32 %v449_v2 }
 0x265   :  { %v462_v7 = vmul.f32 %v608_v5, %v734_v8  ;;  %v451_v9 = vadd.f32 1e-05, %v443_v4 }
 0x267   :  { %v477_v11 = vmul.f32 %v551_v6, %v462_v7  ;;  %621 = vrsqrt.f32 %v451_v9 }
 0x268   :  { %v610_v12 = vpop.eup %609 }
 0x269   :  { %v612_v16 = vpop.eup %611  ;;  %v492_v17 = vadd.f32 %v552_v10, %v477_v11  ;;  %v460_v18 = vmul.f32 %v610_v12, %v738_v14  ;;  %v501_v14 = vld [vmem:[%s837_s5 + $0x18] sm:$0x1] }
 0x26a   :  { %v463_v19 = vmul.f32 %v612_v16, %v740_v15 }
 0x26b   :  { %v504_v20 = vadd.f32 %v500_v13, %v492_v17  ;;  %v475_v8 = vmul.f32 %v551_v6, %v460_v18 }
 0x26c   :  { %v614_v21 = vpop.eup %613  ;;  %v478_v25 = vmul.f32 %v551_v6, %v463_v19 }
 0x26d   :  { %v616_v26 = vpop.eup %615  ;;  %512 = vst.msk [vmem:[%s838_s6 + $0x10] sm:$0xff] %vm28_vm0, %v504_v20  ;;  %v490_v27 = vadd.f32 %v552_v10, %v475_v8  ;;  %v464_v15 = vmul.f32 %v614_v21, %v747_v23 }
 0x26e   :  { %v493_v28 = vadd.f32 %v552_v10, %v478_v25  ;;  %v461_v29 = vmul.f32 %v616_v26, %v749_v24 }
 0x26f   :  { %v502_v30 = vadd.f32 %v498_v22, %v490_v27  ;;  %v479_v31 = vmul.f32 %v551_v6, %v464_v15 }
 0x270   :  { %v618_v32 = vpop.eup %617  ;;  %v505_v35 = vadd.f32 %v501_v14, %v493_v28  ;;  %v476_v36 = vmul.f32 %v551_v6, %v461_v29 }
 0x271   :  { %v620_v37 = vpop.eup %619  ;;  %510 = vst.msk [vmem:[%s838_s6] sm:$0xff] %vm28_vm0, %v502_v30  ;;  %v494_v38 = vadd.f32 %v552_v10, %v479_v31  ;;  %v466_v23 = vmul.f32 %v618_v32, %v757_v33 }
 0x272   :  { %513 = vst.msk [vmem:[%s838_s6 + $0x18] sm:$0x1] %vm32_vm2, %v505_v35  ;;  %v491_v24 = vadd.f32 %v552_v10, %v476_v36  ;;  %v465_v40 = vmul.f32 %v620_v37, %v759_v34 }
 0x273   :  { %v506_v42 = vadd.f32 %v498_v22, %v494_v38  ;;  %v481_v43 = vmul.f32 %v551_v6, %v466_v23 }
 0x274   :  { %v622_v44 = vpop.eup %621  ;;  %v503_v45 = vadd.f32 %v499_v39, %v491_v24  ;;  %v480_v46 = vmul.f32 %v551_v6, %v465_v40 }
 0x275   :  { %514 = vst.msk [vmem:[%s838_s6 + $0x20] sm:$0xff] %vm28_vm0, %v506_v42  ;;  %v496_v47 = vadd.f32 %v552_v10, %v481_v43  ;;  %v467_v33 = vmul.f32 %v622_v44, %v767_v41 }
 0x276   :  { %511 = vst.msk [vmem:[%s838_s6 + $0x8] sm:$0xff] %vm28_vm0, %v503_v45  ;;  %v495_v48 = vadd.f32 %v552_v10, %v480_v46 }
 0x277   :  { %v508_v34 = vadd.f32 %v500_v13, %v496_v47  ;;  %v482_v49 = vmul.f32 %v551_v6, %v467_v33 }
 0x278   :  { %v507_v50 = vadd.f32 %v499_v39, %v495_v48 }
 0x279   :  { %516 = vst.msk [vmem:[%s838_s6 + $0x30] sm:$0xff] %vm28_vm0, %v508_v34  ;;  %v497_v51 = vadd.f32 %v552_v10, %v482_v49 }
 0x27a   :  { %515 = vst.msk [vmem:[%s838_s6 + $0x28] sm:$0xff] %vm28_vm0, %v507_v50 }
 0x27b   :  { %v509_v41 = vadd.f32 %v501_v14, %v497_v51 }
 0x27d   :  { %517 = vst.msk [vmem:[%s838_s6 + $0x38] sm:$0x1] %vm32_vm2, %v509_v41 }

// kernel: encoder_forward.5
= control target key start
LH: loop header
LB: loop body
LE: loop exit
PB: predicated region body
PF: predicated region fallthrough
CT: control target
= control target key end

     0   :  { %s4999_s27 = smov 0   ;;  %s5899_s0 = inlined_call_operand.vmem [shape: f32[2,25,32], index: 0, kind: input, shape index: {}]   ;;  %s5900_s1 = inlined_call_operand.vmem [shape: f32[2,25,32], index: 1, kind: input, shape index: {}]   ;;  %s5901_s2 = inlined_call_operand.vmem [shape: bf16[32,32], index: 2, kind: input, shape index: {}]   ;;  %s5902_s3 = inlined_call_operand.vmem [shape: bf16[32,32], index: 3, kind: input, shape index: {}]   ;;  %s5903_s4 = inlined_call_operand.vmem [shape: bf16[32,64], index: 4, kind: input, shape index: {}]   ;;  %s5904_s5 = inlined_call_operand.vmem [shape: bf16[32,64], index: 5, kind: input, shape index: {}]   ;;  %s5905_s6 = inlined_call_operand.vmem [shape: bf16[32,32], index: 6, kind: input, shape index: {}]   ;;  %s5906_s7 = inlined_call_operand.vmem [shape: f32[1,32], index: 7, kind: input, shape index: {}]   ;;  %s5907_s8 = inlined_call_operand.vmem [shape: f32[2,25,32], index: 8, kind: output, shape index: {}]  }
   0x1 LB: > { %s4022_s28 = sadd.s32 4294967295, %s4929_s27   ;;  %p4026_p0 = scmp.ge.s32.totalorder %s4929_s27, 1  ;;  %s4929_s27 = sphi %s4999_s27, %s18_s27  }
   0x2   : > { %p272_p1 = scmp.lt.s32.totalorder %s4929_s27, 3 }
   0x4   : > { %p273_p2 = pnand %p4026_p0, %p272_p1 }
   0x5   : > { %p311_p3 = scmp.lt.s32.totalorder (!%p273_p2), %s4022_s28, 1  ;;  %s4931_s22 = smov (!%p273_p2), 96  }
   0x6   : > { %276 = sbr.rel (%p273_p2) target bundleno = 9890 (0x26a2), region = 52  ;;  %s4932_s23 = smov (!%p273_p2), 124  }
   0x7   : > { %s4934_s24 = smov (!%p273_p2), 92   ;;  %s4935_s25 = smov (!%p273_p2), 120  }
   0x8   : > { %s4936_s26 = smov (!%p273_p2), 88   ;;  %s4938_s29 = smov (!%p273_p2), 84  }
   0x9   : > { %s4939_s30 = smov (!%p273_p2), 112   ;;  %s4940_s9 = smov (!%p273_p2), 80  }
   0xa   : > { %s4941_s10 = smov (!%p273_p2), 108   ;;  %s4942_s11 = smov (!%p273_p2), 76  }
   0xb   : > { %v4647_v0 = vld [vmem:[%s5903_s4 + $0x8] sm:$0xff]   ;;  %v4648_v1 = vld [vmem:[%s5903_s4] sm:$0xff]   ;;  %s5945_s28 = smov (!%p311_p3, %s4022_s28), 1  ;;  %vm355_vm0 = vcmask 261120   ;;  %vm486_vm1 = vcmask 31744   ;;  %vm548_vm2 = vcmask 203776  }
   0xc   : > { %4288 = vmatprep.subr.bf16.mxu1 %v4647_v0  ;;  %v4649_v2 = vld [vmem:[%s5902_s3 + $0x8] sm:$0xff]   ;;  %v4650_v3 = vld [vmem:[%s5902_s3] sm:$0xff]   ;;  %s5019_s15 = sshll.u32 %s5945_s28, 5  ;;  %vm558_vm3 = vcmask 196608   ;;  %vm609_vm4 = vcmask 1043456   ;;  %vm610_vm5 = vcmask 1044480  }
   0xd   : > { %4289 = vmatpush3.bf16.msra.mxu1 %v4647_v0  ;;  %4280 = vmatprep.subr.bf16.mxu0 %v4649_v2  ;;  %s5025_s18 = scalar_lea.vmem %s5899_s0, %s5019_s15  ;;  %s5034_s21 = scalar_lea.vmem %s5900_s1, %s5019_s15  ;;  %v4933_v60 = vmov 65535   ;;  %vm668_vm6 = vcmask 24576   ;;  %vm866_vm7 = vcmask 64544   ;;  %vm1066_vm8 = vcmask 97344  }
   0xe   : > { %4290 = vmatprep.subr.bf16.mxu1 %v4648_v1  ;;  %4281 = vmatpush3.bf16.msra.mxu0 %v4649_v2  ;;  %v327_v4 = vld [vmem:[%s5025_s18] sm:$0xff]  ;;  %v328_v5 = vld [vmem:[%s5025_s18 + $0x8] sm:$0xff]  ;;  %v329_v6 = vld [vmem:[%s5025_s18 + $0x10] sm:$0xff]  ;;  %v611_v61 = vsel %vm609_vm4, 4294967295, %v4933_v60  ;;  %s4937_s28 = smov 116   ;;  %s5927_s12 = smov 104  }
   0xf   : > { %4282 = vmatprep.subr.bf16.mxu0 %v4650_v3  ;;  %v5036_v7 = vpack.c.bf16 %v328_v5, %v327_v4  ;;  %v330_v8 = vld [vmem:[%s5025_s18 + $0x18] sm:$0x1]  ;;  %v331_v9 = vld [vmem:[%s5034_s21] sm:$0xff]  ;;  %v332_v10 = vld [vmem:[%s5034_s21 + $0x8] sm:$0xff]  ;;  %v5097_v0 = vsel %vm610_vm5, %v611_v61, 0  ;;  %s5925_s13 = smov 72  }
  0x10   : > { %v5041_v11 = vpack.c.bf16 %v330_v8, %v329_v6  ;;  %v5043_v12 = vpack.c.bf16 %v332_v10, %v331_v9  ;;  %v333_v13 = vld [vmem:[%s5034_s21 + $0x10] sm:$0xff]  ;;  %v334_v14 = vld [vmem:[%s5034_s21 + $0x18] sm:$0x1]  ;;  %s5923_s14 = smov 100   ;;  %s5921_s16 = smov 68   ;;  %vm1266_vm9 = vcmask 130144  }
  0x11   : > { %4291 = vmatpush3.bf16.msra.mxu1 %v4648_v1  ;;  %4292 = vmatprep.mubr.msk.bf16.mxu1 %vm355_vm0, %v5036_v7  ;;  %v5049_v15 = vpack.c.bf16 %v334_v14, %v333_v13  ;;  %s5908_s17 = smov 4   ;;  %s5910_s19 = smov 8   ;;  %vm870_vm10 = vcmask 57376   ;;  %vm1466_vm11 = vcmask 162944   ;;  %vm1070_vm12 = vcmask 90176  }
  0x12   : > { %4283 = vmatpush3.bf16.msra.mxu0 %v4650_v3  ;;  %4284 = vmatprep.mubr.msk.bf16.mxu0 %vm355_vm0, %v5043_v12  ;;  %s5912_s20 = smov 12   ;;  %vm1666_vm13 = vcmask 195744   ;;  %vm5914_vm14 = vcmask 122976   ;;  %vm1866_vm15 = vcmask 228544   ;;  %vm1470_vm4 = vcmask 155776  }
  0x13   : > { %vm5930_vm5 = vcmask 188576  }
  0x14   : > { %4293 = vmatmul.mubr.msk.bf16.vlgmr.msra.gmra.mxu1 %vm355_vm0, %v5041_v11 }
  0x15   : > { %4285 = vmatmul.mubr.msk.bf16.vlgmr.msra.gmra.mxu0 %vm355_vm0, %v5049_v15 }
  0xd4   : > { %v4294_v16 = vpop.f32.mrf.mxu1 }
  0xd5   : > { %v4286_v18 = vpop.f32.mrf.mxu0 }
  0xd6   : > { %v469_v17 = vpop.f32.mrf.mxu1 }
  0xd7   : > { %v396_v20 = vpop.f32.mrf.mxu0 }
  0xd8   : > { %v4295_v19 = vpop.f32.mrf.mxu1 }
  0xd9   : > { %v5057_v21 = vpack.c.bf16 %v4295_v19, %v4294_v16  ;;  %v4287_v23 = vpop.f32.mrf.mxu0 }
  0xda   : > { %v472_v22 = vpop.f32.mrf.mxu1  ;;  %v5073_v29 = vpack.c.bf16 %v4287_v23, %v4286_v18 }
  0xdb   : > { %v5059_v24 = vpack.c.bf16 %v472_v22, %v469_v17  ;;  %4584 = vmatprep.subr.msk.bf16.mxu0 %vm486_vm1, %v5057_v21  ;;  %v497_v25 = vsel %vm486_vm1, %v5057_v21, 0  ;;  %v399_v26 = vpop.f32.mrf.mxu0 }
  0xdc   : > { %4297 = vmatpush3.bf16.xpose.msra.mxu0 %v497_v25  ;;  %v5067_v27 = vpack.c.bf16 %v399_v26, %v396_v20 }
  0xdd   : > { %4585 = vmatprep.subr.msk.bf16.mxu0 %vm486_vm1, %v5059_v24  ;;  %v494_v28 = vsel %vm486_vm1, %v5059_v24, 0 }
  0xde   : > { %4300 = vmatprep.mubr.msk.bf16.mxu0 %vm486_vm1, %v5067_v27 }
  0xe4   : > { %4299 = vmatpush3.bf16.xpose.msra.mxu0 %v494_v28 }
  0xeb   : > { %4301 = vmatmul.mubr.msk.bf16.vlgmr.msra.gmra.mxu0 %vm486_vm1, %v5073_v29 }
 0x1ab   : > { %v4302_v30 = vpop.f32.mrf.mxu0 }
 0x1ac   : > { %v555_v31 = vsel %vm548_vm2, %v4302_v30, -inf }
 0x1ad   : > { %556 = vmax.xlane.f32.xlu1 %v555_v31  ;;  %v533_v32 = vpop.f32.mrf.mxu0 }
 0x1ae   : > { %v549_v33 = vsel %vm548_vm2, %v533_v32, -inf }
 0x1af   : > { %550 = vmax.xlane.f32.xlu0 %v549_v33  ;;  %v4303_v34 = vpop.f32.mrf.mxu0 }
 0x1b0   : > { %v559_v35 = vsel %vm558_vm3, %v4303_v34, -inf }
 0x1b1   : > { %560 = vmax.xlane.f32.xlu1 %v559_v35  ;;  %v536_v36 = vpop.f32.mrf.mxu0 }
 0x1b2   : > { %v552_v37 = vsel %vm548_vm2, %v536_v36, -inf }
 0x1b3   : > { %553 = vmax.xlane.f32.xlu0 %v552_v37 }
 0x1c2   : > { %598 = vrot.lane.b32.xlu1 %v5059_v24, %s4931_s22 }
 0x236   : > { %v557_v38 = vpop.xlane.xlu1 %556 }
 0x237   : > { %v564_v39 = vsub.f32 %v4302_v30, %v557_v38 }
 0x238   : > { %v551_v40 = vpop.xlane.xlu0 %550 }
 0x239   : > { %v570_v41 = vmul.f32 1.442695, %v564_v39  ;;  %v562_v42 = vsub.f32 %v533_v32, %v551_v40 }
 0x23a   : > { %v561_v43 = vpop.xlane.xlu1 %560 }
 0x23b   : > { %4659 = vpow2.f32 %v570_v41  ;;  %v566_v44 = vmul.f32 1.442695, %v562_v42  ;;  %v565_v45 = vsub.f32 %v4303_v34, %v561_v43 }
 0x23c   : > { %v554_v46 = vpop.xlane.xlu0 %553 }
 0x23d   : > { %4661 = vpow2.f32 %v566_v44  ;;  %v572_v47 = vmul.f32 1.442695, %v565_v45  ;;  %v563_v48 = vsub.f32 %v536_v36, %v554_v46 }
 0x23e   : > { %v599_v58 = vpop.permute.xlu1 %598 }
 0x23f   : > { %4663 = vpow2.f32 %v572_v47  ;;  %v568_v49 = vmul.f32 1.442695, %v563_v48 }
 0x241   : > { %4665 = vpow2.f32 %v568_v49 }
 0x248   : > { %v4660_v50 = vpop.eup %4659 }
 0x249   : > { %v580_v51 = vsel %vm548_vm2, %v4660_v50, 0.0 }
 0x24a   : > { %v4662_v52 = vpop.eup %4661  ;;  %581 = vadd.xlane.f32.xlu0 %v580_v51 }
 0x24b   : > { %v574_v55 = vsel %vm548_vm2, %v4662_v52, 0.0 }
 0x24c   : > { %v4664_v53 = vpop.eup %4663 }
 0x24d   : > { %v583_v54 = vsel %vm558_vm3, %v4664_v53, 0.0 }
 0x24e   : > { %v4666_v56 = vpop.eup %4665  ;;  %584 = vadd.xlane.f32.xlu1 %v583_v54  ;;  %575 = vadd.xlane.f32.xlu0 %v574_v55 }
 0x24f   : > { %v577_v57 = vsel %vm548_vm2, %v4666_v56, 0.0 }
 0x252   : > { %578 = vadd.xlane.f32.xlu1 %v577_v57 }
 0x263   : > { %678 = vrot.lane.b32.xlu1 %v5057_v21, %s4932_s23 }
 0x264   : > { %600 = vrot.lane.b32.xlu0 %v5057_v21, %s4931_s22 }
 0x267   : > { %676 = vrot.lane.b32.xlu1 %v5059_v24, %s4932_s23 }
 0x268   : > { %672 = vrot.lane.b32.xlu0 %v5067_v27, %s4932_s23 }
 0x26b   : > { %674 = vrot.lane.b32.xlu1 %v5073_v29, %s4932_s23 }
 0x2d3   : > { %v582_v59 = vpop.xlane.xlu0 %581 }
 0x2d7   : > { %v585_v62 = vpop.xlane.xlu1 %584  ;;  %v576_v63 = vpop.xlane.xlu0 %575 }
 0x2d8   : > { %4667 = vrcp.f32 %v585_v62 }
 0x2d9   : > { %4669 = vrcp.f32 %v576_v63 }
 0x2da   : > { %4671 = vrcp.f32 %v582_v59 }
 0x2db   : > { %v579_v1 = vpop.xlane.xlu1 %578  ;;  %v601_v2 = vpop.permute.xlu0 %600 }
 0x2dc   : > { %4673 = vrcp.f32 %v579_v1  ;;  %v614_v3 = vand.u32 %v5097_v0, %v601_v2 }
 0x2de   : > { %4304 = vmatprep.subr.bf16.mxu1 %v614_v3 }
 0x2df   : > { %4305 = vmatpush3.bf16.msra.mxu1 %v614_v3  ;;  %v679_v4 = vpop.permute.xlu1 %678  ;;  %v673_v19 = vpop.permute.xlu0 %672 }
 0x2e0   : > { %4306 = vmatprep.subr.bf16.mxu1 %v599_v58  ;;  %v690_v20 = vsel %vm486_vm1, %v679_v4, 0 }
 0x2e3   : > { %4307 = vmatpush3.bf16.msra.mxu1 %v599_v58  ;;  %v677_v22 = vpop.permute.xlu1 %676 }
 0x2e4   : > { %4586 = vmatprep.subr.msk.bf16.mxu1 %vm486_vm1, %v679_v4  ;;  %v687_v23 = vsel %vm486_vm1, %v677_v22, 0 }
 0x2e5   : > { %v4668_v5 = vpop.eup %4667 }
 0x2e6   : > { %v4670_v6 = vpop.eup %4669  ;;  %v593_v10 = vmul.f32 %v4668_v5, %v4664_v53 }
 0x2e7   : > { %v4672_v8 = vpop.eup %4671  ;;  %v590_v13 = vmul.f32 %v4670_v6, %v4662_v52  ;;  %v675_v25 = vpop.permute.xlu1 %674 }
 0x2e8   : > { %v592_v16 = vmul.f32 %v4672_v8, %v4660_v50 }
 0x2e9   : > { %v4674_v9 = vpop.eup %4673 }
 0x2ea   : > { %v591_v14 = vmul.f32 %v4674_v9, %v4666_v56  ;;  %v595_v18 = vpack.c.bf16 %v593_v10, %v592_v16 }
 0x2ec   : > { %v594_v17 = vpack.c.bf16 %v591_v14, %v590_v13 }
 0x2ee   : > { %4308 = vmatprep.mubr.msk.bf16.mxu1 %vm548_vm2, %v594_v17 }
 0x2ef   : > { %4309 = vmatmul.mubr.msk.bf16.vlgmr.msra.gmra.mxu1 %vm548_vm2, %v595_v18 }
 0x2f0   : > { %4313 = vmatpush3.bf16.xpose.msra.mxu1 %v690_v20  ;;  %4316 = vmatprep.mubr.msk.bf16.mxu1 %vm486_vm1, %v673_v19 }
 0x2f1   : > { %4587 = vmatprep.subr.msk.bf16.mxu1 %vm486_vm1, %v677_v22 }
 0x2f8   : > { %4315 = vmatpush3.bf16.xpose.msra.mxu1 %v687_v23 }
 0x2ff   : > { %4317 = vmatmul.mubr.msk.bf16.vlgmr.msra.gmra.mxu1 %vm486_vm1, %v675_v25 }
 0x3af   : > { %v4310_v26 = vpop.f32.mrf.mxu1 }
 0x3b0   : > { %667 = vst.msk [vmem:[#allocation2 + $0x10] sm:$0xff] %vm486_vm1, %v4310_v26 }
 0x3b1   : > { %v650_v28 = vpop.f32.mrf.mxu1 }
 0x3b2   : > { %665 = vst.msk [vmem:[#allocation2] sm:$0xff] %vm486_vm1, %v650_v28 }
 0x3b3   : > { %v4311_v30 = vpop.f32.mrf.mxu1 }
 0x3b4   : > { %669 = vst.msk [vmem:[#allocation2 + $0x18] sm:$0x1] %vm668_vm6, %v4311_v30 }
 0x3b5   : > { %v653_v31 = vpop.f32.mrf.mxu1 }
 0x3b6   : > { %666 = vst.msk [vmem:[#allocation2 + $0x8] sm:$0xff] %vm486_vm1, %v653_v31 }
 0x3bf   : > { %v4318_v32 = vpop.f32.mrf.mxu1 }
 0x3c0   : > { %v747_v37 = vsel %vm548_vm2, %v4318_v32, -inf }
 0x3c1   : > { %v726_v33 = vpop.f32.mrf.mxu1 }
 0x3c2   : > { %v741_v34 = vsel %vm548_vm2, %v726_v33, -inf }
 0x3c3   : > { %742 = vmax.xlane.f32.xlu0 %v741_v34  ;;  %v4319_v35 = vpop.f32.mrf.mxu1 }
 0x3c4   : > { %v750_v39 = vsel %vm558_vm3, %v4319_v35, -inf }
 0x3c5   : > { %v729_v36 = vpop.f32.mrf.mxu1 }
 0x3c6   : > { %v744_v38 = vsel %vm548_vm2, %v729_v36, -inf }
 0x3c7   : > { %748 = vmax.xlane.f32.xlu0 %v747_v37  ;;  %745 = vmax.xlane.f32.xlu1 %v744_v38 }
 0x3cb   : > { %751 = vmax.xlane.f32.xlu0 %v750_v39 }
 0x3d8   : > { %787 = vrot.lane.b32.xlu1 %v5059_v24, %s4934_s24 }
 0x44c   : > { %v743_v40 = vpop.xlane.xlu0 %742 }
 0x44d   : > { %v753_v41 = vsub.f32 %v726_v33, %v743_v40 }
 0x44f   : > { %v757_v45 = vmul.f32 1.442695, %v753_v41 }
 0x450   : > { %v749_v42 = vpop.xlane.xlu0 %748  ;;  %v746_v43 = vpop.xlane.xlu1 %745 }
 0x451   : > { %v755_v44 = vsub.f32 %v4318_v32, %v749_v42  ;;  %v754_v47 = vsub.f32 %v729_v36, %v746_v43 }
 0x453   : > { %v761_v46 = vmul.f32 1.442695, %v755_v44  ;;  %v759_v50 = vmul.f32 1.442695, %v754_v47 }
 0x454   : > { %v752_v48 = vpop.xlane.xlu0 %751  ;;  %v788_v60 = vpop.permute.xlu1 %787 }
 0x455   : > { %4675 = vpow2.f32 %v761_v46  ;;  %v756_v49 = vsub.f32 %v4319_v35, %v752_v48 }
 0x456   : > { %4677 = vpow2.f32 %v757_v45 }
 0x457   : > { %v763_v51 = vmul.f32 1.442695, %v756_v49 }
 0x459   : > { %4679 = vpow2.f32 %v763_v51 }
 0x45a   : > { %4681 = vpow2.f32 %v759_v50 }
 0x462   : > { %v4676_v52 = vpop.eup %4675 }
 0x463   : > { %v771_v53 = vsel %vm548_vm2, %v4676_v52, 0.0  ;;  %v4678_v54 = vpop.eup %4677 }
 0x464   : > { %772 = vadd.xlane.f32.xlu0 %v771_v53  ;;  %v765_v56 = vsel %vm548_vm2, %v4678_v54, 0.0 }
 0x466   : > { %v4680_v55 = vpop.eup %4679 }
 0x467   : > { %v774_v57 = vsel %vm558_vm3, %v4680_v55, 0.0  ;;  %v4682_v58 = vpop.eup %4681 }
 0x468   : > { %766 = vadd.xlane.f32.xlu0 %v765_v56  ;;  %775 = vadd.xlane.f32.xlu1 %v774_v57  ;;  %v768_v59 = vsel %vm548_vm2, %v4682_v58, 0.0 }
 0x46c   : > { %769 = vadd.xlane.f32.xlu1 %v768_v59 }
 0x47d   : > { %878 = vrot.lane.b32.xlu1 %v5057_v21, %s4935_s25 }
 0x47e   : > { %789 = vrot.lane.b32.xlu0 %v5057_v21, %s4934_s24 }
 0x481   : > { %876 = vrot.lane.b32.xlu1 %v5059_v24, %s4935_s25 }
 0x482   : > { %872 = vrot.lane.b32.xlu0 %v5067_v27, %s4935_s25 }
 0x485   : > { %874 = vrot.lane.b32.xlu1 %v5073_v29, %s4935_s25 }
 0x4ed   : > { %v773_v61 = vpop.xlane.xlu0 %772 }
 0x4f1   : > { %v767_v62 = vpop.xlane.xlu0 %766  ;;  %v776_v63 = vpop.xlane.xlu1 %775 }
 0x4f2   : > { %4683 = vrcp.f32 %v776_v63 }
 0x4f3   : > { %4685 = vrcp.f32 %v767_v62 }
 0x4f4   : > { %4687 = vrcp.f32 %v773_v61 }
 0x4f5   : > { %v790_v1 = vpop.permute.xlu0 %789  ;;  %v770_v2 = vpop.xlane.xlu1 %769 }
 0x4f6   : > { %v799_v3 = vand.u32 %v790_v1, %v5097_v0  ;;  %4689 = vrcp.f32 %v770_v2 }
 0x4f8   : > { %4320 = vmatprep.subr.bf16.mxu0 %v799_v3 }
 0x4f9   : > { %4321 = vmatpush3.bf16.msra.mxu0 %v799_v3  ;;  %v879_v4 = vpop.permute.xlu1 %878  ;;  %v873_v19 = vpop.permute.xlu0 %872 }
 0x4fa   : > { %4322 = vmatprep.subr.bf16.mxu0 %v788_v60  ;;  %v890_v20 = vsel %vm486_vm1, %v879_v4, 0 }
 0x4fd   : > { %4323 = vmatpush3.bf16.msra.mxu0 %v788_v60  ;;  %v877_v22 = vpop.permute.xlu1 %876 }
 0x4fe   : > { %4588 = vmatprep.subr.msk.bf16.mxu0 %vm486_vm1, %v879_v4  ;;  %v887_v23 = vsel %vm486_vm1, %v877_v22, 0 }
 0x4ff   : > { %v4684_v5 = vpop.eup %4683 }
 0x500   : > { %v4686_v6 = vpop.eup %4685  ;;  %v784_v10 = vmul.f32 %v4684_v5, %v4680_v55 }
 0x501   : > { %v4688_v8 = vpop.eup %4687  ;;  %v781_v13 = vmul.f32 %v4686_v6, %v4678_v54  ;;  %v875_v25 = vpop.permute.xlu1 %874 }
 0x502   : > { %v783_v16 = vmul.f32 %v4688_v8, %v4676_v52 }
 0x503   : > { %v4690_v9 = vpop.eup %4689 }
 0x504   : > { %v782_v14 = vmul.f32 %v4690_v9, %v4682_v58  ;;  %v786_v18 = vpack.c.bf16 %v784_v10, %v783_v16 }
 0x506   : > { %v785_v17 = vpack.c.bf16 %v782_v14, %v781_v13 }
 0x508   : > { %4324 = vmatprep.mubr.msk.bf16.mxu0 %vm548_vm2, %v785_v17 }
 0x509   : > { %4325 = vmatmul.mubr.msk.bf16.vlgmr.msra.gmra.mxu0 %vm548_vm2, %v786_v18 }
 0x50a   : > { %4329 = vmatpush3.bf16.xpose.msra.mxu0 %v890_v20  ;;  %4332 = vmatprep.mubr.msk.bf16.mxu0 %vm486_vm1, %v873_v19 }
 0x50b   : > { %4589 = vmatprep.subr.msk.bf16.mxu0 %vm486_vm1, %v877_v22 }
 0x512   : > { %4331 = vmatpush3.bf16.xpose.msra.mxu0 %v887_v23 }
 0x519   : > { %4333 = vmatmul.mubr.msk.bf16.vlgmr.msra.gmra.mxu0 %vm486_vm1, %v875_v25 }
 0x5c9   : > { %v5141_v26 = vpop.f32.mrf.mxu0 }
 0x5cb   : > { %v5143_v28 = vpop.f32.mrf.mxu0 }
 0x5cd   : > { %v5145_v30 = vpop.f32.mrf.mxu0 }
 0x5cf   : > { %v5147_v31 = vpop.f32.mrf.mxu0 }
 0x5d9   : > { %v4334_v32 = vpop.f32.mrf.mxu0 }
 0x5da   : > { %v947_v37 = vsel %vm548_vm2, %v4334_v32, -inf }
 0x5db   : > { %v926_v33 = vpop.f32.mrf.mxu0 }
 0x5dc   : > { %v941_v34 = vsel %vm548_vm2, %v926_v33, -inf }
 0x5dd   : > { %942 = vmax.xlane.f32.xlu0 %v941_v34  ;;  %v4335_v35 = vpop.f32.mrf.mxu0 }
 0x5de   : > { %v950_v39 = vsel %vm558_vm3, %v4335_v35, -inf }
 0x5df   : > { %v929_v36 = vpop.f32.mrf.mxu0 }
 0x5e0   : > { %v944_v38 = vsel %vm548_vm2, %v929_v36, -inf }
 0x5e1   : > { %948 = vmax.xlane.f32.xlu0 %v947_v37  ;;  %945 = vmax.xlane.f32.xlu1 %v944_v38 }
 0x5e5   : > { %951 = vmax.xlane.f32.xlu0 %v950_v39 }
 0x5f2   : > { %987 = vrot.lane.b32.xlu1 %v5059_v24, %s4936_s26 }
 0x666   : > { %v943_v40 = vpop.xlane.xlu0 %942 }
 0x667   : > { %v953_v41 = vsub.f32 %v926_v33, %v943_v40 }
 0x669   : > { %v957_v45 = vmul.f32 1.442695, %v953_v41 }
 0x66a   : > { %v949_v42 = vpop.xlane.xlu0 %948  ;;  %v946_v43 = vpop.xlane.xlu1 %945 }
 0x66b   : > { %v955_v44 = vsub.f32 %v4334_v32, %v949_v42  ;;  %v954_v47 = vsub.f32 %v929_v36, %v946_v43 }
 0x66d   : > { %v961_v46 = vmul.f32 1.442695, %v955_v44  ;;  %v959_v50 = vmul.f32 1.442695, %v954_v47 }
 0x66e   : > { %v952_v48 = vpop.xlane.xlu0 %951  ;;  %v988_v60 = vpop.permute.xlu1 %987 }
 0x66f   : > { %4691 = vpow2.f32 %v961_v46  ;;  %v956_v49 = vsub.f32 %v4335_v35, %v952_v48 }
 0x670   : > { %4693 = vpow2.f32 %v957_v45 }
 0x671   : > { %v963_v51 = vmul.f32 1.442695, %v956_v49 }
 0x673   : > { %4695 = vpow2.f32 %v963_v51 }
 0x674   : > { %4697 = vpow2.f32 %v959_v50 }
 0x67c   : > { %v4692_v52 = vpop.eup %4691 }
 0x67d   : > { %v971_v53 = vsel %vm548_vm2, %v4692_v52, 0.0  ;;  %v4694_v54 = vpop.eup %4693 }
 0x67e   : > { %972 = vadd.xlane.f32.xlu0 %v971_v53  ;;  %v965_v56 = vsel %vm548_vm2, %v4694_v54, 0.0 }
 0x680   : > { %v4696_v55 = vpop.eup %4695 }
 0x681   : > { %v974_v57 = vsel %vm558_vm3, %v4696_v55, 0.0  ;;  %v4698_v58 = vpop.eup %4697 }
 0x682   : > { %966 = vadd.xlane.f32.xlu0 %v965_v56  ;;  %975 = vadd.xlane.f32.xlu1 %v974_v57  ;;  %v968_v59 = vsel %vm548_vm2, %v4698_v58, 0.0 }
 0x686   : > { %969 = vadd.xlane.f32.xlu1 %v968_v59 }
 0x697   : > { %1078 = vrot.lane.b32.xlu1 %v5057_v21, %s4937_s28 }
 0x698   : > { %989 = vrot.lane.b32.xlu0 %v5057_v21, %s4936_s26 }
 0x69b   : > { %1076 = vrot.lane.b32.xlu1 %v5059_v24, %s4937_s28 }
 0x69c   : > { %1072 = vrot.lane.b32.xlu0 %v5067_v27, %s4937_s28 }
 0x69f   : > { %1074 = vrot.lane.b32.xlu1 %v5073_v29, %s4937_s28 }
 0x707   : > { %v973_v61 = vpop.xlane.xlu0 %972 }
 0x70b   : > { %v967_v62 = vpop.xlane.xlu0 %966  ;;  %v976_v63 = vpop.xlane.xlu1 %975 }
 0x70c   : > { %4699 = vrcp.f32 %v976_v63 }
 0x70d   : > { %4701 = vrcp.f32 %v967_v62 }
 0x70e   : > { %4703 = vrcp.f32 %v973_v61 }
 0x70f   : > { %v990_v1 = vpop.permute.xlu0 %989  ;;  %v970_v2 = vpop.xlane.xlu1 %969 }
 0x710   : > { %v999_v3 = vand.u32 %v990_v1, %v5097_v0  ;;  %4705 = vrcp.f32 %v970_v2 }
 0x712   : > { %4336 = vmatprep.subr.bf16.mxu1 %v999_v3 }
 0x713   : > { %4337 = vmatpush3.bf16.msra.mxu1 %v999_v3  ;;  %v1079_v4 = vpop.permute.xlu1 %1078  ;;  %v1073_v19 = vpop.permute.xlu0 %1072 }
 0x714   : > { %4338 = vmatprep.subr.bf16.mxu1 %v988_v60  ;;  %v1090_v20 = vsel %vm486_vm1, %v1079_v4, 0 }
 0x717   : > { %4339 = vmatpush3.bf16.msra.mxu1 %v988_v60  ;;  %v1077_v22 = vpop.permute.xlu1 %1076 }
 0x718   : > { %4590 = vmatprep.subr.msk.bf16.mxu1 %vm486_vm1, %v1079_v4  ;;  %v1087_v23 = vsel %vm486_vm1, %v1077_v22, 0 }
 0x719   : > { %v4700_v5 = vpop.eup %4699 }
 0x71a   : > { %v4702_v6 = vpop.eup %4701  ;;  %v984_v10 = vmul.f32 %v4700_v5, %v4696_v55 }
 0x71b   : > { %v4704_v8 = vpop.eup %4703  ;;  %v981_v13 = vmul.f32 %v4702_v6, %v4694_v54  ;;  %v1075_v25 = vpop.permute.xlu1 %1074 }
 0x71c   : > { %v983_v16 = vmul.f32 %v4704_v8, %v4692_v52 }
 0x71d   : > { %v4706_v9 = vpop.eup %4705 }
 0x71e   : > { %v982_v14 = vmul.f32 %v4706_v9, %v4698_v58  ;;  %v986_v18 = vpack.c.bf16 %v984_v10, %v983_v16 }
 0x720   : > { %v985_v17 = vpack.c.bf16 %v982_v14, %v981_v13 }
 0x722   : > { %4340 = vmatprep.mubr.msk.bf16.mxu1 %vm548_vm2, %v985_v17 }
 0x723   : > { %4341 = vmatmul.mubr.msk.bf16.vlgmr.msra.gmra.mxu1 %vm548_vm2, %v986_v18 }
 0x724   : > { %4345 = vmatpush3.bf16.xpose.msra.mxu1 %v1090_v20  ;;  %4348 = vmatprep.mubr.msk.bf16.mxu1 %vm486_vm1, %v1073_v19 }
 0x725   : > { %4591 = vmatprep.subr.msk.bf16.mxu1 %vm486_vm1, %v1077_v22 }
 0x72c   : > { %4347 = vmatpush3.bf16.xpose.msra.mxu1 %v1087_v23 }
 0x733   : > { %4349 = vmatmul.mubr.msk.bf16.vlgmr.msra.gmra.mxu1 %vm486_vm1, %v1075_v25 }
 0x7e3   : > { %v5178_v32 = vpop.f32.mrf.mxu1 }
 0x7e5   : > { %v5180_v33 = vpop.f32.mrf.mxu1 }
 0x7e7   : > { %v5182_v34 = vpop.f32.mrf.mxu1 }
 0x7e9   : > { %v5184_v35 = vpop.f32.mrf.mxu1 }
 0x7f3   : > { %v4350_v36 = vpop.f32.mrf.mxu1 }
 0x7f4   : > { %v1147_v41 = vsel %vm548_vm2, %v4350_v36, -inf }
 0x7f5   : > { %v1126_v37 = vpop.f32.mrf.mxu1 }
 0x7f6   : > { %v1141_v38 = vsel %vm548_vm2, %v1126_v37, -inf }
 0x7f7   : > { %1142 = vmax.xlane.f32.xlu0 %v1141_v38  ;;  %v4351_v39 = vpop.f32.mrf.mxu1 }
 0x7f8   : > { %v1150_v43 = vsel %vm558_vm3, %v4351_v39, -inf }
 0x7f9   : > { %v1129_v40 = vpop.f32.mrf.mxu1 }
 0x7fa   : > { %v1144_v42 = vsel %vm548_vm2, %v1129_v40, -inf }
 0x7fb   : > { %1148 = vmax.xlane.f32.xlu0 %v1147_v41  ;;  %1145 = vmax.xlane.f32.xlu1 %v1144_v42 }
 0x7ff   : > { %1151 = vmax.xlane.f32.xlu0 %v1150_v43 }
 0x80c   : > { %1187 = vrot.lane.b32.xlu1 %v5059_v24, %s4938_s29 }
 0x880   : > { %v1143_v44 = vpop.xlane.xlu0 %1142 }
 0x881   : > { %v1153_v45 = vsub.f32 %v1126_v37, %v1143_v44 }
 0x883   : > { %v1157_v49 = vmul.f32 1.442695, %v1153_v45 }
 0x884   : > { %v1149_v46 = vpop.xlane.xlu0 %1148  ;;  %v1146_v47 = vpop.xlane.xlu1 %1145 }
 0x885   : > { %v1155_v48 = vsub.f32 %v4350_v36, %v1149_v46  ;;  %v1154_v51 = vsub.f32 %v1129_v40, %v1146_v47 }
 0x887   : > { %v1161_v50 = vmul.f32 1.442695, %v1155_v48  ;;  %v1159_v54 = vmul.f32 1.442695, %v1154_v51 }
 0x888   : > { %v1152_v52 = vpop.xlane.xlu0 %1151  ;;  %v1188_v1 = vpop.permute.xlu1 %1187 }
 0x889   : > { %4707 = vpow2.f32 %v1161_v50  ;;  %v1156_v53 = vsub.f32 %v4351_v39, %v1152_v52 }
 0x88a   : > { %4709 = vpow2.f32 %v1157_v49 }
 0x88b   : > { %v1163_v55 = vmul.f32 1.442695, %v1156_v53 }
 0x88d   : > { %4711 = vpow2.f32 %v1163_v55 }
 0x88e   : > { %4713 = vpow2.f32 %v1159_v54 }
 0x896   : > { %v4708_v56 = vpop.eup %4707 }
 0x897   : > { %v1171_v57 = vsel %vm548_vm2, %v4708_v56, 0.0  ;;  %v4710_v58 = vpop.eup %4709 }
 0x898   : > { %1172 = vadd.xlane.f32.xlu0 %v1171_v57  ;;  %v1165_v60 = vsel %vm548_vm2, %v4710_v58, 0.0 }
 0x89a   : > { %v4712_v59 = vpop.eup %4711 }
 0x89b   : > { %v1174_v61 = vsel %vm558_vm3, %v4712_v59, 0.0  ;;  %v4714_v62 = vpop.eup %4713 }
 0x89c   : > { %1166 = vadd.xlane.f32.xlu0 %v1165_v60  ;;  %1175 = vadd.xlane.f32.xlu1 %v1174_v61  ;;  %v1168_v63 = vsel %vm548_vm2, %v4714_v62, 0.0 }
 0x8a0   : > { %1169 = vadd.xlane.f32.xlu1 %v1168_v63 }
 0x8b1   : > { %1278 = vrot.lane.b32.xlu1 %v5057_v21, %s4939_s30 }
 0x8b2   : > { %1189 = vrot.lane.b32.xlu0 %v5057_v21, %s4938_s29 }
 0x8b5   : > { %1276 = vrot.lane.b32.xlu1 %v5059_v24, %s4939_s30 }
 0x8b6   : > { %1272 = vrot.lane.b32.xlu0 %v5067_v27, %s4939_s30 }
 0x8b9   : > { %1274 = vrot.lane.b32.xlu1 %v5073_v29, %s4939_s30 }
 0x921   : > { %v1173_v2 = vpop.xlane.xlu0 %1172 }
 0x925   : > { %v1167_v3 = vpop.xlane.xlu0 %1166  ;;  %v1176_v4 = vpop.xlane.xlu1 %1175 }
 0x926   : > { %4715 = vrcp.f32 %v1176_v4 }
 0x927   : > { %4717 = vrcp.f32 %v1167_v3 }
 0x928   : > { %4719 = vrcp.f32 %v1173_v2 }
 0x929   : > { %v1190_v5 = vpop.permute.xlu0 %1189  ;;  %v1170_v6 = vpop.xlane.xlu1 %1169 }
 0x92a   : > { %v1199_v8 = vand.u32 %v1190_v5, %v5097_v0  ;;  %4721 = vrcp.f32 %v1170_v6 }
 0x92c   : > { %4352 = vmatprep.subr.bf16.mxu0 %v1199_v8 }
 0x92d   : > { %4353 = vmatpush3.bf16.msra.mxu0 %v1199_v8  ;;  %v1279_v9 = vpop.permute.xlu1 %1278  ;;  %v1273_v25 = vpop.permute.xlu0 %1272 }
 0x92e   : > { %4354 = vmatprep.subr.bf16.mxu0 %v1188_v1  ;;  %v1290_v36 = vsel %vm486_vm1, %v1279_v9, 0 }
 0x931   : > { %4355 = vmatpush3.bf16.msra.mxu0 %v1188_v1  ;;  %v1277_v37 = vpop.permute.xlu1 %1276 }
 0x932   : > { %4592 = vmatprep.subr.msk.bf16.mxu0 %vm486_vm1, %v1279_v9  ;;  %v1287_v38 = vsel %vm486_vm1, %v1277_v37, 0 }
 0x933   : > { %v4716_v10 = vpop.eup %4715 }
 0x934   : > { %v4718_v13 = vpop.eup %4717  ;;  %v1184_v17 = vmul.f32 %v4716_v10, %v4712_v59 }
 0x935   : > { %v4720_v14 = vpop.eup %4719  ;;  %v1181_v18 = vmul.f32 %v4718_v13, %v4710_v58  ;;  %v1275_v39 = vpop.permute.xlu1 %1274 }
 0x936   : > { %v1183_v20 = vmul.f32 %v4720_v14, %v4708_v56 }
 0x937   : > { %v4722_v16 = vpop.eup %4721 }
 0x938   : > { %v1182_v19 = vmul.f32 %v4722_v16, %v4714_v62  ;;  %v1186_v23 = vpack.c.bf16 %v1184_v17, %v1183_v20 }
 0x93a   : > { %v1185_v22 = vpack.c.bf16 %v1182_v19, %v1181_v18 }
 0x93c   : > { %4356 = vmatprep.mubr.msk.bf16.mxu0 %vm548_vm2, %v1185_v22 }
 0x93d   : > { %4357 = vmatmul.mubr.msk.bf16.vlgmr.msra.gmra.mxu0 %vm548_vm2, %v1186_v23 }
 0x93e   : > { %4361 = vmatpush3.bf16.xpose.msra.mxu0 %v1290_v36  ;;  %4364 = vmatprep.mubr.msk.bf16.mxu0 %vm486_vm1, %v1273_v25 }
 0x93f   : > { %4593 = vmatprep.subr.msk.bf16.mxu0 %vm486_vm1, %v1277_v37 }
 0x946   : > { %4363 = vmatpush3.bf16.xpose.msra.mxu0 %v1287_v38 }
 0x94d   : > { %4365 = vmatmul.mubr.msk.bf16.vlgmr.msra.gmra.mxu0 %vm486_vm1, %v1275_v39 }
 0x9fd   : > { %v5215_v40 = vpop.f32.mrf.mxu0 }
 0x9ff   : > { %v5217_v41 = vpop.f32.mrf.mxu0 }
 0xa01   : > { %v5219_v42 = vpop.f32.mrf.mxu0 }
 0xa03   : > { %v5221_v43 = vpop.f32.mrf.mxu0 }
 0xa0d   : > { %v4366_v44 = vpop.f32.mrf.mxu0 }
 0xa0e   : > { %v1347_v49 = vsel %vm548_vm2, %v4366_v44, -inf }
 0xa0f   : > { %v1326_v45 = vpop.f32.mrf.mxu0 }
 0xa10   : > { %v1341_v46 = vsel %vm548_vm2, %v1326_v45, -inf }
 0xa11   : > { %1342 = vmax.xlane.f32.xlu0 %v1341_v46  ;;  %v4367_v47 = vpop.f32.mrf.mxu0 }
 0xa12   : > { %v1350_v51 = vsel %vm558_vm3, %v4367_v47, -inf }
 0xa13   : > { %v1329_v48 = vpop.f32.mrf.mxu0 }
 0xa14   : > { %v1344_v50 = vsel %vm548_vm2, %v1329_v48, -inf }
 0xa15   : > { %1348 = vmax.xlane.f32.xlu0 %v1347_v49  ;;  %1345 = vmax.xlane.f32.xlu1 %v1344_v50 }
 0xa19   : > { %1351 = vmax.xlane.f32.xlu0 %v1350_v51 }
 0xa26   : > { %1387 = vrot.lane.b32.xlu1 %v5059_v24, %s4940_s9 }
 0xa9a   : > { %v1343_v52 = vpop.xlane.xlu0 %1342 }
 0xa9b   : > { %v1353_v53 = vsub.f32 %v1326_v45, %v1343_v52 }
 0xa9d   : > { %v1357_v57 = vmul.f32 1.442695, %v1353_v53 }
 0xa9e   : > { %v1349_v54 = vpop.xlane.xlu0 %1348  ;;  %v1346_v55 = vpop.xlane.xlu1 %1345 }
 0xa9f   : > { %v1355_v56 = vsub.f32 %v4366_v44, %v1349_v54  ;;  %v1354_v59 = vsub.f32 %v1329_v48, %v1346_v55 }
 0xaa1   : > { %v1361_v58 = vmul.f32 1.442695, %v1355_v56  ;;  %v1359_v62 = vmul.f32 1.442695, %v1354_v59 }
 0xaa2   : > { %v1352_v60 = vpop.xlane.xlu0 %1351  ;;  %v1388_v10 = vpop.permute.xlu1 %1387 }
 0xaa3   : > { %4723 = vpow2.f32 %v1361_v58  ;;  %v1356_v61 = vsub.f32 %v4367_v47, %v1352_v60 }
 0xaa4   : > { %4725 = vpow2.f32 %v1357_v57 }
 0xaa5   : > { %v1363_v63 = vmul.f32 1.442695, %v1356_v61 }
 0xaa7   : > { %4727 = vpow2.f32 %v1363_v63 }
 0xaa8   : > { %4729 = vpow2.f32 %v1359_v62 }
 0xab0   : > { %v4724_v1 = vpop.eup %4723 }
 0xab1   : > { %v1371_v2 = vsel %vm548_vm2, %v4724_v1, 0.0  ;;  %v4726_v3 = vpop.eup %4725 }
 0xab2   : > { %1372 = vadd.xlane.f32.xlu0 %v1371_v2  ;;  %v1365_v5 = vsel %vm548_vm2, %v4726_v3, 0.0 }
 0xab4   : > { %v4728_v4 = vpop.eup %4727 }
 0xab5   : > { %v1374_v6 = vsel %vm558_vm3, %v4728_v4, 0.0  ;;  %v4730_v8 = vpop.eup %4729 }
 0xab6   : > { %1366 = vadd.xlane.f32.xlu0 %v1365_v5  ;;  %1375 = vadd.xlane.f32.xlu1 %v1374_v6  ;;  %v1368_v9 = vsel %vm548_vm2, %v4730_v8, 0.0 }
 0xaba   : > { %1369 = vadd.xlane.f32.xlu1 %v1368_v9 }
 0xacb   : > { %1478 = vrot.lane.b32.xlu1 %v5057_v21, %s4941_s10 }
 0xacc   : > { %1389 = vrot.lane.b32.xlu0 %v5057_v21, %s4940_s9 }
 0xacf   : > { %1476 = vrot.lane.b32.xlu1 %v5059_v24, %s4941_s10 }
 0xad0   : > { %1472 = vrot.lane.b32.xlu0 %v5067_v27, %s4941_s10 }
 0xad3   : > { %1474 = vrot.lane.b32.xlu1 %v5073_v29, %s4941_s10 }
 0xb3b   : > { %v1373_v13 = vpop.xlane.xlu0 %1372 }
 0xb3f   : > { %v1367_v14 = vpop.xlane.xlu0 %1366  ;;  %v1376_v16 = vpop.xlane.xlu1 %1375 }
 0xb40   : > { %4731 = vrcp.f32 %v1376_v16 }
 0xb41   : > { %4733 = vrcp.f32 %v1367_v14 }
 0xb42   : > { %4735 = vrcp.f32 %v1373_v13 }
 0xb43   : > { %v1390_v17 = vpop.permute.xlu0 %1389  ;;  %v1370_v18 = vpop.xlane.xlu1 %1369 }
 0xb44   : > { %v1399_v19 = vand.u32 %v1390_v17, %v5097_v0  ;;  %4737 = vrcp.f32 %v1370_v18 }
 0xb46   : > { %4368 = vmatprep.subr.bf16.mxu1 %v1399_v19 }
 0xb47   : > { %4369 = vmatpush3.bf16.msra.mxu1 %v1399_v19  ;;  %v1479_v20 = vpop.permute.xlu1 %1478  ;;  %v1473_v47 = vpop.permute.xlu0 %1472 }
 0xb48   : > { %4370 = vmatprep.subr.bf16.mxu1 %v1388_v10  ;;  %v1490_v48 = vsel %vm486_vm1, %v1479_v20, 0 }
 0xb4b   : > { %4371 = vmatpush3.bf16.msra.mxu1 %v1388_v10  ;;  %v1477_v49 = vpop.permute.xlu1 %1476 }
 0xb4c   : > { %4594 = vmatprep.subr.msk.bf16.mxu1 %vm486_vm1, %v1479_v20  ;;  %v1487_v50 = vsel %vm486_vm1, %v1477_v49, 0 }
 0xb4d   : > { %v4732_v22 = vpop.eup %4731 }
 0xb4e   : > { %v4734_v23 = vpop.eup %4733  ;;  %v1384_v37 = vmul.f32 %v4732_v22, %v4728_v4 }
 0xb4f   : > { %v4736_v25 = vpop.eup %4735  ;;  %v1381_v38 = vmul.f32 %v4734_v23, %v4726_v3  ;;  %v1475_v51 = vpop.permute.xlu1 %1474 }
 0xb50   : > { %v1383_v44 = vmul.f32 %v4736_v25, %v4724_v1 }
 0xb51   : > { %v4738_v36 = vpop.eup %4737 }
 0xb52   : > { %v1382_v39 = vmul.f32 %v4738_v36, %v4730_v8  ;;  %v1386_v46 = vpack.c.bf16 %v1384_v37, %v1383_v44 }
 0xb54   : > { %v1385_v45 = vpack.c.bf16 %v1382_v39, %v1381_v38 }
 0xb56   : > { %4372 = vmatprep.mubr.msk.bf16.mxu1 %vm548_vm2, %v1385_v45 }
 0xb57   : > { %4373 = vmatmul.mubr.msk.bf16.vlgmr.msra.gmra.mxu1 %vm548_vm2, %v1386_v46 }
 0xb58   : > { %4377 = vmatpush3.bf16.xpose.msra.mxu1 %v1490_v48  ;;  %4380 = vmatprep.mubr.msk.bf16.mxu1 %vm486_vm1, %v1473_v47 }
 0xb59   : > { %4595 = vmatprep.subr.msk.bf16.mxu1 %vm486_vm1, %v1477_v49 }
 0xb60   : > { %4379 = vmatpush3.bf16.xpose.msra.mxu1 %v1487_v50 }
 0xb67   : > { %4381 = vmatmul.mubr.msk.bf16.vlgmr.msra.gmra.mxu1 %vm486_vm1, %v1475_v51 }
 0xc17   : > { %v5252_v52 = vpop.f32.mrf.mxu1 }
 0xc19   : > { %v5254_v53 = vpop.f32.mrf.mxu1 }
 0xc1b   : > { %v5256_v54 = vpop.f32.mrf.mxu1 }
 0xc1d   : > { %v5258_v55 = vpop.f32.mrf.mxu1 }
 0xc27   : > { %v4382_v56 = vpop.f32.mrf.mxu1 }
 0xc28   : > { %v1547_v61 = vsel %vm548_vm2, %v4382_v56, -inf }
 0xc29   : > { %v1526_v57 = vpop.f32.mrf.mxu1 }
 0xc2a   : > { %v1541_v58 = vsel %vm548_vm2, %v1526_v57, -inf }
 0xc2b   : > { %1542 = vmax.xlane.f32.xlu0 %v1541_v58  ;;  %v4383_v59 = vpop.f32.mrf.mxu1 }
 0xc2c   : > { %v1550_v63 = vsel %vm558_vm3, %v4383_v59, -inf }
 0xc2d   : > { %v1529_v60 = vpop.f32.mrf.mxu1 }
 0xc2e   : > { %v1544_v62 = vsel %vm548_vm2, %v1529_v60, -inf }
 0xc2f   : > { %1548 = vmax.xlane.f32.xlu0 %v1547_v61  ;;  %1545 = vmax.xlane.f32.xlu1 %v1544_v62 }
 0xc33   : > { %1551 = vmax.xlane.f32.xlu0 %v1550_v63 }
 0xc40   : > { %1587 = vrot.lane.b32.xlu1 %v5059_v24, %s4942_s11 }
 0xcb4   : > { %v1543_v1 = vpop.xlane.xlu0 %1542 }
 0xcb5   : > { %v1553_v2 = vsub.f32 %v1526_v57, %v1543_v1 }
 0xcb7   : > { %v1557_v6 = vmul.f32 1.442695, %v1553_v2 }
 0xcb8   : > { %v1549_v3 = vpop.xlane.xlu0 %1548  ;;  %v1546_v4 = vpop.xlane.xlu1 %1545 }
 0xcb9   : > { %v1555_v5 = vsub.f32 %v4382_v56, %v1549_v3  ;;  %v1554_v9 = vsub.f32 %v1529_v60, %v1546_v4 }
 0xcbb   : > { %v1561_v8 = vmul.f32 1.442695, %v1555_v5  ;;  %v1559_v14 = vmul.f32 1.442695, %v1554_v9 }
 0xcbc   : > { %v1552_v10 = vpop.xlane.xlu0 %1551  ;;  %v1588_v37 = vpop.permute.xlu1 %1587 }
 0xcbd   : > { %4739 = vpow2.f32 %v1561_v8  ;;  %v1556_v13 = vsub.f32 %v4383_v59, %v1552_v10 }
 0xcbe   : > { %4741 = vpow2.f32 %v1557_v6 }
 0xcbf   : > { %v1563_v16 = vmul.f32 1.442695, %v1556_v13 }
 0xcc1   : > { %4743 = vpow2.f32 %v1563_v16 }
 0xcc2   : > { %4745 = vpow2.f32 %v1559_v14 }
 0xcca   : > { %v4740_v17 = vpop.eup %4739 }
 0xccb   : > { %v1571_v18 = vsel %vm548_vm2, %v4740_v17, 0.0  ;;  %v4742_v19 = vpop.eup %4741 }
 0xccc   : > { %1572 = vadd.xlane.f32.xlu0 %v1571_v18  ;;  %v1565_v22 = vsel %vm548_vm2, %v4742_v19, 0.0 }
 0xcce   : > { %v4744_v20 = vpop.eup %4743 }
 0xccf   : > { %v1574_v23 = vsel %vm558_vm3, %v4744_v20, 0.0  ;;  %v4746_v25 = vpop.eup %4745 }
 0xcd0   : > { %1566 = vadd.xlane.f32.xlu0 %v1565_v22  ;;  %1575 = vadd.xlane.f32.xlu1 %v1574_v23  ;;  %v1568_v36 = vsel %vm548_vm2, %v4746_v25, 0.0 }
 0xcd4   : > { %1569 = vadd.xlane.f32.xlu1 %v1568_v36 }
 0xce5   : > { %1678 = vrot.lane.b32.xlu1 %v5057_v21, %s5927_s12 }
 0xce6   : > { %1589 = vrot.lane.b32.xlu0 %v5057_v21, %s4942_s11 }
 0xce9   : > { %1676 = vrot.lane.b32.xlu1 %v5059_v24, %s5927_s12 }
 0xcea   : > { %1672 = vrot.lane.b32.xlu0 %v5067_v27, %s5927_s12 }
 0xced   : > { %1674 = vrot.lane.b32.xlu1 %v5073_v29, %s5927_s12 }
 0xd55   : > { %v1573_v38 = vpop.xlane.xlu0 %1572 }
 0xd59   : > { %v1567_v39 = vpop.xlane.xlu0 %1566  ;;  %v1576_v44 = vpop.xlane.xlu1 %1575 }
 0xd5a   : > { %4747 = vrcp.f32 %v1576_v44 }
 0xd5b   : > { %4749 = vrcp.f32 %v1567_v39 }
 0xd5c   : > { %4751 = vrcp.f32 %v1573_v38 }
 0xd5d   : > { %v1590_v45 = vpop.permute.xlu0 %1589  ;;  %v1570_v46 = vpop.xlane.xlu1 %1569 }
 0xd5e   : > { %v1599_v47 = vand.u32 %v1590_v45, %v5097_v0  ;;  %4753 = vrcp.f32 %v1570_v46 }
 0xd60   : > { %4384 = vmatprep.subr.bf16.mxu0 %v1599_v47 }
 0xd61   : > { %4385 = vmatpush3.bf16.msra.mxu0 %v1599_v47  ;;  %v1679_v48 = vpop.permute.xlu1 %1678  ;;  %v1673_v63 = vpop.permute.xlu0 %1672 }
 0xd62   : > { %4386 = vmatprep.subr.bf16.mxu0 %v1588_v37  ;;  %v1690_v1 = vsel %vm486_vm1, %v1679_v48, 0 }
 0xd65   : > { %4387 = vmatpush3.bf16.msra.mxu0 %v1588_v37  ;;  %v1677_v2 = vpop.permute.xlu1 %1676 }
 0xd66   : > { %4596 = vmatprep.subr.msk.bf16.mxu0 %vm486_vm1, %v1679_v48  ;;  %v1687_v3 = vsel %vm486_vm1, %v1677_v2, 0 }
 0xd67   : > { %v4748_v49 = vpop.eup %4747 }
 0xd68   : > { %v4750_v50 = vpop.eup %4749  ;;  %v1584_v57 = vmul.f32 %v4748_v49, %v4744_v20 }
 0xd69   : > { %v4752_v51 = vpop.eup %4751  ;;  %v1581_v58 = vmul.f32 %v4750_v50, %v4742_v19  ;;  %v1675_v4 = vpop.permute.xlu1 %1674 }
 0xd6a   : > { %v1583_v60 = vmul.f32 %v4752_v51, %v4740_v17 }
 0xd6b   : > { %v4754_v56 = vpop.eup %4753 }
 0xd6c   : > { %v1582_v59 = vmul.f32 %v4754_v56, %v4746_v25  ;;  %v1586_v62 = vpack.c.bf16 %v1584_v57, %v1583_v60 }
 0xd6e   : > { %v1585_v61 = vpack.c.bf16 %v1582_v59, %v1581_v58 }
 0xd70   : > { %4388 = vmatprep.mubr.msk.bf16.mxu0 %vm548_vm2, %v1585_v61 }
 0xd71   : > { %4389 = vmatmul.mubr.msk.bf16.vlgmr.msra.gmra.mxu0 %vm548_vm2, %v1586_v62 }
 0xd72   : > { %4393 = vmatpush3.bf16.xpose.msra.mxu0 %v1690_v1  ;;  %4396 = vmatprep.mubr.msk.bf16.mxu0 %vm486_vm1, %v1673_v63 }
 0xd73   : > { %4597 = vmatprep.subr.msk.bf16.mxu0 %vm486_vm1, %v1677_v2 }
 0xd7a   : > { %4395 = vmatpush3.bf16.xpose.msra.mxu0 %v1687_v3 }
 0xd81   : > { %4397 = vmatmul.mubr.msk.bf16.vlgmr.msra.gmra.mxu0 %vm486_vm1, %v1675_v4 }
 0xe31   : > { %v5289_v5 = vpop.f32.mrf.mxu0 }
 0xe33   : > { %v5291_v6 = vpop.f32.mrf.mxu0 }
 0xe35   : > { %v5293_v8 = vpop.f32.mrf.mxu0 }
 0xe37   : > { %v5295_v9 = vpop.f32.mrf.mxu0 }
 0xe41   : > { %v4398_v10 = vpop.f32.mrf.mxu0 }
 0xe42   : > { %v1747_v18 = vsel %vm548_vm2, %v4398_v10, -inf }
 0xe43   : > { %v1726_v13 = vpop.f32.mrf.mxu0 }
 0xe44   : > { %v1741_v14 = vsel %vm548_vm2, %v1726_v13, -inf }
 0xe45   : > { %1742 = vmax.xlane.f32.xlu0 %v1741_v14  ;;  %v4399_v16 = vpop.f32.mrf.mxu0 }
 0xe46   : > { %v1750_v20 = vsel %vm558_vm3, %v4399_v16, -inf }
 0xe47   : > { %v1729_v17 = vpop.f32.mrf.mxu0 }
 0xe48   : > { %v1744_v19 = vsel %vm548_vm2, %v1729_v17, -inf }
 0xe49   : > { %1748 = vmax.xlane.f32.xlu0 %v1747_v18  ;;  %1745 = vmax.xlane.f32.xlu1 %v1744_v19 }
 0xe4d   : > { %1751 = vmax.xlane.f32.xlu0 %v1750_v20 }
 0xe5a   : > { %1787 = vrot.lane.b32.xlu1 %v5059_v24, %s5925_s13 }
 0xece   : > { %v1743_v22 = vpop.xlane.xlu0 %1742 }
 0xecf   : > { %v1753_v23 = vsub.f32 %v1726_v13, %v1743_v22 }
 0xed1   : > { %v1757_v38 = vmul.f32 1.442695, %v1753_v23 }
 0xed2   : > { %v1749_v25 = vpop.xlane.xlu0 %1748  ;;  %v1746_v36 = vpop.xlane.xlu1 %1745 }
 0xed3   : > { %v1755_v37 = vsub.f32 %v4398_v10, %v1749_v25  ;;  %v1754_v44 = vsub.f32 %v1729_v17, %v1746_v36 }
 0xed5   : > { %v1761_v39 = vmul.f32 1.442695, %v1755_v37  ;;  %v1759_v47 = vmul.f32 1.442695, %v1754_v44 }
 0xed6   : > { %v1752_v45 = vpop.xlane.xlu0 %1751  ;;  %v1788_v61 = vpop.permute.xlu1 %1787 }
 0xed7   : > { %4755 = vpow2.f32 %v1761_v39  ;;  %v1756_v46 = vsub.f32 %v4399_v16, %v1752_v45 }
 0xed8   : > { %4757 = vpow2.f32 %v1757_v38 }
 0xed9   : > { %v1763_v48 = vmul.f32 1.442695, %v1756_v46 }
 0xedb   : > { %4759 = vpow2.f32 %v1763_v48 }
 0xedc   : > { %4761 = vpow2.f32 %v1759_v47 }
 0xee4   : > { %v4756_v49 = vpop.eup %4755 }
 0xee5   : > { %v1771_v50 = vsel %vm548_vm2, %v4756_v49, 0.0  ;;  %v4758_v51 = vpop.eup %4757 }
 0xee6   : > { %1772 = vadd.xlane.f32.xlu0 %v1771_v50  ;;  %v1765_v57 = vsel %vm548_vm2, %v4758_v51, 0.0 }
 0xee8   : > { %v4760_v56 = vpop.eup %4759 }
 0xee9   : > { %v1774_v58 = vsel %vm558_vm3, %v4760_v56, 0.0  ;;  %v4762_v59 = vpop.eup %4761 }
 0xeea   : > { %1766 = vadd.xlane.f32.xlu0 %v1765_v57  ;;  %1775 = vadd.xlane.f32.xlu1 %v1774_v58  ;;  %v1768_v60 = vsel %vm548_vm2, %v4762_v59, 0.0 }
 0xeee   : > { %1769 = vadd.xlane.f32.xlu1 %v1768_v60 }
 0xeff   : > { %1878 = vrot.lane.b32.xlu1 %v5057_v21, %s5923_s14 }
 0xf00   : > { %1789 = vrot.lane.b32.xlu0 %v5057_v21, %s5925_s13 }
 0xf03   : > { %1876 = vrot.lane.b32.xlu1 %v5059_v24, %s5923_s14 }
 0xf04   : > { %1872 = vrot.lane.b32.xlu0 %v5067_v27, %s5923_s14 }
 0xf07   : > { %1874 = vrot.lane.b32.xlu1 %v5073_v29, %s5923_s14  ;;  %s4953_s14 = smov 28  }
 0xf6f   : > { %v1773_v62 = vpop.xlane.xlu0 %1772 }
 0xf73   : > { %v1767_v63 = vpop.xlane.xlu0 %1766  ;;  %v1776_v1 = vpop.xlane.xlu1 %1775 }
 0xf74   : > { %4763 = vrcp.f32 %v1776_v1 }
 0xf75   : > { %4765 = vrcp.f32 %v1767_v63 }
 0xf76   : > { %4767 = vrcp.f32 %v1773_v62 }
 0xf77   : > { %v1790_v2 = vpop.permute.xlu0 %1789  ;;  %v1770_v3 = vpop.xlane.xlu1 %1769 }
 0xf78   : > { %v1799_v4 = vand.u32 %v1790_v2, %v5097_v0  ;;  %4769 = vrcp.f32 %v1770_v3 }
 0xf7a   : > { %4400 = vmatprep.subr.bf16.mxu1 %v1799_v4 }
 0xf7b   : > { %4401 = vmatpush3.bf16.msra.mxu1 %v1799_v4  ;;  %v1879_v10 = vpop.permute.xlu1 %1878  ;;  %v1873_v23 = vpop.permute.xlu0 %1872 }
 0xf7c   : > { %4402 = vmatprep.subr.bf16.mxu1 %v1788_v61  ;;  %v1890_v25 = vsel %vm486_vm1, %v1879_v10, 0 }
 0xf7f   : > { %4403 = vmatpush3.bf16.msra.mxu1 %v1788_v61  ;;  %v1877_v36 = vpop.permute.xlu1 %1876 }
 0xf80   : > { %4598 = vmatprep.subr.msk.bf16.mxu1 %vm486_vm1, %v1879_v10  ;;  %v1887_v37 = vsel %vm486_vm1, %v1877_v36, 0 }
 0xf81   : > { %v4764_v27 = vpop.eup %4763 }
 0xf82   : > { %v4766_v29 = vpop.eup %4765  ;;  %v1784_v16 = vmul.f32 %v4764_v27, %v4760_v56 }
 0xf83   : > { %v4768_v13 = vpop.eup %4767  ;;  %v1781_v17 = vmul.f32 %v4766_v29, %v4758_v51  ;;  %v1875_v38 = vpop.permute.xlu1 %1874 }
 0xf84   : > { %v1783_v19 = vmul.f32 %v4768_v13, %v4756_v49 }
 0xf85   : > { %v4770_v14 = vpop.eup %4769 }
 0xf86   : > { %v1782_v18 = vmul.f32 %v4770_v14, %v4762_v59  ;;  %v1786_v22 = vpack.c.bf16 %v1784_v16, %v1783_v19 }
 0xf88   : > { %v1785_v20 = vpack.c.bf16 %v1782_v18, %v1781_v17 }
 0xf8a   : > { %4404 = vmatprep.mubr.msk.bf16.mxu1 %vm548_vm2, %v1785_v20 }
 0xf8b   : > { %4405 = vmatmul.mubr.msk.bf16.vlgmr.msra.gmra.mxu1 %vm548_vm2, %v1786_v22 }
 0xf8c   : > { %4409 = vmatpush3.bf16.xpose.msra.mxu1 %v1890_v25  ;;  %4412 = vmatprep.mubr.msk.bf16.mxu1 %vm486_vm1, %v1873_v23 }
 0xf8d   : > { %4599 = vmatprep.subr.msk.bf16.mxu1 %vm486_vm1, %v1877_v36 }
 0xf94   : > { %4411 = vmatpush3.bf16.xpose.msra.mxu1 %v1887_v37 }
 0xf9b   : > { %4413 = vmatmul.mubr.msk.bf16.vlgmr.msra.gmra.mxu1 %vm486_vm1, %v1875_v38 }
 0xf9c   : > { %4436 = vmatprep.mubr.msk.bf16.mxu1 %vm355_vm0, %v5036_v7 }
0x104b   : > { %v5328_v39 = vpop.f32.mrf.mxu1 }
0x104d   : > { %v5330_v44 = vpop.f32.mrf.mxu1 }
0x104f   : > { %v5332_v45 = vpop.f32.mrf.mxu1 }
0x1051   : > { %v5334_v46 = vpop.f32.mrf.mxu1 }
0x105b   : > { %v4414_v47 = vpop.f32.mrf.mxu1 }
0x105c   : > { %v1947_v56 = vsel %vm548_vm2, %v4414_v47, -inf }
0x105d   : > { %v1926_v48 = vpop.f32.mrf.mxu1 }
0x105e   : > { %v1941_v49 = vsel %vm548_vm2, %v1926_v48, -inf }
0x105f   : > { %1942 = vmax.xlane.f32.xlu0 %v1941_v49  ;;  %v4415_v50 = vpop.f32.mrf.mxu1 }
0x1060   : > { %v1950_v7 = vsel %vm558_vm3, %v4415_v50, -inf }
0x1061   : > { %v1929_v51 = vpop.f32.mrf.mxu1 }
0x1062   : > { %v1944_v57 = vsel %vm548_vm2, %v1929_v51, -inf }
0x1063   : > { %1948 = vmax.xlane.f32.xlu0 %v1947_v56  ;;  %1945 = vmax.xlane.f32.xlu1 %v1944_v57 }
0x1067   : > { %1951 = vmax.xlane.f32.xlu0 %v1950_v7 }
0x10e8   : > { %v1943_v58 = vpop.xlane.xlu0 %1942 }
0x10e9   : > { %v1953_v59 = vsub.f32 %v1926_v48, %v1943_v58 }
0x10eb   : > { %v1957_v63 = vmul.f32 1.442695, %v1953_v59  ;;  %v4651_v59 = vld [vmem:[%s5905_s6 + $0x8] sm:$0xff]  }
0x10ec   : > { %v1949_v60 = vpop.xlane.xlu0 %1948  ;;  %v1946_v61 = vpop.xlane.xlu1 %1945 }
0x10ed   : > { %v1955_v62 = vsub.f32 %v4414_v47, %v1949_v60  ;;  %v1954_v2 = vsub.f32 %v1929_v51, %v1946_v61  ;;  %v4652_v60 = vld [vmem:[%s5905_s6] sm:$0xff]  }
0x10ef   : > { %v1961_v1 = vmul.f32 1.442695, %v1955_v62  ;;  %v1959_v10 = vmul.f32 1.442695, %v1954_v2 }
0x10f0   : > { %v1952_v3 = vpop.xlane.xlu0 %1951 }
0x10f1   : > { %4771 = vpow2.f32 %v1961_v1  ;;  %v1956_v4 = vsub.f32 %v4415_v50, %v1952_v3  ;;  %v4653_v1 = vld [vmem:[%s5904_s5 + $0x8] sm:$0xff]  }
0x10f2   : > { %4773 = vpow2.f32 %v1957_v63  ;;  %v4655_v3 = vld [vmem:[%s5901_s2 + $0x8] sm:$0xff]  }
0x10f3   : > { %v1963_v27 = vmul.f32 1.442695, %v1956_v4  ;;  %4432 = vmatprep.subr.bf16.mxu1 %v4655_v3  ;;  %v4656_v4 = vld [vmem:[%s5901_s2] sm:$0xff]  }
0x10f4   : > { %4433 = vmatpush3.bf16.msra.mxu1 %v4655_v3 }
0x10f5   : > { %4775 = vpow2.f32 %v1963_v27  ;;  %4434 = vmatprep.subr.bf16.mxu1 %v4656_v4 }
0x10f6   : > { %4777 = vpow2.f32 %v1959_v10 }
0x10f8   : > { %4435 = vmatpush3.bf16.msra.mxu1 %v4656_v4 }
0x10fb   : > { %4437 = vmatmul.mubr.msk.bf16.vlgmr.msra.gmra.mxu1 %vm355_vm0, %v5041_v11 }
0x10fe   : > { %v5340_v29 = vpop.eup %4771 }
0x10ff   : > { %v1971_v13 = vsel %vm548_vm2, %v5340_v29, 0.0  ;;  %v5344_v14 = vpop.eup %4773 }
0x1100   : > { %1972 = vadd.xlane.f32.xlu0 %v1971_v13  ;;  %v1965_v17 = vsel %vm548_vm2, %v5344_v14, 0.0 }
0x1102   : > { %v5346_v16 = vpop.eup %4775 }
0x1103   : > { %v1974_v18 = vsel %vm558_vm3, %v5346_v16, 0.0  ;;  %v5352_v19 = vpop.eup %4777 }
0x1104   : > { %1966 = vadd.xlane.f32.xlu0 %v1965_v17  ;;  %1975 = vadd.xlane.f32.xlu1 %v1974_v18  ;;  %v1968_v20 = vsel %vm548_vm2, %v5352_v19, 0.0 }
0x1108   : > { %1969 = vadd.xlane.f32.xlu1 %v1968_v20  ;;  %v4654_v20 = vld [vmem:[%s5904_s5] sm:$0xff]  }
0x1119   : > { %1987 = vrot.lane.b32.xlu1 %v5059_v24, %s5921_s16 }
0x111a   : > { %1989 = vrot.lane.b32.xlu0 %v5057_v21, %s5921_s16 }
0x111d   : > { %854 = vrot.lane.b32.xlu1 %v5143_v28, %s5908_s17 }
0x111e   : > { %858 = vrot.lane.b32.xlu0 %v5141_v26, %s5908_s17 }
0x1121   : > { %856 = vrot.lane.b32.xlu1 %v5147_v31, %s5908_s17 }
0x1122   : > { %1054 = vrot.lane.b32.xlu0 %v5180_v33, %s5910_s19 }
0x1125   : > { %860 = vrot.lane.b32.xlu1 %v5145_v30, %s5908_s17  ;;  %s5919_s17 = smov 16  }
0x1126   : > { %1058 = vrot.lane.b32.xlu0 %v5178_v32, %s5910_s19 }
0x1129   : > { %1056 = vrot.lane.b32.xlu1 %v5184_v35, %s5910_s19 }
0x112a   : > { %1254 = vrot.lane.b32.xlu0 %v5217_v41, %s5912_s20 }
0x112d   : > { %1060 = vrot.lane.b32.xlu1 %v5182_v34, %s5910_s19  ;;  %s5917_s19 = smov 20  }
0x112e   : > { %1258 = vrot.lane.b32.xlu0 %v5215_v40, %s5912_s20 }
0x1131   : > { %1256 = vrot.lane.b32.xlu1 %v5221_v43, %s5912_s20 }
0x1132   : > { %1454 = vrot.lane.b32.xlu0 %v5254_v53, %s5919_s17 }
0x1135   : > { %1260 = vrot.lane.b32.xlu1 %v5219_v42, %s5912_s20  ;;  %s5915_s20 = smov 24  }
0x1136   : > { %1458 = vrot.lane.b32.xlu0 %v5252_v52, %s5919_s17 }
0x1139   : > { %1456 = vrot.lane.b32.xlu1 %v5258_v55, %s5919_s17 }
0x113a   : > { %1654 = vrot.lane.b32.xlu0 %v5291_v6, %s5917_s19 }
0x113d   : > { %1460 = vrot.lane.b32.xlu1 %v5256_v54, %s5919_s17 }
0x113e   : > { %1658 = vrot.lane.b32.xlu0 %v5289_v5, %s5917_s19 }
0x1141   : > { %1656 = vrot.lane.b32.xlu1 %v5295_v9, %s5917_s19 }
0x1142   : > { %1854 = vrot.lane.b32.xlu0 %v5330_v44, %s5915_s20 }
0x1145   : > { %1660 = vrot.lane.b32.xlu1 %v5293_v8, %s5917_s19 }
0x1146   : > { %1858 = vrot.lane.b32.xlu0 %v5328_v39, %s5915_s20 }
0x1149   : > { %1856 = vrot.lane.b32.xlu1 %v5334_v46, %s5915_s20 }
0x114d   : > { %1860 = vrot.lane.b32.xlu1 %v5332_v45, %s5915_s20 }
0x1189   : > { %v1973_v21 = vpop.xlane.xlu0 %1972 }
0x118d   : > { %v1967_v24 = vpop.xlane.xlu0 %1966  ;;  %v1976_v26 = vpop.xlane.xlu1 %1975 }
0x118e   : > { %4779 = vrcp.f32 %v1976_v26 }
0x118f   : > { %4781 = vrcp.f32 %v1967_v24 }
0x1190   : > { %4783 = vrcp.f32 %v1973_v21 }
0x1191   : > { %v1990_v28 = vpop.permute.xlu0 %1989  ;;  %v1970_v30 = vpop.xlane.xlu1 %1969 }
0x1192   : > { %v1999_v31 = vand.u32 %v1990_v28, %v5097_v0  ;;  %4785 = vrcp.f32 %v1970_v30 }
0x1194   : > { %4416 = vmatprep.subr.bf16.mxu0 %v1999_v31 }
0x1195   : > { %4417 = vmatpush3.bf16.msra.mxu0 %v1999_v31  ;;  %v859_v32 = vpop.permute.xlu0 %858  ;;  %v1988_v33 = vpop.permute.xlu1 %1987 }
0x1196   : > { %869 = vst.msk [vmem:[#allocation2 + $0x10] sm:$0xff] %vm866_vm7, %v859_v32  ;;  %4418 = vmatprep.subr.bf16.mxu0 %v1988_v33 }
0x1199   : > { %v1055_v34 = vpop.permute.xlu0 %1054  ;;  %4419 = vmatpush3.bf16.msra.mxu0 %v1988_v33  ;;  %v855_v35 = vpop.permute.xlu1 %854 }
0x119a   : > { %867 = vst.msk [vmem:[#allocation2] sm:$0xff] %vm866_vm7, %v855_v35  ;;  %4424 = vmatprep.subr.bf16.mxu0 %v4651_v59 }
0x119b   : > { %1067 = vst.msk [vmem:[#allocation2] sm:$0xff] %vm1066_vm8, %v1055_v34  ;;  %v4780_v40 = vpop.eup %4779 }
0x119c   : > { %v4782_v41 = vpop.eup %4781  ;;  %v1984_v54 = vmul.f32 %v4780_v40, %v5346_v16 }
0x119d   : > { %v1059_v42 = vpop.permute.xlu0 %1058  ;;  %v857_v43 = vpop.permute.xlu1 %856  ;;  %v1981_v55 = vmul.f32 %v4782_v41, %v5344_v14 }
0x119e   : > { %v4784_v52 = vpop.eup %4783  ;;  %1069 = vst.msk [vmem:[#allocation2 + $0x10] sm:$0xff] %vm1066_vm8, %v1059_v42 }
0x119f   : > { %868 = vst.msk [vmem:[#allocation2 + $0x8] sm:$0xff] %vm866_vm7, %v857_v43  ;;  %v4786_v53 = vpop.eup %4785  ;;  %v1983_v9 = vmul.f32 %v4784_v52, %v5340_v29 }
0x11a0   : > { %v1982_v5 = vmul.f32 %v4786_v53, %v5352_v19 }
0x11a1   : > { %v1255_v6 = vpop.permute.xlu0 %1254  ;;  %v861_v8 = vpop.permute.xlu1 %860  ;;  %v1986_v23 = vpack.c.bf16 %v1984_v54, %v1983_v9 }
0x11a2   : > { %1267 = vst.msk [vmem:[#allocation2] sm:$0xff] %vm1266_vm9, %v1255_v6  ;;  %v1985_v22 = vpack.c.bf16 %v1982_v5, %v1981_v55 }
0x11a3   : > { %871 = vst.msk [vmem:[#allocation2 + $0x18] sm:$0x1] %vm870_vm10, %v861_v8 }
0x11a4   : > { %4420 = vmatprep.mubr.msk.bf16.mxu0 %vm548_vm2, %v1985_v22 }
0x11a5   : > { %v1259_v25 = vpop.permute.xlu0 %1258  ;;  %4421 = vmatmul.mubr.msk.bf16.vlgmr.msra.gmra.mxu0 %vm548_vm2, %v1986_v23  ;;  %v1057_v36 = vpop.permute.xlu1 %1056 }
0x11a6   : > { %1269 = vst.msk [vmem:[#allocation2 + $0x10] sm:$0xff] %vm1266_vm9, %v1259_v25  ;;  %4425 = vmatpush3.bf16.msra.mxu0 %v4651_v59 }
0x11a7   : > { %1068 = vst.msk [vmem:[#allocation2 + $0x8] sm:$0xff] %vm1066_vm8, %v1057_v36  ;;  %4426 = vmatprep.subr.bf16.mxu0 %v4652_v60 }
0x11a9   : > { %v1455_v37 = vpop.permute.xlu0 %1454  ;;  %v1061_v38 = vpop.permute.xlu1 %1060 }
0x11aa   : > { %1467 = vst.msk [vmem:[#allocation2] sm:$0xff] %vm1466_vm11, %v1455_v37  ;;  %4427 = vmatpush3.bf16.msra.mxu0 %v4652_v60 }
0x11ab   : > { %1071 = vst.msk [vmem:[#allocation2 + $0x18] sm:$0x1] %vm1070_vm12, %v1061_v38  ;;  %4440 = vmatprep.subr.bf16.mxu0 %v4653_v1 }
0x11ad   : > { %v1459_v39 = vpop.permute.xlu0 %1458  ;;  %v1257_v44 = vpop.permute.xlu1 %1256 }
0x11ae   : > { %1469 = vst.msk [vmem:[#allocation2 + $0x10] sm:$0xff] %vm1466_vm11, %v1459_v39 }
0x11af   : > { %1268 = vst.msk [vmem:[#allocation2 + $0x8] sm:$0xff] %vm1266_vm9, %v1257_v44 }
0x11b1   : > { %v1655_v45 = vpop.permute.xlu0 %1654  ;;  %v1261_v46 = vpop.permute.xlu1 %1260 }
0x11b2   : > { %1667 = vst.msk [vmem:[#allocation2] sm:$0xff] %vm1666_vm13, %v1655_v45 }
0x11b3   : > { %1271 = vst.msk [vmem:[#allocation2 + $0x18] sm:$0x1] %vm5914_vm14, %v1261_v46  ;;  %vm5929_vm14 = vcmask 221376  }
0x11b5   : > { %v1659_v47 = vpop.permute.xlu0 %1658  ;;  %v1457_v48 = vpop.permute.xlu1 %1456 }
0x11b6   : > { %1669 = vst.msk [vmem:[#allocation2 + $0x10] sm:$0xff] %vm1666_vm13, %v1659_v47 }
0x11b7   : > { %1468 = vst.msk [vmem:[#allocation2 + $0x8] sm:$0xff] %vm1466_vm11, %v1457_v48 }
0x11b9   : > { %v1855_v49 = vpop.permute.xlu0 %1854  ;;  %v1461_v50 = vpop.permute.xlu1 %1460 }
0x11ba   : > { %1867 = vst.msk [vmem:[#allocation2] sm:$0xff] %vm1866_vm15, %v1855_v49 }
0x11bb   : > { %1471 = vst.msk [vmem:[#allocation2 + $0x18] sm:$0x1] %vm1470_vm4, %v1461_v50  ;;  %v4438_v21 = vpop.f32.mrf.mxu1 }
0x11bd   : > { %v1859_v51 = vpop.permute.xlu0 %1858  ;;  %v1657_v56 = vpop.permute.xlu1 %1656 }
0x11be   : > { %1869 = vst.msk [vmem:[#allocation2 + $0x10] sm:$0xff] %vm1866_vm15, %v1859_v51  ;;  %v2210_v24 = vpop.f32.mrf.mxu1 }
0x11bf   : > { %1668 = vst.msk [vmem:[#allocation2 + $0x8] sm:$0xff] %vm1666_vm13, %v1657_v56 }
0x11c0   : > { %v4439_v26 = vpop.f32.mrf.mxu1 }
0x11c1   : > { %v1661_v57 = vpop.permute.xlu1 %1660  ;;  %v5473_v28 = vpack.c.bf16 %v4439_v26, %v4438_v21 }
0x11c2   : > { %1671 = vst.msk [vmem:[#allocation2 + $0x18] sm:$0x1] %vm5930_vm5, %v1661_v57  ;;  %vm2070_vm5 = vcmask 254176   ;;  %v2213_v30 = vpop.f32.mrf.mxu1 }
0x11c3   : > { %v5475_v31 = vpack.c.bf16 %v2213_v30, %v2210_v24 }
0x11c5   : > { %v1857_v7 = vpop.permute.xlu1 %1856  ;;  %4452 = vmatprep.mubr.msk.bf16.mxu1 %vm486_vm1, %v5475_v31 }
0x11c6   : > { %1868 = vst.msk [vmem:[#allocation2 + $0x8] sm:$0xff] %vm1866_vm15, %v1857_v7 }
0x11c9   : > { %v1861_v58 = vpop.permute.xlu1 %1860 }
0x11ca   : > { %1871 = vst.msk [vmem:[#allocation2 + $0x18] sm:$0x1] %vm5929_vm14, %v1861_v58  ;;  %vm2066_vm14 = vcmask 261344  }
0x1265   : > { %v4422_v61 = vpop.f32.mrf.mxu0 }
0x1267   : > { %v2035_v62 = vpop.f32.mrf.mxu0 }
0x1268   : > { %2054 = vrot.lane.b32.xlu0 %v2035_v62, %s4953_s14 }
0x1269   : > { %v4423_v63 = vpop.f32.mrf.mxu0 }
0x126b   : > { %v2038_v2 = vpop.f32.mrf.mxu0 }
0x126c   : > { %2058 = vrot.lane.b32.xlu0 %v4422_v61, %s4953_s14  ;;  %2056 = vrot.lane.b32.xlu1 %v2038_v2, %s4953_s14 }
0x1270   : > { %2060 = vrot.lane.b32.xlu1 %v4423_v63, %s4953_s14 }
0x12da   : > { %v2055_v10 = vpop.permute.xlu0 %2054 }
0x12db   : > { %2067 = vst.msk [vmem:[#allocation2] sm:$0xff] %vm2066_vm14, %v2055_v10 }
0x12de   : > { %v2059_v27 = vpop.permute.xlu0 %2058  ;;  %v2057_v29 = vpop.permute.xlu1 %2056 }
0x12df   : > { %2069 = vst.msk [vmem:[#allocation2 + $0x10] sm:$0xff] %vm2066_vm14, %v2059_v27  ;;  %2068 = vst.msk [vmem:[#allocation2 + $0x8] sm:$0xff] %vm2066_vm14, %v2057_v29 }
0x12e2   : > { %v2061_v13 = vpop.permute.xlu1 %2060  ;;  %v2072_v14 = vld [vmem:[#allocation2] sm:$0xff] }
0x12e3   : > { %2071 = vst.msk [vmem:[#allocation2 + $0x18] sm:$0x1] %vm2070_vm5, %v2061_v13 }
0x12e6   : > { %v2073_v16 = vld [vmem:[#allocation2 + $0x8] sm:$0xff]  ;;  %v2074_v11 = vld [vmem:[#allocation2 + $0x10] sm:$0xff] }
0x12e7   : > { %v2076_v17 = vpack.c.bf16 %v2073_v16, %v2072_v14 }
0x12e9   : > { %4428 = vmatprep.mubr.msk.bf16.mxu0 %vm355_vm0, %v2076_v17 }
0x12ea   : > { %v2075_v18 = vld [vmem:[#allocation2 + $0x18] sm:$0x1] }
0x12eb   : > { %v2077_v19 = vpack.c.bf16 %v2075_v18, %v2074_v11 }
0x12ed   : > { %4429 = vmatmul.mubr.msk.bf16.vlgmr.msra.gmra.mxu0 %vm355_vm0, %v2077_v19 }
0x12ee   : > { %4441 = vmatpush3.bf16.msra.mxu0 %v4653_v1  ;;  %4444 = vmatprep.mubr.msk.bf16.mxu0 %vm355_vm0, %v5043_v12 }
0x12ef   : > { %4442 = vmatprep.subr.bf16.mxu0 %v4654_v20 }
0x12f2   : > { %4443 = vmatpush3.bf16.msra.mxu0 %v4654_v20 }
0x12f5   : > { %4445 = vmatmul.mubr.msk.bf16.vlgmr.msra.gmra.mxu0 %vm355_vm0, %v5049_v15 }
0x13ad   : > { %v5479_v32 = vpop.f32.mrf.mxu0 }
0x13af   : > { %v5481_v33 = vpop.f32.mrf.mxu0 }
0x13b1   : > { %v5483_v12 = vpop.f32.mrf.mxu0 }
0x13b3   : > { %v5485_v34 = vpop.f32.mrf.mxu0 }
0x13b5   : > { %v4446_v15 = vpop.f32.mrf.mxu0 }
0x13b7   : > { %v2277_v35 = vpop.f32.mrf.mxu0 }
0x13b9   : > { %v4447_v40 = vpop.f32.mrf.mxu0 }
0x13ba   : > { %v5487_v41 = vpack.c.bf16 %v4447_v40, %v4446_v15 }
0x13bb   : > { %v2280_v42 = vpop.f32.mrf.mxu0 }
0x13bc   : > { %v5489_v43 = vpack.c.bf16 %v2280_v42, %v2277_v35  ;;  %4600 = vmatprep.subr.msk.bf16.mxu1 %vm486_vm1, %v5487_v41  ;;  %v2304_v52 = vsel %vm486_vm1, %v5487_v41, 0 }
0x13bd   : > { %4449 = vmatpush3.bf16.xpose.msra.mxu1 %v2304_v52 }
0x13be   : > { %4601 = vmatprep.subr.msk.bf16.mxu1 %vm486_vm1, %v5489_v43  ;;  %v2301_v53 = vsel %vm486_vm1, %v5489_v43, 0 }
0x13c5   : > { %4451 = vmatpush3.bf16.xpose.msra.mxu1 %v2301_v53 }
0x13cc   : > { %4453 = vmatmul.mubr.msk.bf16.vlgmr.msra.gmra.mxu1 %vm486_vm1, %v5473_v28 }
0x148c   : > { %v4454_v54 = vpop.f32.mrf.mxu1 }
0x148d   : > { %v2361_v9 = vsel %vm548_vm2, %v4454_v54, -inf }
0x148e   : > { %v2340_v55 = vpop.f32.mrf.mxu1 }
0x148f   : > { %v2355_v5 = vsel %vm548_vm2, %v2340_v55, -inf }
0x1490   : > { %2356 = vmax.xlane.f32.xlu0 %v2355_v5  ;;  %v4455_v6 = vpop.f32.mrf.mxu1 }
0x1491   : > { %v2364_v23 = vsel %vm558_vm3, %v4455_v6, -inf }
0x1492   : > { %v2343_v8 = vpop.f32.mrf.mxu1 }
0x1493   : > { %v2358_v22 = vsel %vm548_vm2, %v2343_v8, -inf }
0x1494   : > { %2362 = vmax.xlane.f32.xlu0 %v2361_v9  ;;  %2359 = vmax.xlane.f32.xlu1 %v2358_v22 }
0x1498   : > { %2365 = vmax.xlane.f32.xlu0 %v2364_v23 }
0x14a5   : > { %2403 = vrot.lane.b32.xlu1 %v5489_v43, %s4931_s22 }
0x1519   : > { %v2357_v25 = vpop.xlane.xlu0 %2356 }
0x151a   : > { %v2367_v36 = vsub.f32 %v2340_v55, %v2357_v25 }
0x151c   : > { %v2371_v44 = vmul.f32 1.442695, %v2367_v36 }
0x151d   : > { %v2363_v37 = vpop.xlane.xlu0 %2362  ;;  %v2360_v38 = vpop.xlane.xlu1 %2359 }
0x151e   : > { %v2369_v39 = vsub.f32 %v4454_v54, %v2363_v37  ;;  %v2368_v46 = vsub.f32 %v2343_v8, %v2360_v38 }
0x1520   : > { %v2375_v45 = vmul.f32 1.442695, %v2369_v39  ;;  %v2373_v49 = vmul.f32 1.442695, %v2368_v46 }
0x1521   : > { %v2366_v47 = vpop.xlane.xlu0 %2365  ;;  %v2404_v62 = vpop.permute.xlu1 %2403 }
0x1522   : > { %4787 = vpow2.f32 %v2375_v45  ;;  %v2370_v48 = vsub.f32 %v4455_v6, %v2366_v47 }
0x1523   : > { %4789 = vpow2.f32 %v2371_v44 }
0x1524   : > { %v2377_v50 = vmul.f32 1.442695, %v2370_v48 }
0x1526   : > { %4791 = vpow2.f32 %v2377_v50 }
0x1527   : > { %4793 = vpow2.f32 %v2373_v49 }
0x152f   : > { %v4788_v51 = vpop.eup %4787 }
0x1530   : > { %v2385_v56 = vsel %vm548_vm2, %v4788_v51, 0.0  ;;  %v4790_v57 = vpop.eup %4789 }
0x1531   : > { %2386 = vadd.xlane.f32.xlu0 %v2385_v56  ;;  %v2379_v58 = vsel %vm548_vm2, %v4790_v57, 0.0 }
0x1533   : > { %v4792_v7 = vpop.eup %4791 }
0x1534   : > { %v2388_v59 = vsel %vm558_vm3, %v4792_v7, 0.0  ;;  %v4794_v60 = vpop.eup %4793 }
0x1535   : > { %2380 = vadd.xlane.f32.xlu0 %v2379_v58  ;;  %2389 = vadd.xlane.f32.xlu1 %v2388_v59  ;;  %v2382_v61 = vsel %vm548_vm2, %v4794_v60, 0.0 }
0x1539   : > { %2383 = vadd.xlane.f32.xlu1 %v2382_v61 }
0x154a   : > { %2478 = vrot.lane.b32.xlu1 %v5487_v41, %s4932_s23 }
0x154b   : > { %2405 = vrot.lane.b32.xlu0 %v5487_v41, %s4931_s22  ;;  %s5931_s22 = smov 104  }
0x154e   : > { %2476 = vrot.lane.b32.xlu1 %v5489_v43, %s4932_s23 }
0x154f   : > { %2472 = vrot.lane.b32.xlu0 %v5475_v31, %s4932_s23 }
0x1552   : > { %2474 = vrot.lane.b32.xlu1 %v5473_v28, %s4932_s23  ;;  %s5932_s23 = smov 72  }
0x15ba   : > { %v2387_v63 = vpop.xlane.xlu0 %2386 }
0x15be   : > { %v2381_v1 = vpop.xlane.xlu0 %2380  ;;  %v2390_v2 = vpop.xlane.xlu1 %2389 }
0x15bf   : > { %4795 = vrcp.f32 %v2390_v2 }
0x15c0   : > { %4797 = vrcp.f32 %v2381_v1 }
0x15c1   : > { %4799 = vrcp.f32 %v2387_v63 }
0x15c2   : > { %v2406_v3 = vpop.permute.xlu0 %2405  ;;  %v2384_v4 = vpop.xlane.xlu1 %2383 }
0x15c3   : > { %v2415_v10 = vand.u32 %v2406_v3, %v5097_v0  ;;  %4801 = vrcp.f32 %v2384_v4 }
0x15c5   : > { %4456 = vmatprep.subr.bf16.mxu0 %v2415_v10 }
0x15c6   : > { %4457 = vmatpush3.bf16.msra.mxu0 %v2415_v10  ;;  %v2479_v27 = vpop.permute.xlu1 %2478  ;;  %v2473_v24 = vpop.permute.xlu0 %2472 }
0x15c7   : > { %4458 = vmatprep.subr.bf16.mxu0 %v2404_v62  ;;  %v2490_v26 = vsel %vm486_vm1, %v2479_v27, 0 }
0x15ca   : > { %4459 = vmatpush3.bf16.msra.mxu0 %v2404_v62  ;;  %v2477_v30 = vpop.permute.xlu1 %2476 }
0x15cb   : > { %4602 = vmatprep.subr.msk.bf16.mxu0 %vm486_vm1, %v2479_v27  ;;  %v2487_v15 = vsel %vm486_vm1, %v2477_v30, 0 }
0x15cc   : > { %v4796_v29 = vpop.eup %4795 }
0x15cd   : > { %v4798_v13 = vpop.eup %4797  ;;  %v2398_v17 = vmul.f32 %v4796_v29, %v4792_v7 }
0x15ce   : > { %v4800_v14 = vpop.eup %4799  ;;  %v2395_v11 = vmul.f32 %v4798_v13, %v4790_v57  ;;  %v2475_v35 = vpop.permute.xlu1 %2474 }
0x15cf   : > { %v2397_v19 = vmul.f32 %v4800_v14, %v4788_v51 }
0x15d0   : > { %v4802_v16 = vpop.eup %4801 }
0x15d1   : > { %v2396_v18 = vmul.f32 %v4802_v16, %v4794_v60  ;;  %v2400_v21 = vpack.c.bf16 %v2398_v17, %v2397_v19 }
0x15d3   : > { %v2399_v20 = vpack.c.bf16 %v2396_v18, %v2395_v11 }
0x15d5   : > { %4460 = vmatprep.mubr.msk.bf16.mxu0 %vm548_vm2, %v2399_v20 }
0x15d6   : > { %4461 = vmatmul.mubr.msk.bf16.vlgmr.msra.gmra.mxu0 %vm548_vm2, %v2400_v21 }
0x15d7   : > { %4465 = vmatpush3.bf16.xpose.msra.mxu0 %v2490_v26  ;;  %4468 = vmatprep.mubr.msk.bf16.mxu0 %vm486_vm1, %v2473_v24 }
0x15d8   : > { %4603 = vmatprep.subr.msk.bf16.mxu0 %vm486_vm1, %v2477_v30 }
0x15df   : > { %4467 = vmatpush3.bf16.xpose.msra.mxu0 %v2487_v15 }
0x15e6   : > { %4469 = vmatmul.mubr.msk.bf16.vlgmr.msra.gmra.mxu0 %vm486_vm1, %v2475_v35 }
0x1696   : > { %v4462_v40 = vpop.f32.mrf.mxu0 }
0x1697   : > { %2468 = vst.msk [vmem:[#allocation2 + $0x10] sm:$0xff] %vm486_vm1, %v4462_v40 }
0x1698   : > { %v2451_v42 = vpop.f32.mrf.mxu0 }
0x1699   : > { %2466 = vst.msk [vmem:[#allocation2] sm:$0xff] %vm486_vm1, %v2451_v42 }
0x169a   : > { %v4463_v52 = vpop.f32.mrf.mxu0 }
0x169b   : > { %2469 = vst.msk [vmem:[#allocation2 + $0x18] sm:$0x1] %vm668_vm6, %v4463_v52  ;;  %vm3953_vm6 = vcmask 253952  }
0x169c   : > { %v2454_v53 = vpop.f32.mrf.mxu0 }
0x169d   : > { %2467 = vst.msk [vmem:[#allocation2 + $0x8] sm:$0xff] %vm486_vm1, %v2454_v53 }
0x16a6   : > { %v4470_v54 = vpop.f32.mrf.mxu0 }
0x16a7   : > { %v2547_v9 = vsel %vm548_vm2, %v4470_v54, -inf }
0x16a8   : > { %v2526_v55 = vpop.f32.mrf.mxu0 }
0x16a9   : > { %v2541_v5 = vsel %vm548_vm2, %v2526_v55, -inf }
0x16aa   : > { %2542 = vmax.xlane.f32.xlu0 %v2541_v5  ;;  %v4471_v6 = vpop.f32.mrf.mxu0 }
0x16ab   : > { %v2550_v23 = vsel %vm558_vm3, %v4471_v6, -inf }
0x16ac   : > { %v2529_v8 = vpop.f32.mrf.mxu0 }
0x16ad   : > { %v2544_v22 = vsel %vm548_vm2, %v2529_v8, -inf }
0x16ae   : > { %2548 = vmax.xlane.f32.xlu0 %v2547_v9  ;;  %2545 = vmax.xlane.f32.xlu1 %v2544_v22 }
0x16b2   : > { %2551 = vmax.xlane.f32.xlu0 %v2550_v23 }
0x16bf   : > { %2587 = vrot.lane.b32.xlu1 %v5489_v43, %s4934_s24 }
0x1733   : > { %v2543_v25 = vpop.xlane.xlu0 %2542 }
0x1734   : > { %v2553_v36 = vsub.f32 %v2526_v55, %v2543_v25 }
0x1736   : > { %v2557_v44 = vmul.f32 1.442695, %v2553_v36 }
0x1737   : > { %v2549_v37 = vpop.xlane.xlu0 %2548  ;;  %v2546_v38 = vpop.xlane.xlu1 %2545 }
0x1738   : > { %v2555_v39 = vsub.f32 %v4470_v54, %v2549_v37  ;;  %v2554_v46 = vsub.f32 %v2529_v8, %v2546_v38 }
0x173a   : > { %v2561_v45 = vmul.f32 1.442695, %v2555_v39  ;;  %v2559_v49 = vmul.f32 1.442695, %v2554_v46 }
0x173b   : > { %v2552_v47 = vpop.xlane.xlu0 %2551  ;;  %v2588_v62 = vpop.permute.xlu1 %2587 }
0x173c   : > { %4803 = vpow2.f32 %v2561_v45  ;;  %v2556_v48 = vsub.f32 %v4471_v6, %v2552_v47 }
0x173d   : > { %4805 = vpow2.f32 %v2557_v44 }
0x173e   : > { %v2563_v50 = vmul.f32 1.442695, %v2556_v48 }
0x1740   : > { %4807 = vpow2.f32 %v2563_v50 }
0x1741   : > { %4809 = vpow2.f32 %v2559_v49 }
0x1749   : > { %v4804_v51 = vpop.eup %4803 }
0x174a   : > { %v2571_v56 = vsel %vm548_vm2, %v4804_v51, 0.0  ;;  %v4806_v57 = vpop.eup %4805 }
0x174b   : > { %2572 = vadd.xlane.f32.xlu0 %v2571_v56  ;;  %v2565_v58 = vsel %vm548_vm2, %v4806_v57, 0.0 }
0x174d   : > { %v4808_v7 = vpop.eup %4807 }
0x174e   : > { %v2574_v59 = vsel %vm558_vm3, %v4808_v7, 0.0  ;;  %v4810_v60 = vpop.eup %4809 }
0x174f   : > { %2566 = vadd.xlane.f32.xlu0 %v2565_v58  ;;  %2575 = vadd.xlane.f32.xlu1 %v2574_v59  ;;  %v2568_v61 = vsel %vm548_vm2, %v4810_v60, 0.0 }
0x1753   : > { %2569 = vadd.xlane.f32.xlu1 %v2568_v61 }
0x1764   : > { %2676 = vrot.lane.b32.xlu1 %v5487_v41, %s4935_s25 }
0x1765   : > { %2589 = vrot.lane.b32.xlu0 %v5487_v41, %s4934_s24  ;;  %s5933_s24 = smov 100  }
0x1768   : > { %2674 = vrot.lane.b32.xlu1 %v5489_v43, %s4935_s25 }
0x1769   : > { %2670 = vrot.lane.b32.xlu0 %v5475_v31, %s4935_s25 }
0x176c   : > { %2672 = vrot.lane.b32.xlu1 %v5473_v28, %s4935_s25  ;;  %s5934_s25 = smov 68  }
0x17d4   : > { %v2573_v63 = vpop.xlane.xlu0 %2572 }
0x17d8   : > { %v2567_v1 = vpop.xlane.xlu0 %2566  ;;  %v2576_v2 = vpop.xlane.xlu1 %2575 }
0x17d9   : > { %4811 = vrcp.f32 %v2576_v2 }
0x17da   : > { %4813 = vrcp.f32 %v2567_v1 }
0x17db   : > { %4815 = vrcp.f32 %v2573_v63 }
0x17dc   : > { %v2590_v3 = vpop.permute.xlu0 %2589  ;;  %v2570_v4 = vpop.xlane.xlu1 %2569 }
0x17dd   : > { %v2599_v10 = vand.u32 %v2590_v3, %v5097_v0  ;;  %4817 = vrcp.f32 %v2570_v4 }
0x17df   : > { %4472 = vmatprep.subr.bf16.mxu1 %v2599_v10 }
0x17e0   : > { %4473 = vmatpush3.bf16.msra.mxu1 %v2599_v10  ;;  %v2677_v27 = vpop.permute.xlu1 %2676  ;;  %v2671_v24 = vpop.permute.xlu0 %2670 }
0x17e1   : > { %4474 = vmatprep.subr.bf16.mxu1 %v2588_v62  ;;  %v2688_v26 = vsel %vm486_vm1, %v2677_v27, 0 }
0x17e4   : > { %4475 = vmatpush3.bf16.msra.mxu1 %v2588_v62  ;;  %v2675_v30 = vpop.permute.xlu1 %2674 }
0x17e5   : > { %4604 = vmatprep.subr.msk.bf16.mxu1 %vm486_vm1, %v2677_v27  ;;  %v2685_v15 = vsel %vm486_vm1, %v2675_v30, 0 }
0x17e6   : > { %v4812_v29 = vpop.eup %4811 }
0x17e7   : > { %v4814_v13 = vpop.eup %4813  ;;  %v2584_v17 = vmul.f32 %v4812_v29, %v4808_v7 }
0x17e8   : > { %v4816_v14 = vpop.eup %4815  ;;  %v2581_v11 = vmul.f32 %v4814_v13, %v4806_v57  ;;  %v2673_v35 = vpop.permute.xlu1 %2672 }
0x17e9   : > { %v2583_v19 = vmul.f32 %v4816_v14, %v4804_v51 }
0x17ea   : > { %v4818_v16 = vpop.eup %4817 }
0x17eb   : > { %v2582_v18 = vmul.f32 %v4818_v16, %v4810_v60  ;;  %v2586_v21 = vpack.c.bf16 %v2584_v17, %v2583_v19 }
0x17ed   : > { %v2585_v20 = vpack.c.bf16 %v2582_v18, %v2581_v11 }
0x17ef   : > { %4476 = vmatprep.mubr.msk.bf16.mxu1 %vm548_vm2, %v2585_v20 }
0x17f0   : > { %4477 = vmatmul.mubr.msk.bf16.vlgmr.msra.gmra.mxu1 %vm548_vm2, %v2586_v21 }
0x17f1   : > { %4481 = vmatpush3.bf16.xpose.msra.mxu1 %v2688_v26  ;;  %4484 = vmatprep.mubr.msk.bf16.mxu1 %vm486_vm1, %v2671_v24 }
0x17f2   : > { %4605 = vmatprep.subr.msk.bf16.mxu1 %vm486_vm1, %v2675_v30 }
0x17f9   : > { %4483 = vmatpush3.bf16.xpose.msra.mxu1 %v2685_v15 }
0x1800   : > { %4485 = vmatmul.mubr.msk.bf16.vlgmr.msra.gmra.mxu1 %vm486_vm1, %v2673_v35 }
0x18b0   : > { %v5563_v40 = vpop.f32.mrf.mxu1 }
0x18b2   : > { %v5565_v42 = vpop.f32.mrf.mxu1 }
0x18b4   : > { %v5567_v52 = vpop.f32.mrf.mxu1 }
0x18b6   : > { %v5569_v53 = vpop.f32.mrf.mxu1 }
0x18c0   : > { %v4486_v54 = vpop.f32.mrf.mxu1 }
0x18c1   : > { %v2745_v9 = vsel %vm548_vm2, %v4486_v54, -inf }
0x18c2   : > { %v2724_v55 = vpop.f32.mrf.mxu1 }
0x18c3   : > { %v2739_v5 = vsel %vm548_vm2, %v2724_v55, -inf }
0x18c4   : > { %2740 = vmax.xlane.f32.xlu0 %v2739_v5  ;;  %v4487_v6 = vpop.f32.mrf.mxu1 }
0x18c5   : > { %v2748_v23 = vsel %vm558_vm3, %v4487_v6, -inf }
0x18c6   : > { %v2727_v8 = vpop.f32.mrf.mxu1 }
0x18c7   : > { %v2742_v22 = vsel %vm548_vm2, %v2727_v8, -inf }
0x18c8   : > { %2746 = vmax.xlane.f32.xlu0 %v2745_v9  ;;  %2743 = vmax.xlane.f32.xlu1 %v2742_v22 }
0x18cc   : > { %2749 = vmax.xlane.f32.xlu0 %v2748_v23 }
0x18d9   : > { %2785 = vrot.lane.b32.xlu1 %v5489_v43, %s4936_s26 }
0x194d   : > { %v2741_v25 = vpop.xlane.xlu0 %2740 }
0x194e   : > { %v2751_v36 = vsub.f32 %v2724_v55, %v2741_v25 }
0x1950   : > { %v2755_v44 = vmul.f32 1.442695, %v2751_v36 }
0x1951   : > { %v2747_v37 = vpop.xlane.xlu0 %2746  ;;  %v2744_v38 = vpop.xlane.xlu1 %2743 }
0x1952   : > { %v2753_v39 = vsub.f32 %v4486_v54, %v2747_v37  ;;  %v2752_v46 = vsub.f32 %v2727_v8, %v2744_v38 }
0x1954   : > { %v2759_v45 = vmul.f32 1.442695, %v2753_v39  ;;  %v2757_v49 = vmul.f32 1.442695, %v2752_v46 }
0x1955   : > { %v2750_v47 = vpop.xlane.xlu0 %2749  ;;  %v2786_v62 = vpop.permute.xlu1 %2785 }
0x1956   : > { %4819 = vpow2.f32 %v2759_v45  ;;  %v2754_v48 = vsub.f32 %v4487_v6, %v2750_v47 }
0x1957   : > { %4821 = vpow2.f32 %v2755_v44 }
0x1958   : > { %v2761_v50 = vmul.f32 1.442695, %v2754_v48 }
0x195a   : > { %4823 = vpow2.f32 %v2761_v50 }
0x195b   : > { %4825 = vpow2.f32 %v2757_v49 }
0x1963   : > { %v4820_v51 = vpop.eup %4819 }
0x1964   : > { %v2769_v56 = vsel %vm548_vm2, %v4820_v51, 0.0  ;;  %v4822_v57 = vpop.eup %4821 }
0x1965   : > { %2770 = vadd.xlane.f32.xlu0 %v2769_v56  ;;  %v2763_v58 = vsel %vm548_vm2, %v4822_v57, 0.0 }
0x1967   : > { %v4824_v7 = vpop.eup %4823 }
0x1968   : > { %v2772_v59 = vsel %vm558_vm3, %v4824_v7, 0.0  ;;  %v4826_v60 = vpop.eup %4825 }
0x1969   : > { %2764 = vadd.xlane.f32.xlu0 %v2763_v58  ;;  %2773 = vadd.xlane.f32.xlu1 %v2772_v59  ;;  %v2766_v61 = vsel %vm548_vm2, %v4826_v60, 0.0 }
0x196d   : > { %2767 = vadd.xlane.f32.xlu1 %v2766_v61 }
0x197e   : > { %2874 = vrot.lane.b32.xlu1 %v5487_v41, %s4937_s28 }
0x197f   : > { %2787 = vrot.lane.b32.xlu0 %v5487_v41, %s4936_s26  ;;  %s5935_s26 = smov 4  }
0x1982   : > { %2872 = vrot.lane.b32.xlu1 %v5489_v43, %s4937_s28 }
0x1983   : > { %2868 = vrot.lane.b32.xlu0 %v5475_v31, %s4937_s28 }
0x1986   : > { %2870 = vrot.lane.b32.xlu1 %v5473_v28, %s4937_s28  ;;  %s5936_s28 = smov 8  }
0x19ee   : > { %v2771_v63 = vpop.xlane.xlu0 %2770 }
0x19f2   : > { %v2765_v1 = vpop.xlane.xlu0 %2764  ;;  %v2774_v2 = vpop.xlane.xlu1 %2773 }
0x19f3   : > { %4827 = vrcp.f32 %v2774_v2 }
0x19f4   : > { %4829 = vrcp.f32 %v2765_v1 }
0x19f5   : > { %4831 = vrcp.f32 %v2771_v63 }
0x19f6   : > { %v2788_v3 = vpop.permute.xlu0 %2787  ;;  %v2768_v4 = vpop.xlane.xlu1 %2767 }
0x19f7   : > { %v2797_v10 = vand.u32 %v2788_v3, %v5097_v0  ;;  %4833 = vrcp.f32 %v2768_v4 }
0x19f9   : > { %4488 = vmatprep.subr.bf16.mxu0 %v2797_v10 }
0x19fa   : > { %4489 = vmatpush3.bf16.msra.mxu0 %v2797_v10  ;;  %v2875_v27 = vpop.permute.xlu1 %2874  ;;  %v2869_v24 = vpop.permute.xlu0 %2868 }
0x19fb   : > { %4490 = vmatprep.subr.bf16.mxu0 %v2786_v62  ;;  %v2886_v26 = vsel %vm486_vm1, %v2875_v27, 0 }
0x19fe   : > { %4491 = vmatpush3.bf16.msra.mxu0 %v2786_v62  ;;  %v2873_v30 = vpop.permute.xlu1 %2872 }
0x19ff   : > { %4606 = vmatprep.subr.msk.bf16.mxu0 %vm486_vm1, %v2875_v27  ;;  %v2883_v15 = vsel %vm486_vm1, %v2873_v30, 0 }
0x1a00   : > { %v4828_v29 = vpop.eup %4827 }
0x1a01   : > { %v4830_v13 = vpop.eup %4829  ;;  %v2782_v17 = vmul.f32 %v4828_v29, %v4824_v7 }
0x1a02   : > { %v4832_v14 = vpop.eup %4831  ;;  %v2779_v11 = vmul.f32 %v4830_v13, %v4822_v57  ;;  %v2871_v35 = vpop.permute.xlu1 %2870 }
0x1a03   : > { %v2781_v19 = vmul.f32 %v4832_v14, %v4820_v51 }
0x1a04   : > { %v4834_v16 = vpop.eup %4833 }
0x1a05   : > { %v2780_v18 = vmul.f32 %v4834_v16, %v4826_v60  ;;  %v2784_v21 = vpack.c.bf16 %v2782_v17, %v2781_v19 }
0x1a07   : > { %v2783_v20 = vpack.c.bf16 %v2780_v18, %v2779_v11 }
0x1a09   : > { %4492 = vmatprep.mubr.msk.bf16.mxu0 %vm548_vm2, %v2783_v20 }
0x1a0a   : > { %4493 = vmatmul.mubr.msk.bf16.vlgmr.msra.gmra.mxu0 %vm548_vm2, %v2784_v21 }
0x1a0b   : > { %4497 = vmatpush3.bf16.xpose.msra.mxu0 %v2886_v26  ;;  %4500 = vmatprep.mubr.msk.bf16.mxu0 %vm486_vm1, %v2869_v24 }
0x1a0c   : > { %4607 = vmatprep.subr.msk.bf16.mxu0 %vm486_vm1, %v2873_v30 }
0x1a13   : > { %4499 = vmatpush3.bf16.xpose.msra.mxu0 %v2883_v15 }
0x1a1a   : > { %4501 = vmatmul.mubr.msk.bf16.vlgmr.msra.gmra.mxu0 %vm486_vm1, %v2871_v35 }
0x1aca   : > { %v5600_v54 = vpop.f32.mrf.mxu0 }
0x1acc   : > { %v5602_v55 = vpop.f32.mrf.mxu0 }
0x1ace   : > { %v5604_v5 = vpop.f32.mrf.mxu0 }
0x1ad0   : > { %v5606_v6 = vpop.f32.mrf.mxu0 }
0x1ada   : > { %v4502_v8 = vpop.f32.mrf.mxu0 }
0x1adb   : > { %v2943_v36 = vsel %vm548_vm2, %v4502_v8, -inf }
0x1adc   : > { %v2922_v9 = vpop.f32.mrf.mxu0 }
0x1add   : > { %v2937_v22 = vsel %vm548_vm2, %v2922_v9, -inf }
0x1ade   : > { %2938 = vmax.xlane.f32.xlu0 %v2937_v22  ;;  %v4503_v23 = vpop.f32.mrf.mxu0 }
0x1adf   : > { %v2946_v38 = vsel %vm558_vm3, %v4503_v23, -inf }
0x1ae0   : > { %v2925_v25 = vpop.f32.mrf.mxu0 }
0x1ae1   : > { %v2940_v37 = vsel %vm548_vm2, %v2925_v25, -inf }
0x1ae2   : > { %2944 = vmax.xlane.f32.xlu0 %v2943_v36  ;;  %2941 = vmax.xlane.f32.xlu1 %v2940_v37 }
0x1ae6   : > { %2947 = vmax.xlane.f32.xlu0 %v2946_v38 }
0x1af3   : > { %2983 = vrot.lane.b32.xlu1 %v5489_v43, %s4938_s29 }
0x1b67   : > { %v2939_v39 = vpop.xlane.xlu0 %2938 }
0x1b68   : > { %v2949_v44 = vsub.f32 %v2922_v9, %v2939_v39 }
0x1b6a   : > { %v2953_v48 = vmul.f32 1.442695, %v2949_v44 }
0x1b6b   : > { %v2945_v45 = vpop.xlane.xlu0 %2944  ;;  %v2942_v46 = vpop.xlane.xlu1 %2941 }
0x1b6c   : > { %v2951_v47 = vsub.f32 %v4502_v8, %v2945_v45  ;;  %v2950_v50 = vsub.f32 %v2925_v25, %v2942_v46 }
0x1b6e   : > { %v2957_v49 = vmul.f32 1.442695, %v2951_v47  ;;  %v2955_v57 = vmul.f32 1.442695, %v2950_v50 }
0x1b6f   : > { %v2948_v51 = vpop.xlane.xlu0 %2947  ;;  %v2984_v3 = vpop.permute.xlu1 %2983 }
0x1b70   : > { %4835 = vpow2.f32 %v2957_v49  ;;  %v2952_v56 = vsub.f32 %v4503_v23, %v2948_v51 }
0x1b71   : > { %4837 = vpow2.f32 %v2953_v48 }
0x1b72   : > { %v2959_v7 = vmul.f32 1.442695, %v2952_v56 }
0x1b74   : > { %4839 = vpow2.f32 %v2959_v7 }
0x1b75   : > { %4841 = vpow2.f32 %v2955_v57 }
0x1b7d   : > { %v4836_v58 = vpop.eup %4835 }
0x1b7e   : > { %v2967_v59 = vsel %vm548_vm2, %v4836_v58, 0.0  ;;  %v4838_v60 = vpop.eup %4837 }
0x1b7f   : > { %2968 = vadd.xlane.f32.xlu0 %v2967_v59  ;;  %v2961_v62 = vsel %vm548_vm2, %v4838_v60, 0.0 }
0x1b81   : > { %v4840_v61 = vpop.eup %4839 }
0x1b82   : > { %v2970_v63 = vsel %vm558_vm3, %v4840_v61, 0.0  ;;  %v4842_v1 = vpop.eup %4841 }
0x1b83   : > { %2962 = vadd.xlane.f32.xlu0 %v2961_v62  ;;  %2971 = vadd.xlane.f32.xlu1 %v2970_v63  ;;  %v2964_v2 = vsel %vm548_vm2, %v4842_v1, 0.0 }
0x1b87   : > { %2965 = vadd.xlane.f32.xlu1 %v2964_v2 }
0x1b98   : > { %3072 = vrot.lane.b32.xlu1 %v5487_v41, %s4939_s30 }
0x1b99   : > { %2985 = vrot.lane.b32.xlu0 %v5487_v41, %s4938_s29  ;;  %s5937_s29 = smov 12  }
0x1b9c   : > { %3070 = vrot.lane.b32.xlu1 %v5489_v43, %s4939_s30 }
0x1b9d   : > { %3066 = vrot.lane.b32.xlu0 %v5475_v31, %s4939_s30 }
0x1ba0   : > { %3068 = vrot.lane.b32.xlu1 %v5473_v28, %s4939_s30  ;;  %s5938_s30 = smov 16  }
0x1c08   : > { %v2969_v4 = vpop.xlane.xlu0 %2968 }
0x1c0c   : > { %v2963_v10 = vpop.xlane.xlu0 %2962  ;;  %v2972_v27 = vpop.xlane.xlu1 %2971 }
0x1c0d   : > { %4843 = vrcp.f32 %v2972_v27 }
0x1c0e   : > { %4845 = vrcp.f32 %v2963_v10 }
0x1c0f   : > { %4847 = vrcp.f32 %v2969_v4 }
0x1c10   : > { %v2986_v29 = vpop.permute.xlu0 %2985  ;;  %v2966_v13 = vpop.xlane.xlu1 %2965 }
0x1c11   : > { %v2995_v14 = vand.u32 %v2986_v29, %v5097_v0  ;;  %4849 = vrcp.f32 %v2966_v13 }
0x1c13   : > { %4504 = vmatprep.subr.bf16.mxu1 %v2995_v14 }
0x1c14   : > { %4505 = vmatpush3.bf16.msra.mxu1 %v2995_v14  ;;  %v3073_v16 = vpop.permute.xlu1 %3072  ;;  %v3067_v35 = vpop.permute.xlu0 %3066 }
0x1c15   : > { %4506 = vmatprep.subr.bf16.mxu1 %v2984_v3  ;;  %v3084_v8 = vsel %vm486_vm1, %v3073_v16, 0 }
0x1c18   : > { %4507 = vmatpush3.bf16.msra.mxu1 %v2984_v3  ;;  %v3071_v9 = vpop.permute.xlu1 %3070 }
0x1c19   : > { %4608 = vmatprep.subr.msk.bf16.mxu1 %vm486_vm1, %v3073_v16  ;;  %v3081_v22 = vsel %vm486_vm1, %v3071_v9, 0 }
0x1c1a   : > { %v4844_v17 = vpop.eup %4843 }
0x1c1b   : > { %v4846_v11 = vpop.eup %4845  ;;  %v2980_v20 = vmul.f32 %v4844_v17, %v4840_v61 }
0x1c1c   : > { %v4848_v18 = vpop.eup %4847  ;;  %v2977_v21 = vmul.f32 %v4846_v11, %v4838_v60  ;;  %v3069_v23 = vpop.permute.xlu1 %3068 }
0x1c1d   : > { %v2979_v26 = vmul.f32 %v4848_v18, %v4836_v58 }
0x1c1e   : > { %v4850_v19 = vpop.eup %4849 }
0x1c1f   : > { %v2978_v24 = vmul.f32 %v4850_v19, %v4842_v1  ;;  %v2982_v15 = vpack.c.bf16 %v2980_v20, %v2979_v26 }
0x1c21   : > { %v2981_v30 = vpack.c.bf16 %v2978_v24, %v2977_v21 }
0x1c23   : > { %4508 = vmatprep.mubr.msk.bf16.mxu1 %vm548_vm2, %v2981_v30 }
0x1c24   : > { %4509 = vmatmul.mubr.msk.bf16.vlgmr.msra.gmra.mxu1 %vm548_vm2, %v2982_v15 }
0x1c25   : > { %4513 = vmatpush3.bf16.xpose.msra.mxu1 %v3084_v8  ;;  %4516 = vmatprep.mubr.msk.bf16.mxu1 %vm486_vm1, %v3067_v35 }
0x1c26   : > { %4609 = vmatprep.subr.msk.bf16.mxu1 %vm486_vm1, %v3071_v9 }
0x1c2d   : > { %4515 = vmatpush3.bf16.xpose.msra.mxu1 %v3081_v22 }
0x1c34   : > { %4517 = vmatmul.mubr.msk.bf16.vlgmr.msra.gmra.mxu1 %vm486_vm1, %v3069_v23 }
0x1ce4   : > { %v5637_v25 = vpop.f32.mrf.mxu1 }
0x1ce6   : > { %v5639_v36 = vpop.f32.mrf.mxu1 }
0x1ce8   : > { %v5641_v37 = vpop.f32.mrf.mxu1 }
0x1cea   : > { %v5643_v38 = vpop.f32.mrf.mxu1 }
0x1cf4   : > { %v4518_v39 = vpop.f32.mrf.mxu1 }
0x1cf5   : > { %v3141_v48 = vsel %vm548_vm2, %v4518_v39, -inf }
0x1cf6   : > { %v3120_v44 = vpop.f32.mrf.mxu1 }
0x1cf7   : > { %v3135_v45 = vsel %vm548_vm2, %v3120_v44, -inf }
0x1cf8   : > { %3136 = vmax.xlane.f32.xlu0 %v3135_v45  ;;  %v4519_v46 = vpop.f32.mrf.mxu1 }
0x1cf9   : > { %v3144_v50 = vsel %vm558_vm3, %v4519_v46, -inf }
0x1cfa   : > { %v3123_v47 = vpop.f32.mrf.mxu1 }
0x1cfb   : > { %v3138_v49 = vsel %vm548_vm2, %v3123_v47, -inf }
0x1cfc   : > { %3142 = vmax.xlane.f32.xlu0 %v3141_v48  ;;  %3139 = vmax.xlane.f32.xlu1 %v3138_v49 }
0x1d00   : > { %3145 = vmax.xlane.f32.xlu0 %v3144_v50 }
0x1d0d   : > { %3181 = vrot.lane.b32.xlu1 %v5489_v43, %s4940_s9 }
0x1d81   : > { %v3137_v51 = vpop.xlane.xlu0 %3136 }
0x1d82   : > { %v3147_v56 = vsub.f32 %v3120_v44, %v3137_v51 }
0x1d84   : > { %v3151_v59 = vmul.f32 1.442695, %v3147_v56 }
0x1d85   : > { %v3143_v57 = vpop.xlane.xlu0 %3142  ;;  %v3140_v7 = vpop.xlane.xlu1 %3139 }
0x1d86   : > { %v3149_v58 = vsub.f32 %v4518_v39, %v3143_v57  ;;  %v3148_v61 = vsub.f32 %v3123_v47, %v3140_v7 }
0x1d88   : > { %v3155_v60 = vmul.f32 1.442695, %v3149_v58  ;;  %v3153_v1 = vmul.f32 1.442695, %v3148_v61 }
0x1d89   : > { %v3146_v62 = vpop.xlane.xlu0 %3145  ;;  %v3182_v17 = vpop.permute.xlu1 %3181 }
0x1d8a   : > { %4851 = vpow2.f32 %v3155_v60  ;;  %v3150_v63 = vsub.f32 %v4519_v46, %v3146_v62 }
0x1d8b   : > { %4853 = vpow2.f32 %v3151_v59 }
0x1d8c   : > { %v3157_v2 = vmul.f32 1.442695, %v3150_v63 }
0x1d8e   : > { %4855 = vpow2.f32 %v3157_v2 }
0x1d8f   : > { %4857 = vpow2.f32 %v3153_v1 }
0x1d97   : > { %v4852_v3 = vpop.eup %4851 }
0x1d98   : > { %v3165_v4 = vsel %vm548_vm2, %v4852_v3, 0.0  ;;  %v4854_v10 = vpop.eup %4853 }
0x1d99   : > { %3166 = vadd.xlane.f32.xlu0 %v3165_v4  ;;  %v3159_v29 = vsel %vm548_vm2, %v4854_v10, 0.0 }
0x1d9b   : > { %v4856_v27 = vpop.eup %4855 }
0x1d9c   : > { %v3168_v13 = vsel %vm558_vm3, %v4856_v27, 0.0  ;;  %v4858_v14 = vpop.eup %4857 }
0x1d9d   : > { %3160 = vadd.xlane.f32.xlu0 %v3159_v29  ;;  %3169 = vadd.xlane.f32.xlu1 %v3168_v13  ;;  %v3162_v16 = vsel %vm548_vm2, %v4858_v14, 0.0 }
0x1da1   : > { %3163 = vadd.xlane.f32.xlu1 %v3162_v16 }
0x1db2   : > { %3270 = vrot.lane.b32.xlu1 %v5487_v41, %s4941_s10 }
0x1db3   : > { %3183 = vrot.lane.b32.xlu0 %v5487_v41, %s4940_s9  ;;  %s5939_s9 = smov 20  }
0x1db6   : > { %3268 = vrot.lane.b32.xlu1 %v5489_v43, %s4941_s10 }
0x1db7   : > { %3264 = vrot.lane.b32.xlu0 %v5475_v31, %s4941_s10 }
0x1dba   : > { %3266 = vrot.lane.b32.xlu1 %v5473_v28, %s4941_s10  ;;  %s5940_s10 = smov 24  }
0x1e22   : > { %v3167_v11 = vpop.xlane.xlu0 %3166 }
0x1e26   : > { %v3161_v18 = vpop.xlane.xlu0 %3160  ;;  %v3170_v19 = vpop.xlane.xlu1 %3169 }
0x1e27   : > { %4859 = vrcp.f32 %v3170_v19 }
0x1e28   : > { %4861 = vrcp.f32 %v3161_v18 }
0x1e29   : > { %4863 = vrcp.f32 %v3167_v11 }
0x1e2a   : > { %v3184_v20 = vpop.permute.xlu0 %3183  ;;  %v3164_v21 = vpop.xlane.xlu1 %3163 }
0x1e2b   : > { %v3193_v24 = vand.u32 %v3184_v20, %v5097_v0  ;;  %4865 = vrcp.f32 %v3164_v21 }
0x1e2d   : > { %4520 = vmatprep.subr.bf16.mxu0 %v3193_v24 }
0x1e2e   : > { %4521 = vmatpush3.bf16.msra.mxu0 %v3193_v24  ;;  %v3271_v26 = vpop.permute.xlu1 %3270  ;;  %v3265_v46 = vpop.permute.xlu0 %3264 }
0x1e2f   : > { %4522 = vmatprep.subr.bf16.mxu0 %v3182_v17  ;;  %v3282_v47 = vsel %vm486_vm1, %v3271_v26, 0 }
0x1e32   : > { %4523 = vmatpush3.bf16.msra.mxu0 %v3182_v17  ;;  %v3269_v48 = vpop.permute.xlu1 %3268 }
0x1e33   : > { %4610 = vmatprep.subr.msk.bf16.mxu0 %vm486_vm1, %v3271_v26  ;;  %v3279_v49 = vsel %vm486_vm1, %v3269_v48, 0 }
0x1e34   : > { %v4860_v30 = vpop.eup %4859 }
0x1e35   : > { %v4862_v15 = vpop.eup %4861  ;;  %v3178_v9 = vmul.f32 %v4860_v30, %v4856_v27 }
0x1e36   : > { %v4864_v35 = vpop.eup %4863  ;;  %v3175_v22 = vmul.f32 %v4862_v15, %v4854_v10  ;;  %v3267_v50 = vpop.permute.xlu1 %3266 }
0x1e37   : > { %v3177_v39 = vmul.f32 %v4864_v35, %v4852_v3 }
0x1e38   : > { %v4866_v8 = vpop.eup %4865 }
0x1e39   : > { %v3176_v23 = vmul.f32 %v4866_v8, %v4858_v14  ;;  %v3180_v45 = vpack.c.bf16 %v3178_v9, %v3177_v39 }
0x1e3b   : > { %v3179_v44 = vpack.c.bf16 %v3176_v23, %v3175_v22 }
0x1e3d   : > { %4524 = vmatprep.mubr.msk.bf16.mxu0 %vm548_vm2, %v3179_v44 }
0x1e3e   : > { %4525 = vmatmul.mubr.msk.bf16.vlgmr.msra.gmra.mxu0 %vm548_vm2, %v3180_v45 }
0x1e3f   : > { %4529 = vmatpush3.bf16.xpose.msra.mxu0 %v3282_v47  ;;  %4532 = vmatprep.mubr.msk.bf16.mxu0 %vm486_vm1, %v3265_v46 }
0x1e40   : > { %4611 = vmatprep.subr.msk.bf16.mxu0 %vm486_vm1, %v3269_v48 }
0x1e47   : > { %4531 = vmatpush3.bf16.xpose.msra.mxu0 %v3279_v49 }
0x1e4e   : > { %4533 = vmatmul.mubr.msk.bf16.vlgmr.msra.gmra.mxu0 %vm486_vm1, %v3267_v50 }
0x1efe   : > { %v5674_v51 = vpop.f32.mrf.mxu0 }
0x1f00   : > { %v5676_v56 = vpop.f32.mrf.mxu0 }
0x1f02   : > { %v5678_v57 = vpop.f32.mrf.mxu0 }
0x1f04   : > { %v5680_v7 = vpop.f32.mrf.mxu0 }
0x1f0e   : > { %v4534_v58 = vpop.f32.mrf.mxu0 }
0x1f0f   : > { %v3339_v63 = vsel %vm548_vm2, %v4534_v58, -inf }
0x1f10   : > { %v3318_v59 = vpop.f32.mrf.mxu0 }
0x1f11   : > { %v3333_v60 = vsel %vm548_vm2, %v3318_v59, -inf }
0x1f12   : > { %3334 = vmax.xlane.f32.xlu0 %v3333_v60  ;;  %v4535_v61 = vpop.f32.mrf.mxu0 }
0x1f13   : > { %v3342_v2 = vsel %vm558_vm3, %v4535_v61, -inf }
0x1f14   : > { %v3321_v62 = vpop.f32.mrf.mxu0 }
0x1f15   : > { %v3336_v1 = vsel %vm548_vm2, %v3321_v62, -inf }
0x1f16   : > { %3340 = vmax.xlane.f32.xlu0 %v3339_v63  ;;  %3337 = vmax.xlane.f32.xlu1 %v3336_v1 }
0x1f1a   : > { %3343 = vmax.xlane.f32.xlu0 %v3342_v2 }
0x1f27   : > { %3379 = vrot.lane.b32.xlu1 %v5489_v43, %s4942_s11 }
0x1f9b   : > { %v3335_v3 = vpop.xlane.xlu0 %3334 }
0x1f9c   : > { %v3345_v4 = vsub.f32 %v3318_v59, %v3335_v3 }
0x1f9e   : > { %v3349_v13 = vmul.f32 1.442695, %v3345_v4 }
0x1f9f   : > { %v3341_v10 = vpop.xlane.xlu0 %3340  ;;  %v3338_v27 = vpop.xlane.xlu1 %3337 }
0x1fa0   : > { %v3347_v29 = vsub.f32 %v4534_v58, %v3341_v10  ;;  %v3346_v16 = vsub.f32 %v3321_v62, %v3338_v27 }
0x1fa2   : > { %v3353_v14 = vmul.f32 1.442695, %v3347_v29  ;;  %v3351_v18 = vmul.f32 1.442695, %v3346_v16 }
0x1fa3   : > { %v3344_v17 = vpop.xlane.xlu0 %3343  ;;  %v3380_v9 = vpop.permute.xlu1 %3379 }
0x1fa4   : > { %4867 = vpow2.f32 %v3353_v14  ;;  %v3348_v11 = vsub.f32 %v4535_v61, %v3344_v17 }
0x1fa5   : > { %4869 = vpow2.f32 %v3349_v13 }
0x1fa6   : > { %v3355_v19 = vmul.f32 1.442695, %v3348_v11 }
0x1fa8   : > { %4871 = vpow2.f32 %v3355_v19 }
0x1fa9   : > { %4873 = vpow2.f32 %v3351_v18 }
0x1fb1   : > { %v4868_v20 = vpop.eup %4867 }
0x1fb2   : > { %v3363_v21 = vsel %vm548_vm2, %v4868_v20, 0.0  ;;  %v4870_v24 = vpop.eup %4869 }
0x1fb3   : > { %3364 = vadd.xlane.f32.xlu0 %v3363_v21  ;;  %v3357_v30 = vsel %vm548_vm2, %v4870_v24, 0.0 }
0x1fb5   : > { %v4872_v26 = vpop.eup %4871 }
0x1fb6   : > { %v3366_v15 = vsel %vm558_vm3, %v4872_v26, 0.0  ;;  %v4874_v35 = vpop.eup %4873 }
0x1fb7   : > { %3358 = vadd.xlane.f32.xlu0 %v3357_v30  ;;  %3367 = vadd.xlane.f32.xlu1 %v3366_v15  ;;  %v3360_v8 = vsel %vm548_vm2, %v4874_v35, 0.0 }
0x1fbb   : > { %3361 = vadd.xlane.f32.xlu1 %v3360_v8 }
0x1fcc   : > { %3468 = vrot.lane.b32.xlu1 %v5487_v41, %s5931_s22 }
0x1fcd   : > { %3381 = vrot.lane.b32.xlu0 %v5487_v41, %s4942_s11 }
0x1fd0   : > { %3466 = vrot.lane.b32.xlu1 %v5489_v43, %s5931_s22 }
0x1fd1   : > { %3462 = vrot.lane.b32.xlu0 %v5475_v31, %s5931_s22 }
0x1fd4   : > { %3464 = vrot.lane.b32.xlu1 %v5473_v28, %s5931_s22 }
0x203c   : > { %v3365_v22 = vpop.xlane.xlu0 %3364 }
0x2040   : > { %v3359_v23 = vpop.xlane.xlu0 %3358  ;;  %v3368_v39 = vpop.xlane.xlu1 %3367 }
0x2041   : > { %4875 = vrcp.f32 %v3368_v39 }
0x2042   : > { %4877 = vrcp.f32 %v3359_v23 }
0x2043   : > { %4879 = vrcp.f32 %v3365_v22 }
0x2044   : > { %v3382_v44 = vpop.permute.xlu0 %3381  ;;  %v3362_v45 = vpop.xlane.xlu1 %3361 }
0x2045   : > { %v3391_v46 = vand.u32 %v3382_v44, %v5097_v0  ;;  %4881 = vrcp.f32 %v3362_v45 }
0x2047   : > { %4536 = vmatprep.subr.bf16.mxu1 %v3391_v46 }
0x2048   : > { %4537 = vmatpush3.bf16.msra.mxu1 %v3391_v46  ;;  %v3469_v47 = vpop.permute.xlu1 %3468  ;;  %v3463_v2 = vpop.permute.xlu0 %3462 }
0x2049   : > { %4538 = vmatprep.subr.bf16.mxu1 %v3380_v9  ;;  %v3480_v3 = vsel %vm486_vm1, %v3469_v47, 0 }
0x204c   : > { %4539 = vmatpush3.bf16.msra.mxu1 %v3380_v9  ;;  %v3467_v4 = vpop.permute.xlu1 %3466 }
0x204d   : > { %4612 = vmatprep.subr.msk.bf16.mxu1 %vm486_vm1, %v3469_v47  ;;  %v3477_v10 = vsel %vm486_vm1, %v3467_v4, 0 }
0x204e   : > { %v4876_v48 = vpop.eup %4875 }
0x204f   : > { %v4878_v49 = vpop.eup %4877  ;;  %v3376_v59 = vmul.f32 %v4876_v48, %v4872_v26 }
0x2050   : > { %v4880_v50 = vpop.eup %4879  ;;  %v3373_v60 = vmul.f32 %v4878_v49, %v4870_v24  ;;  %v3465_v27 = vpop.permute.xlu1 %3464 }
0x2051   : > { %v3375_v62 = vmul.f32 %v4880_v50, %v4868_v20 }
0x2052   : > { %v4882_v58 = vpop.eup %4881 }
0x2053   : > { %v3374_v61 = vmul.f32 %v4882_v58, %v4874_v35  ;;  %v3378_v1 = vpack.c.bf16 %v3376_v59, %v3375_v62 }
0x2055   : > { %v3377_v63 = vpack.c.bf16 %v3374_v61, %v3373_v60 }
0x2057   : > { %4540 = vmatprep.mubr.msk.bf16.mxu1 %vm548_vm2, %v3377_v63 }
0x2058   : > { %4541 = vmatmul.mubr.msk.bf16.vlgmr.msra.gmra.mxu1 %vm548_vm2, %v3378_v1 }
0x2059   : > { %4545 = vmatpush3.bf16.xpose.msra.mxu1 %v3480_v3  ;;  %4548 = vmatprep.mubr.msk.bf16.mxu1 %vm486_vm1, %v3463_v2 }
0x205a   : > { %4613 = vmatprep.subr.msk.bf16.mxu1 %vm486_vm1, %v3467_v4 }
0x2061   : > { %4547 = vmatpush3.bf16.xpose.msra.mxu1 %v3477_v10 }
0x2068   : > { %4549 = vmatmul.mubr.msk.bf16.vlgmr.msra.gmra.mxu1 %vm486_vm1, %v3465_v27 }
0x2118   : > { %v5711_v29 = vpop.f32.mrf.mxu1 }
0x211a   : > { %v5713_v13 = vpop.f32.mrf.mxu1 }
0x211c   : > { %v5715_v14 = vpop.f32.mrf.mxu1 }
0x211e   : > { %v5717_v16 = vpop.f32.mrf.mxu1 }
0x2128   : > { %v4550_v17 = vpop.f32.mrf.mxu1 }
0x2129   : > { %v3537_v21 = vsel %vm548_vm2, %v4550_v17, -inf }
0x212a   : > { %v3516_v11 = vpop.f32.mrf.mxu1 }
0x212b   : > { %v3531_v18 = vsel %vm548_vm2, %v3516_v11, -inf }
0x212c   : > { %3532 = vmax.xlane.f32.xlu0 %v3531_v18  ;;  %v4551_v19 = vpop.f32.mrf.mxu1 }
0x212d   : > { %v3540_v26 = vsel %vm558_vm3, %v4551_v19, -inf }
0x212e   : > { %v3519_v20 = vpop.f32.mrf.mxu1 }
0x212f   : > { %v3534_v24 = vsel %vm548_vm2, %v3519_v20, -inf }
0x2130   : > { %3538 = vmax.xlane.f32.xlu0 %v3537_v21  ;;  %3535 = vmax.xlane.f32.xlu1 %v3534_v24 }
0x2134   : > { %3541 = vmax.xlane.f32.xlu0 %v3540_v26 }
0x2141   : > { %3577 = vrot.lane.b32.xlu1 %v5489_v43, %s5932_s23 }
0x21b5   : > { %v3533_v30 = vpop.xlane.xlu0 %3532 }
0x21b6   : > { %v3543_v15 = vsub.f32 %v3516_v11, %v3533_v30 }
0x21b8   : > { %v3547_v22 = vmul.f32 1.442695, %v3543_v15 }
0x21b9   : > { %v3539_v35 = vpop.xlane.xlu0 %3538  ;;  %v3536_v8 = vpop.xlane.xlu1 %3535 }
0x21ba   : > { %v3545_v9 = vsub.f32 %v4550_v17, %v3539_v35  ;;  %v3544_v39 = vsub.f32 %v3519_v20, %v3536_v8 }
0x21bc   : > { %v3551_v23 = vmul.f32 1.442695, %v3545_v9  ;;  %v3549_v46 = vmul.f32 1.442695, %v3544_v39 }
0x21bd   : > { %v3542_v44 = vpop.xlane.xlu0 %3541  ;;  %v3578_v63 = vpop.permute.xlu1 %3577 }
0x21be   : > { %4883 = vpow2.f32 %v3551_v23  ;;  %v3546_v45 = vsub.f32 %v4551_v19, %v3542_v44 }
0x21bf   : > { %4885 = vpow2.f32 %v3547_v22 }
0x21c0   : > { %v3553_v47 = vmul.f32 1.442695, %v3546_v45 }
0x21c2   : > { %4887 = vpow2.f32 %v3553_v47 }
0x21c3   : > { %4889 = vpow2.f32 %v3549_v46 }
0x21cb   : > { %v4884_v48 = vpop.eup %4883 }
0x21cc   : > { %v3561_v49 = vsel %vm548_vm2, %v4884_v48, 0.0  ;;  %v4886_v50 = vpop.eup %4885 }
0x21cd   : > { %3562 = vadd.xlane.f32.xlu0 %v3561_v49  ;;  %v3555_v59 = vsel %vm548_vm2, %v4886_v50, 0.0 }
0x21cf   : > { %v4888_v58 = vpop.eup %4887 }
0x21d0   : > { %v3564_v60 = vsel %vm558_vm3, %v4888_v58, 0.0  ;;  %v4890_v61 = vpop.eup %4889 }
0x21d1   : > { %3556 = vadd.xlane.f32.xlu0 %v3555_v59  ;;  %3565 = vadd.xlane.f32.xlu1 %v3564_v60  ;;  %v3558_v62 = vsel %vm548_vm2, %v4890_v61, 0.0 }
0x21d5   : > { %3559 = vadd.xlane.f32.xlu1 %v3558_v62 }
0x21e6   : > { %3666 = vrot.lane.b32.xlu1 %v5487_v41, %s5933_s24 }
0x21e7   : > { %3579 = vrot.lane.b32.xlu0 %v5487_v41, %s5932_s23 }
0x21ea   : > { %3664 = vrot.lane.b32.xlu1 %v5489_v43, %s5933_s24 }
0x21eb   : > { %3660 = vrot.lane.b32.xlu0 %v5475_v31, %s5933_s24 }
0x21ee   : > { %3662 = vrot.lane.b32.xlu1 %v5473_v28, %s5933_s24  ;;  %s325_s24 = scalar_lea.vmem %s5907_s8, %s5019_s15 }
0x2256   : > { %v3563_v1 = vpop.xlane.xlu0 %3562 }
0x225a   : > { %v3557_v2 = vpop.xlane.xlu0 %3556  ;;  %v3566_v3 = vpop.xlane.xlu1 %3565 }
0x225b   : > { %4891 = vrcp.f32 %v3566_v3 }
0x225c   : > { %4893 = vrcp.f32 %v3557_v2 }
0x225d   : > { %4895 = vrcp.f32 %v3563_v1 }
0x225e   : > { %v3580_v4 = vpop.permute.xlu0 %3579  ;;  %v3560_v10 = vpop.xlane.xlu1 %3559 }
0x225f   : > { %v3589_v27 = vand.u32 %v3580_v4, %v5097_v0  ;;  %4897 = vrcp.f32 %v3560_v10 }
0x2261   : > { %4552 = vmatprep.subr.bf16.mxu0 %v3589_v27 }
0x2262   : > { %4553 = vmatpush3.bf16.msra.mxu0 %v3589_v27  ;;  %v3667_v17 = vpop.permute.xlu1 %3666  ;;  %v3661_v15 = vpop.permute.xlu0 %3660 }
0x2263   : > { %4554 = vmatprep.subr.bf16.mxu0 %v3578_v63  ;;  %v3678_v35 = vsel %vm486_vm1, %v3667_v17, 0 }
0x2266   : > { %4555 = vmatpush3.bf16.msra.mxu0 %v3578_v63  ;;  %v3665_v8 = vpop.permute.xlu1 %3664 }
0x2267   : > { %4614 = vmatprep.subr.msk.bf16.mxu0 %vm486_vm1, %v3667_v17  ;;  %v3675_v9 = vsel %vm486_vm1, %v3665_v8, 0 }
0x2268   : > { %v4892_v28 = vpop.eup %4891 }
0x2269   : > { %v4894_v31 = vpop.eup %4893  ;;  %v3574_v19 = vmul.f32 %v4892_v28, %v4888_v58 }
0x226a   : > { %v4896_v11 = vpop.eup %4895  ;;  %v3571_v20 = vmul.f32 %v4894_v31, %v4886_v50  ;;  %v3663_v22 = vpop.permute.xlu1 %3662 }
0x226b   : > { %v3573_v24 = vmul.f32 %v4896_v11, %v4884_v48 }
0x226c   : > { %v4898_v18 = vpop.eup %4897 }
0x226d   : > { %v3572_v21 = vmul.f32 %v4898_v18, %v4890_v61  ;;  %v3576_v30 = vpack.c.bf16 %v3574_v19, %v3573_v24 }
0x226f   : > { %v3575_v26 = vpack.c.bf16 %v3572_v21, %v3571_v20 }
0x2271   : > { %4556 = vmatprep.mubr.msk.bf16.mxu0 %vm548_vm2, %v3575_v26 }
0x2272   : > { %4557 = vmatmul.mubr.msk.bf16.vlgmr.msra.gmra.mxu0 %vm548_vm2, %v3576_v30 }
0x2273   : > { %4561 = vmatpush3.bf16.xpose.msra.mxu0 %v3678_v35  ;;  %4564 = vmatprep.mubr.msk.bf16.mxu0 %vm486_vm1, %v3661_v15 }
0x2274   : > { %4615 = vmatprep.subr.msk.bf16.mxu0 %vm486_vm1, %v3665_v8 }
0x227b   : > { %4563 = vmatpush3.bf16.xpose.msra.mxu0 %v3675_v9 }
0x2282   : > { %4565 = vmatmul.mubr.msk.bf16.vlgmr.msra.gmra.mxu0 %vm486_vm1, %v3663_v22  ;;  %vm5941_vm1 = vcmask 122976  }
0x2332   : > { %v5748_v23 = vpop.f32.mrf.mxu0 }
0x2334   : > { %v5750_v39 = vpop.f32.mrf.mxu0 }
0x2336   : > { %v5752_v44 = vpop.f32.mrf.mxu0 }
0x2338   : > { %v5754_v45 = vpop.f32.mrf.mxu0 }
0x2342   : > { %v4566_v46 = vpop.f32.mrf.mxu0 }
0x2343   : > { %v3735_v59 = vsel %vm548_vm2, %v4566_v46, -inf }
0x2344   : > { %v3714_v47 = vpop.f32.mrf.mxu0 }
0x2345   : > { %v3729_v48 = vsel %vm548_vm2, %v3714_v47, -inf }
0x2346   : > { %3730 = vmax.xlane.f32.xlu0 %v3729_v48  ;;  %v4567_v49 = vpop.f32.mrf.mxu0 }
0x2347   : > { %v3738_v60 = vsel %vm558_vm3, %v4567_v49, -inf }
0x2348   : > { %v3717_v50 = vpop.f32.mrf.mxu0 }
0x2349   : > { %v3732_v58 = vsel %vm548_vm2, %v3717_v50, -inf }
0x234a   : > { %3736 = vmax.xlane.f32.xlu0 %v3735_v59  ;;  %3733 = vmax.xlane.f32.xlu1 %v3732_v58 }
0x234e   : > { %3739 = vmax.xlane.f32.xlu0 %v3738_v60 }
0x23cf   : > { %v3731_v61 = vpop.xlane.xlu0 %3730 }
0x23d0   : > { %v3741_v62 = vsub.f32 %v3714_v47, %v3731_v61 }
0x23d2   : > { %v3745_v3 = vmul.f32 1.442695, %v3741_v62  ;;  %v4657_v62 = vld [vmem:[%s5905_s6 + $0x8] sm:$0xff]  }
0x23d3   : > { %v3737_v63 = vpop.xlane.xlu0 %3736  ;;  %v3734_v1 = vpop.xlane.xlu1 %3733 }
0x23d4   : > { %v3743_v2 = vsub.f32 %v4566_v46, %v3737_v63  ;;  %v3742_v10 = vsub.f32 %v3717_v50, %v3734_v1  ;;  %v4658_v63 = vld [vmem:[%s5905_s6] sm:$0xff]  }
0x23d6   : > { %v3749_v4 = vmul.f32 1.442695, %v3743_v2  ;;  %v3747_v28 = vmul.f32 1.442695, %v3742_v10 }
0x23d7   : > { %v3740_v27 = vpop.xlane.xlu0 %3739 }
0x23d8   : > { %4899 = vpow2.f32 %v3749_v4  ;;  %v3744_v17 = vsub.f32 %v4567_v49, %v3740_v27 }
0x23d9   : > { %4901 = vpow2.f32 %v3745_v3 }
0x23da   : > { %v3751_v31 = vmul.f32 1.442695, %v3744_v17 }
0x23dc   : > { %4903 = vpow2.f32 %v3751_v31 }
0x23dd   : > { %4905 = vpow2.f32 %v3747_v28 }
0x23e5   : > { %v5760_v11 = vpop.eup %4899 }
0x23e6   : > { %v3759_v18 = vsel %vm548_vm2, %v5760_v11, 0.0  ;;  %v5764_v19 = vpop.eup %4901 }
0x23e7   : > { %3760 = vadd.xlane.f32.xlu0 %v3759_v18  ;;  %v3753_v21 = vsel %vm548_vm2, %v5764_v19, 0.0 }
0x23e9   : > { %v5766_v20 = vpop.eup %4903 }
0x23ea   : > { %v3762_v24 = vsel %vm558_vm3, %v5766_v20, 0.0  ;;  %v4906_v26 = vpop.eup %4905  ;;  %vm5943_vm3 = vcmask 221376  }
0x23eb   : > { %3754 = vadd.xlane.f32.xlu0 %v3753_v21  ;;  %3763 = vadd.xlane.f32.xlu1 %v3762_v24  ;;  %v3756_v30 = vsel %vm548_vm2, %v4906_v26, 0.0  ;;  %v4073_v24 = vld [vmem:[%s5906_s7] ss:$0 sm:$0xff] }
0x23ef   : > { %3757 = vadd.xlane.f32.xlu1 %v3756_v30  ;;  %v2150_v30 = vadd.f32 %v5479_v32, %v4073_v24  ;;  %v4917_v32 = vld [vmem:[%s5025_s18] sm:$0xff] }
0x2400   : > { %3775 = vrot.lane.b32.xlu1 %v5489_v43, %s5934_s25 }
0x2401   : > { %3777 = vrot.lane.b32.xlu0 %v5487_v41, %s5934_s25 }
0x2404   : > { %2654 = vrot.lane.b32.xlu1 %v5565_v42, %s5935_s26 }
0x2405   : > { %2658 = vrot.lane.b32.xlu0 %v5563_v40, %s5935_s26 }
0x2408   : > { %2656 = vrot.lane.b32.xlu1 %v5569_v53, %s5935_s26 }
0x2409   : > { %2852 = vrot.lane.b32.xlu0 %v5602_v55, %s5936_s28 }
0x240c   : > { %2660 = vrot.lane.b32.xlu1 %v5567_v52, %s5935_s26 }
0x240d   : > { %2856 = vrot.lane.b32.xlu0 %v5600_v54, %s5936_s28 }
0x2410   : > { %2854 = vrot.lane.b32.xlu1 %v5606_v6, %s5936_s28 }
0x2411   : > { %3050 = vrot.lane.b32.xlu0 %v5639_v36, %s5937_s29 }
0x2414   : > { %2858 = vrot.lane.b32.xlu1 %v5604_v5, %s5936_s28 }
0x2415   : > { %3054 = vrot.lane.b32.xlu0 %v5637_v25, %s5937_s29 }
0x2418   : > { %3052 = vrot.lane.b32.xlu1 %v5643_v38, %s5937_s29 }
0x2419   : > { %3248 = vrot.lane.b32.xlu0 %v5676_v56, %s5938_s30 }
0x241c   : > { %3056 = vrot.lane.b32.xlu1 %v5641_v37, %s5937_s29 }
0x241d   : > { %3252 = vrot.lane.b32.xlu0 %v5674_v51, %s5938_s30 }
0x2420   : > { %3250 = vrot.lane.b32.xlu1 %v5680_v7, %s5938_s30 }
0x2421   : > { %3446 = vrot.lane.b32.xlu0 %v5713_v13, %s5939_s9 }
0x2424   : > { %3254 = vrot.lane.b32.xlu1 %v5678_v57, %s5938_s30 }
0x2425   : > { %3450 = vrot.lane.b32.xlu0 %v5711_v29, %s5939_s9 }
0x2428   : > { %3448 = vrot.lane.b32.xlu1 %v5717_v16, %s5939_s9 }
0x2429   : > { %3644 = vrot.lane.b32.xlu0 %v5750_v39, %s5940_s10 }
0x242c   : > { %3452 = vrot.lane.b32.xlu1 %v5715_v14, %s5939_s9 }
0x242d   : > { %3648 = vrot.lane.b32.xlu0 %v5748_v23, %s5940_s10 }
0x2430   : > { %3646 = vrot.lane.b32.xlu1 %v5754_v45, %s5940_s10 }
0x2434   : > { %3650 = vrot.lane.b32.xlu1 %v5752_v44, %s5940_s10 }
0x2470   : > { %v3761_v41 = vpop.xlane.xlu0 %3760 }
0x2474   : > { %v3755_v43 = vpop.xlane.xlu0 %3754  ;;  %v3764_v40 = vpop.xlane.xlu1 %3763 }
0x2475   : > { %4907 = vrcp.f32 %v3764_v40 }
0x2476   : > { %4909 = vrcp.f32 %v3755_v43 }
0x2477   : > { %4911 = vrcp.f32 %v3761_v41  ;;  %v2142_v41 = vadd.f32 %v4073_v24, %v5481_v33 }
0x2478   : > { %v3778_v42 = vpop.permute.xlu0 %3777  ;;  %v3758_v52 = vpop.xlane.xlu1 %3757 }
0x2479   : > { %v3787_v53 = vand.u32 %v3778_v42, %v5097_v0  ;;  %4913 = vrcp.f32 %v3758_v52  ;;  %v4915_v52 = vld [vmem:[%s5025_s18 + $0x10] sm:$0xff] }
0x247b   : > { %4568 = vmatprep.subr.bf16.mxu1 %v3787_v53 }
0x247c   : > { %4569 = vmatpush3.bf16.msra.mxu1 %v3787_v53  ;;  %v2659_v54 = vpop.permute.xlu0 %2658  ;;  %v3776_v55 = vpop.permute.xlu1 %3775  ;;  %v2158_v53 = vadd.f32 %v4915_v52, %v2150_v30 }
0x247d   : > { %2668 = vst.msk [vmem:[#allocation2 + $0x10] sm:$0xff] %vm866_vm7, %v2659_v54  ;;  %4570 = vmatprep.subr.bf16.mxu1 %v3776_v55  ;;  %v2153_v54 = vadd.f32 %v5483_v12, %v4073_v24 }
0x2480   : > { %v2853_v5 = vpop.permute.xlu0 %2852  ;;  %4571 = vmatpush3.bf16.msra.mxu1 %v3776_v55  ;;  %v2655_v6 = vpop.permute.xlu1 %2654  ;;  %v4916_v55 = vld [vmem:[%s5034_s21 + $0x10] sm:$0xff] }
0x2481   : > { %2666 = vst.msk [vmem:[#allocation2] sm:$0xff] %vm866_vm7, %v2655_v6  ;;  %4576 = vmatprep.subr.bf16.mxu1 %v4657_v62 }
0x2482   : > { %2864 = vst.msk [vmem:[#allocation2] sm:$0xff] %vm1066_vm8, %v2853_v5  ;;  %v4908_v25 = vpop.eup %4907 }
0x2483   : > { %v4910_v36 = vpop.eup %4909  ;;  %v3772_v56 = vmul.f32 %v4908_v25, %v5766_v20  ;;  %v2156_v25 = vadd.f32 %v4917_v32, %v2142_v41 }
0x2484   : > { %v2857_v37 = vpop.permute.xlu0 %2856  ;;  %v2657_v38 = vpop.permute.xlu1 %2656  ;;  %v3769_v57 = vmul.f32 %v4910_v36, %v5764_v19  ;;  %v2145_v36 = vadd.f32 %v4073_v24, %v5485_v34 }
0x2485   : > { %v4912_v0 = vpop.eup %4911  ;;  %2866 = vst.msk [vmem:[#allocation2 + $0x10] sm:$0xff] %vm1066_vm8, %v2857_v37 }
0x2486   : > { %2667 = vst.msk [vmem:[#allocation2 + $0x8] sm:$0xff] %vm866_vm7, %v2657_v38  ;;  %v4914_v51 = vpop.eup %4913  ;;  %v3771_v14 = vmul.f32 %v4912_v0, %v5760_v11  ;;  %v4918_v38 = vld [vmem:[%s5034_s21] sm:$0xff] }
0x2487   : > { %v3770_v7 = vmul.f32 %v4914_v51, %v4906_v26  ;;  %v4118_v26 = vld [vmem:[%s5906_s7] ss:$0 sm:$0xff] }
0x2488   : > { %v3051_v29 = vpop.permute.xlu0 %3050  ;;  %v2661_v13 = vpop.permute.xlu1 %2660  ;;  %v3774_v15 = vpack.c.bf16 %v3772_v56, %v3771_v14  ;;  %v4919_v56 = vld [vmem:[%s5025_s18 + $0x18] sm:$0x1] }
0x2489   : > { %3062 = vst.msk [vmem:[#allocation2] sm:$0xff] %vm1266_vm9, %v3051_v29  ;;  %v3773_v16 = vpack.c.bf16 %v3770_v7, %v3769_v57  ;;  %v2159_v57 = vadd.f32 %v4919_v56, %v2153_v54  ;;  %v4920_v29 = vld [vmem:[%s5034_s21 + $0x18] sm:$0x1] }
0x248a   : > { %2669 = vst.msk [vmem:[#allocation2 + $0x18] sm:$0x1] %vm870_vm10, %v2661_v13 }
0x248b   : > { %4572 = vmatprep.mubr.msk.bf16.mxu1 %vm548_vm2, %v3773_v16  ;;  %v4921_v16 = vld [vmem:[%s5025_s18 + $0x8] sm:$0xff] }
0x248c   : > { %v3055_v35 = vpop.permute.xlu0 %3054  ;;  %4573 = vmatmul.mubr.msk.bf16.vlgmr.msra.gmra.mxu1 %vm548_vm2, %v3774_v15  ;;  %v2855_v8 = vpop.permute.xlu1 %2854  ;;  %vm5942_vm2 = vcmask 188576   ;;  %v2157_v15 = vadd.f32 %v4921_v16, %v2145_v36 }
0x248d   : > { %3064 = vst.msk [vmem:[#allocation2 + $0x10] sm:$0xff] %vm1266_vm9, %v3055_v35  ;;  %4577 = vmatpush3.bf16.msra.mxu1 %v4657_v62  ;;  %v4922_v35 = vld [vmem:[%s5034_s21 + $0x8] sm:$0xff] }
0x248e   : > { %2865 = vst.msk [vmem:[#allocation2 + $0x8] sm:$0xff] %vm1066_vm8, %v2855_v8  ;;  %4578 = vmatprep.subr.bf16.mxu1 %v4658_v63 }
0x2490   : > { %v3249_v9 = vpop.permute.xlu0 %3248  ;;  %v2859_v22 = vpop.permute.xlu1 %2858 }
0x2491   : > { %3260 = vst.msk [vmem:[#allocation2] sm:$0xff] %vm1466_vm11, %v3249_v9  ;;  %4579 = vmatpush3.bf16.msra.mxu1 %v4658_v63 }
0x2492   : > { %2867 = vst.msk [vmem:[#allocation2 + $0x18] sm:$0x1] %vm1070_vm12, %v2859_v22 }
0x2494   : > { %v3253_v23 = vpop.permute.xlu0 %3252  ;;  %v3053_v39 = vpop.permute.xlu1 %3052 }
0x2495   : > { %3262 = vst.msk [vmem:[#allocation2 + $0x10] sm:$0xff] %vm1466_vm11, %v3253_v23 }
0x2496   : > { %3063 = vst.msk [vmem:[#allocation2 + $0x8] sm:$0xff] %vm1266_vm9, %v3053_v39 }
0x2498   : > { %v3447_v44 = vpop.permute.xlu0 %3446  ;;  %v3057_v45 = vpop.permute.xlu1 %3056 }
0x2499   : > { %3458 = vst.msk [vmem:[#allocation2] sm:$0xff] %vm1666_vm13, %v3447_v44 }
0x249a   : > { %3065 = vst.msk [vmem:[#allocation2 + $0x18] sm:$0x1] %vm5941_vm1, %v3057_v45 }
0x249c   : > { %v3451_v46 = vpop.permute.xlu0 %3450  ;;  %v3251_v47 = vpop.permute.xlu1 %3250 }
0x249d   : > { %3460 = vst.msk [vmem:[#allocation2 + $0x10] sm:$0xff] %vm1666_vm13, %v3451_v46 }
0x249e   : > { %3261 = vst.msk [vmem:[#allocation2 + $0x8] sm:$0xff] %vm1466_vm11, %v3251_v47 }
0x24a0   : > { %v3645_v48 = vpop.permute.xlu0 %3644  ;;  %v3255_v49 = vpop.permute.xlu1 %3254 }
0x24a1   : > { %3656 = vst.msk [vmem:[#allocation2] sm:$0xff] %vm1866_vm15, %v3645_v48 }
0x24a2   : > { %3263 = vst.msk [vmem:[#allocation2 + $0x18] sm:$0x1] %vm1470_vm4, %v3255_v49 }
0x24a4   : > { %v3649_v50 = vpop.permute.xlu0 %3648  ;;  %v3449_v58 = vpop.permute.xlu1 %3448 }
0x24a5   : > { %3658 = vst.msk [vmem:[#allocation2 + $0x10] sm:$0xff] %vm1866_vm15, %v3649_v50 }
0x24a6   : > { %3459 = vst.msk [vmem:[#allocation2 + $0x8] sm:$0xff] %vm1666_vm13, %v3449_v58 }
0x24a8   : > { %v3453_v59 = vpop.permute.xlu1 %3452 }
0x24a9   : > { %3461 = vst.msk [vmem:[#allocation2 + $0x18] sm:$0x1] %vm5942_vm2, %v3453_v59 }
0x24ac   : > { %v3647_v60 = vpop.permute.xlu1 %3646 }
0x24ad   : > { %3657 = vst.msk [vmem:[#allocation2 + $0x8] sm:$0xff] %vm1866_vm15, %v3647_v60 }
0x24b0   : > { %v3651_v61 = vpop.permute.xlu1 %3650 }
0x24b1   : > { %3659 = vst.msk [vmem:[#allocation2 + $0x18] sm:$0x1] %vm5943_vm3, %v3651_v61 }
0x254c   : > { %v4574_v1 = vpop.f32.mrf.mxu1 }
0x254e   : > { %v3823_v2 = vpop.f32.mrf.mxu1 }
0x254f   : > { %3842 = vrot.lane.b32.xlu0 %v3823_v2, %s4953_s14 }
0x2550   : > { %v4575_v3 = vpop.f32.mrf.mxu1 }
0x2552   : > { %v3826_v4 = vpop.f32.mrf.mxu1 }
0x2553   : > { %3846 = vrot.lane.b32.xlu0 %v4574_v1, %s4953_s14  ;;  %3844 = vrot.lane.b32.xlu1 %v3826_v4, %s4953_s14 }
0x2557   : > { %3848 = vrot.lane.b32.xlu1 %v4575_v3, %s4953_s14 }
0x25c1   : > { %v3843_v10 = vpop.permute.xlu0 %3842 }
0x25c2   : > { %3854 = vst.msk [vmem:[#allocation2] sm:$0xff] %vm2066_vm14, %v3843_v10 }
0x25c5   : > { %v3847_v27 = vpop.permute.xlu0 %3846  ;;  %v3845_v17 = vpop.permute.xlu1 %3844 }
0x25c6   : > { %3856 = vst.msk [vmem:[#allocation2 + $0x10] sm:$0xff] %vm2066_vm14, %v3847_v27  ;;  %3855 = vst.msk [vmem:[#allocation2 + $0x8] sm:$0xff] %vm2066_vm14, %v3845_v17 }
0x25c9   : > { %v3849_v28 = vpop.permute.xlu1 %3848  ;;  %v3858_v31 = vld [vmem:[#allocation2] sm:$0xff] }
0x25ca   : > { %3857 = vst.msk [vmem:[#allocation2 + $0x18] sm:$0x1] %vm2070_vm5, %v3849_v28 }
0x25cd   : > { %v3859_v11 = vld [vmem:[#allocation2 + $0x8] sm:$0xff]  ;;  %v3860_v19 = vld [vmem:[#allocation2 + $0x10] sm:$0xff] }
0x25ce   : > { %v3862_v18 = vpack.c.bf16 %v3859_v11, %v3858_v31 }
0x25d0   : > { %4580 = vmatprep.mubr.msk.bf16.mxu1 %vm355_vm0, %v3862_v18 }
0x25d1   : > { %v3861_v20 = vld [vmem:[#allocation2 + $0x18] sm:$0x1] }
0x25d2   : > { %v3863_v21 = vpack.c.bf16 %v3861_v20, %v3860_v19 }
0x25d4   : > { %4581 = vmatmul.mubr.msk.bf16.vlgmr.msra.gmra.mxu1 %vm355_vm0, %v3863_v21 }
0x2694   : > { %v4582_v43 = vpop.f32.mrf.mxu1 }
0x2695   : > { %v3936_v40 = vadd.f32 %v4582_v43, %v4118_v26 }
0x2696   : > { %v3927_v42 = vpop.f32.mrf.mxu1 }
0x2697   : > { %v3944_v5 = vadd.f32 %v4916_v55, %v3936_v40  ;;  %v3928_v6 = vadd.f32 %v4118_v26, %v3927_v42 }
0x2698   : > { %v4583_v33 = vpop.f32.mrf.mxu1 }
0x2699   : > { %v3948_v37 = vadd.f32 %v3944_v5, %v2158_v53  ;;  %v3942_v0 = vadd.f32 %v4918_v38, %v3928_v6  ;;  %v3939_v51 = vadd.f32 %v4583_v33, %v4118_v26 }
0x269a   : > { %v3930_v12 = vpop.f32.mrf.mxu1 }
0x269b   : > { %3952 = vst.msk [vmem:[%s325_s24 + $0x10] sm:$0xff] %vm355_vm0, %v3948_v37  ;;  %v3946_v7 = vadd.f32 %v3942_v0, %v2156_v25  ;;  %v3945_v13 = vadd.f32 %v4920_v29, %v3939_v51  ;;  %v3931_v14 = vadd.f32 %v4118_v26, %v3930_v12 }
0x269d   : > { %3950 = vst.msk [vmem:[%s325_s24] sm:$0xff] %vm355_vm0, %v3946_v7  ;;  %v3949_v34 = vadd.f32 %v3945_v13, %v2159_v57  ;;  %v3943_v8 = vadd.f32 %v4922_v35, %v3931_v14 }
0x269f   : > { %3954 = vst.msk [vmem:[%s325_s24 + $0x18] sm:$0x1] %vm3953_vm6, %v3949_v34  ;;  %v3947_v9 = vadd.f32 %v3943_v8, %v2157_v15 }
0x26a1   : > { %3951 = vst.msk [vmem:[%s325_s24 + $0x8] sm:$0xff] %vm355_vm0, %v3947_v9 }
0x26a2 PF: > { %s18_s27 = sadd.s32 1, %s4929_s27  }
0x26a3   : > { %p15_p4 = scmp.ge.s32.totalorder %s18_s27, 4  }
0x26a5   :  { %17 = sbr.rel (!%p15_p4) target bundleno = 1 (0x1), region = 85 }

</bundles_post_ra>
